<compile_context>
chip_gen: v5e
topology: v5e:2x2
jax: 0.10.0
libtpu: 0.0.40
codegen_flags: <defaults>
</compile_context>

<pallas_src>
import functools

import jax
import jax.numpy as jnp
from jax.experimental import pallas as pl
from jax.experimental.pallas import tpu as pltpu

_WPAD = 8  # left/right halo padding along W inside the VMEM scratch (sublane-aligned interior)


def _double_conv_kernel(x_ref, w1_ref, s1_ref, b1_ref, w2_ref, s2_ref, b2_ref,
                        out_ref, pad1_ref, pad2_ref, *, H, W, c_in, c_mid):
    """Fused (conv3x3 -> scale/bias -> ReLU) x 2 for one image.

    x_ref   : (1, H, W, c_in)      VMEM input block (NHWC)
    w1_ref  : (3, 3, c_in, c_mid)  conv1 weights (HWIO)
    s1_ref, b1_ref : (1, c_mid)    folded BN1 scale / bias
    w2_ref  : (3, 3, c_mid, c_mid) conv2 weights (HWIO)
    s2_ref, b2_ref : (1, c_mid)    folded BN2 scale / bias
    out_ref : (1, H, W, c_mid)     output block (NHWC)
    pad1_ref: (H+2, W+2*_WPAD, c_in)   zero-padded halo scratch for conv1
    pad2_ref: (H+2, W+2*_WPAD, c_mid)  zero-padded halo scratch for conv2
    """
    # Zero the halo buffers every step (scratch is per-core & uninitialized;
    # required for correctness when the batch axis is split across cores).
    pad1_ref[...] = jnp.zeros_like(pad1_ref)
    pad2_ref[...] = jnp.zeros_like(pad2_ref)

    # Place the input into the interior. W-offset = _WPAD (multiple of 8) so the
    # store is sublane-aligned; the H-offset is a leading-dim offset (free).
    pad1_ref[1:H + 1, _WPAD:_WPAD + W, :] = x_ref[0]

    def conv3x3(src_ref, w_ref, c):
        """3x3 same-padding cross-correlation as 9 shifted MXU matmuls."""
        c_out = w_ref.shape[-1]
        acc = jnp.zeros((H * W, c_out), jnp.float32)
        for ky in range(3):
            for kx in range(3):
                patch = src_ref[ky:ky + H, _WPAD - 1 + kx:_WPAD - 1 + kx + W, :]
                patch2d = patch.reshape(H * W, c)
                acc = acc + jnp.dot(patch2d, w_ref[ky, kx],
                                    preferred_element_type=jnp.float32)
        return acc

    # conv1 + folded BN1 + ReLU (intermediate stays resident in VMEM)
    y1 = conv3x3(pad1_ref, w1_ref, c_in)
    y1 = jnp.maximum(y1 * s1_ref[...] + b1_ref[...], 0.0)
    pad2_ref[1:H + 1, _WPAD:_WPAD + W, :] = y1.reshape(H, W, c_mid)

    # conv2 + folded BN2 + ReLU
    y2 = conv3x3(pad2_ref, w2_ref, c_mid)
    y2 = jnp.maximum(y2 * s2_ref[...] + b2_ref[...], 0.0)
    out_ref[0] = y2.reshape(H, W, c_mid).astype(out_ref.dtype)


def double_conv_forward(x, params, *, eps=1e-5):
    """inconv / double_conv forward.  x is NCHW; returns NCHW float32."""
    (w1, bconv1, g1, beta1, m1, v1,
     w2, bconv2, g2, beta2, m2, v2) = params

    N, c_in, H, W = x.shape
    c_mid = w1.shape[0]

    # Fold conv bias + inference BatchNorm into per-channel scale & bias.
    s1 = g1 / jnp.sqrt(v1 + eps)
    b1 = beta1 + s1 * (bconv1 - m1)
    s2 = g2 / jnp.sqrt(v2 + eps)
    b2 = beta2 + s2 * (bconv2 - m2)

    x_nhwc = jnp.transpose(x, (0, 2, 3, 1)).astype(jnp.float32)
    w1_hwio = jnp.transpose(w1, (2, 3, 1, 0)).astype(jnp.float32)   # (3,3,cin,cmid)
    w2_hwio = jnp.transpose(w2, (2, 3, 1, 0)).astype(jnp.float32)   # (3,3,cmid,cmid)

    kernel = functools.partial(_double_conv_kernel,
                               H=H, W=W, c_in=c_in, c_mid=c_mid)

    out_nhwc = pl.pallas_call(
        kernel,
        out_shape=jax.ShapeDtypeStruct((N, H, W, c_mid), jnp.float32),
        grid_spec=pltpu.PrefetchScalarGridSpec(
            num_scalar_prefetch=0,
            grid=(N,),
            in_specs=[
                pl.BlockSpec((1, H, W, c_in), lambda n: (n, 0, 0, 0)),
                pl.BlockSpec((3, 3, c_in, c_mid), lambda n: (0, 0, 0, 0)),
                pl.BlockSpec((1, c_mid), lambda n: (0, 0)),
                pl.BlockSpec((1, c_mid), lambda n: (0, 0)),
                pl.BlockSpec((3, 3, c_mid, c_mid), lambda n: (0, 0, 0, 0)),
                pl.BlockSpec((1, c_mid), lambda n: (0, 0)),
                pl.BlockSpec((1, c_mid), lambda n: (0, 0)),
            ],
            out_specs=pl.BlockSpec((1, H, W, c_mid), lambda n: (n, 0, 0, 0)),
            scratch_shapes=[
                pltpu.VMEM((H + 2, W + 2 * _WPAD, c_in), jnp.float32),
                pltpu.VMEM((H + 2, W + 2 * _WPAD, c_mid), jnp.float32),
            ],
        ),
        compiler_params=pltpu.CompilerParams(
            dimension_semantics=("parallel",),
        ),
    )(x_nhwc, w1_hwio,
      s1.reshape(1, c_mid).astype(jnp.float32),
      b1.reshape(1, c_mid).astype(jnp.float32),
      w2_hwio,
      s2.reshape(1, c_mid).astype(jnp.float32),
      b2.reshape(1, c_mid).astype(jnp.float32))

    return jnp.transpose(out_nhwc, (0, 3, 1, 2))  # back to NCHW


def _double_conv_ref(x, params, eps=1e-5):
    """Pure-JAX reference matching PyTorch Conv2d(3,pad=1)+BN(eval)+ReLU twice."""
    (w1, bconv1, g1, beta1, m1, v1,
     w2, bconv2, g2, beta2, m2, v2) = params

    def block(x, w, bconv, g, beta, m, v):
        y = jax.lax.conv_general_dilated(
            x, w, window_strides=(1, 1), padding=((1, 1), (1, 1)),
            dimension_numbers=("NCHW", "OIHW", "NCHW"),
            precision=jax.lax.Precision.HIGHEST)
        y = y + bconv[None, :, None, None]
        y = (y - m[None, :, None, None]) / jnp.sqrt(v[None, :, None, None] + eps)
        y = y * g[None, :, None, None] + beta[None, :, None, None]
        return jnp.maximum(y, 0.0)

    y = block(x, w1, bconv1, g1, beta1, m1, v1)
    y = block(y, w2, bconv2, g2, beta2, m2, v2)
    return y


if __name__ == "__main__":
    key = jax.random.PRNGKey(0)
    keys = jax.random.split(key, 13)

    N, c_in, c_out, H, W = 2, 4, 8, 16, 16

    x = jax.random.normal(keys[0], (N, c_in, H, W), dtype=jnp.float32)

    w1 = 0.2 * jax.random.normal(keys[1], (c_out, c_in, 3, 3), jnp.float32)
    bconv1 = 0.1 * jax.random.normal(keys[2], (c_out,), jnp.float32)
    g1 = 1.0 + 0.1 * jax.random.normal(keys[3], (c_out,), jnp.float32)
    beta1 = 0.1 * jax.random.normal(keys[4], (c_out,), jnp.float32)
    m1 = 0.1 * jax.random.normal(keys[5], (c_out,), jnp.float32)
    v1 = 1.0 + 0.1 * jax.random.uniform(keys[6], (c_out,), jnp.float32)

    w2 = 0.2 * jax.random.normal(keys[7], (c_out, c_out, 3, 3), jnp.float32)
    bconv2 = 0.1 * jax.random.normal(keys[8], (c_out,), jnp.float32)
    g2 = 1.0 + 0.1 * jax.random.normal(keys[9], (c_out,), jnp.float32)
    beta2 = 0.1 * jax.random.normal(keys[10], (c_out,), jnp.float32)
    m2 = 0.1 * jax.random.normal(keys[11], (c_out,), jnp.float32)
    v2 = 1.0 + 0.1 * jax.random.uniform(keys[12], (c_out,), jnp.float32)

    params = (w1, bconv1, g1, beta1, m1, v1,
              w2, bconv2, g2, beta2, m2, v2)

    out = double_conv_forward(x, params)
    out = jax.block_until_ready(out)

    ref = _double_conv_ref(x, params)
    assert out.shape == (N, c_out, H, W), out.shape
    max_err = float(jnp.max(jnp.abs(out - ref)))
    assert jnp.allclose(out, ref, atol=1e-2, rtol=1e-2), max_err

    print("KERNEL_OK")
</pallas_src>

<mosaic_0001>
module attributes {stable_mosaic.version = 11 : i64} {
  func.func @_double_conv_kernel(%arg0: i32, %arg1: memref<1x16x16x4xf32, #tpu.memory_space<vmem>>, %arg2: memref<3x3x4x8xf32, #tpu.memory_space<vmem>>, %arg3: memref<1x8xf32, #tpu.memory_space<vmem>>, %arg4: memref<1x8xf32, #tpu.memory_space<vmem>>, %arg5: memref<3x3x8x8xf32, #tpu.memory_space<vmem>>, %arg6: memref<1x8xf32, #tpu.memory_space<vmem>>, %arg7: memref<1x8xf32, #tpu.memory_space<vmem>>, %arg8: memref<1x16x16x8xf32, #tpu.memory_space<vmem>>, %arg9: memref<18x32x4xf32, #tpu.memory_space<vmem>>, %arg10: memref<18x32x8xf32, #tpu.memory_space<vmem>>) attributes {dimension_semantics = [#tpu.dimension_semantics<parallel>], iteration_bounds = array<i64: 2>, scalar_prefetch = 0 : i64, scratch_operands = 2 : i64, tpu.core_type = #tpu.core_type<tc>, window_params = [{transform_indices = @transform_0, window_bounds = array<i64: 1, 16, 16, 4>}, {pipeline_mode = #tpu.pipeline_mode<synchronous>, transform_indices = @transform_1, window_bounds = array<i64: 3, 3, 4, 8>}, {pipeline_mode = #tpu.pipeline_mode<synchronous>, transform_indices = @transform_2, window_bounds = array<i64: 1, 8>}, {pipeline_mode = #tpu.pipeline_mode<synchronous>, transform_indices = @transform_3, window_bounds = array<i64: 1, 8>}, {pipeline_mode = #tpu.pipeline_mode<synchronous>, transform_indices = @transform_4, window_bounds = array<i64: 3, 3, 8, 8>}, {pipeline_mode = #tpu.pipeline_mode<synchronous>, transform_indices = @transform_5, window_bounds = array<i64: 1, 8>}, {pipeline_mode = #tpu.pipeline_mode<synchronous>, transform_indices = @transform_6, window_bounds = array<i64: 1, 8>}, {transform_indices = @transform_7, window_bounds = array<i64: 1, 16, 16, 8>}]} {
    %cst = arith.constant 0.000000e+00 : f32
    %0 = vector.broadcast %cst : f32 to vector<18x32x4xf32>
    %c0 = arith.constant 0 : index
    %c0_0 = arith.constant 0 : index
    %c0_1 = arith.constant 0 : index
    %1 = vector.load %arg9[%c0, %c0_0, %c0_1] : memref<18x32x4xf32, #tpu.memory_space<vmem>>, vector<18x32x4xf32>
    tpu.vector_store %arg9[%c0, %c0_0, %c0_1], %0 {strides = array<i32>} : memref<18x32x4xf32, #tpu.memory_space<vmem>>, vector<18x32x4xf32>,
    %cst_2 = arith.constant 0.000000e+00 : f32
    %2 = vector.broadcast %cst_2 : f32 to vector<18x32x8xf32>
    %c0_3 = arith.constant 0 : index
    %c0_4 = arith.constant 0 : index
    %c0_5 = arith.constant 0 : index
    %3 = vector.load %arg10[%c0_3, %c0_4, %c0_5] : memref<18x32x8xf32, #tpu.memory_space<vmem>>, vector<18x32x8xf32>
    tpu.vector_store %arg10[%c0_3, %c0_4, %c0_5], %2 {strides = array<i32>} : memref<18x32x8xf32, #tpu.memory_space<vmem>>, vector<18x32x8xf32>,
    %c0_6 = arith.constant 0 : index
    %c0_7 = arith.constant 0 : index
    %c0_8 = arith.constant 0 : index
    %c0_9 = arith.constant 0 : index
    %4 = vector.load %arg1[%c0_6, %c0_7, %c0_8, %c0_9] : memref<1x16x16x4xf32, #tpu.memory_space<vmem>>, vector<1x16x16x4xf32>
    %5 = vector.shape_cast %4 : vector<1x16x16x4xf32> to vector<16x16x4xf32>
    %c1 = arith.constant 1 : index
    %c8 = arith.constant 8 : index
    %c0_10 = arith.constant 0 : index
    %6 = vector.load %arg9[%c1, %c8, %c0_10] : memref<18x32x4xf32, #tpu.memory_space<vmem>>, vector<16x16x4xf32>
    tpu.vector_store %arg9[%c1, %c8, %c0_10], %5 {strides = array<i32>} : memref<18x32x4xf32, #tpu.memory_space<vmem>>, vector<16x16x4xf32>,
    %cst_11 = arith.constant 0.000000e+00 : f32
    %7 = vector.broadcast %cst_11 : f32 to vector<256x8xf32>
    %c0_12 = arith.constant 0 : index
    %c7 = arith.constant 7 : index
    %c0_13 = arith.constant 0 : index
    %8 = vector.load %arg9[%c0_12, %c7, %c0_13] : memref<18x32x4xf32, #tpu.memory_space<vmem>>, vector<16x16x4xf32>
    %9 = vector.shape_cast %8 : vector<16x16x4xf32> to vector<256x4xf32>
    %c0_14 = arith.constant 0 : index
    %c0_15 = arith.constant 0 : index
    %c0_16 = arith.constant 0 : index
    %c0_17 = arith.constant 0 : index
    %10 = vector.load %arg2[%c0_14, %c0_15, %c0_16, %c0_17] : memref<3x3x4x8xf32, #tpu.memory_space<vmem>>, vector<1x1x4x8xf32>
    %11 = vector.shape_cast %10 : vector<1x1x4x8xf32> to vector<4x8xf32>
    %cst_18 = arith.constant dense<0.000000e+00> : vector<256x8xf32>
    %12 = tpu.matmul %9, %11, %cst_18 {dimension_numbers = #tpu.dot_dimension_numbers<[1], [0], [0], [1], [0, 0, 1, 1], [], []>} : vector<256x4xf32>, vector<4x8xf32>, vector<256x8xf32> -> vector<256x8xf32>
    %13 = arith.addf %7, %12 : vector<256x8xf32>
    %c0_19 = arith.constant 0 : index
    %c8_20 = arith.constant 8 : index
    %c0_21 = arith.constant 0 : index
    %14 = vector.load %arg9[%c0_19, %c8_20, %c0_21] : memref<18x32x4xf32, #tpu.memory_space<vmem>>, vector<16x16x4xf32>
    %15 = vector.shape_cast %14 : vector<16x16x4xf32> to vector<256x4xf32>
    %c0_22 = arith.constant 0 : index
    %c1_23 = arith.constant 1 : index
    %c0_24 = arith.constant 0 : index
    %c0_25 = arith.constant 0 : index
    %16 = vector.load %arg2[%c0_22, %c1_23, %c0_24, %c0_25] : memref<3x3x4x8xf32, #tpu.memory_space<vmem>>, vector<1x1x4x8xf32>
    %17 = vector.shape_cast %16 : vector<1x1x4x8xf32> to vector<4x8xf32>
    %cst_26 = arith.constant dense<0.000000e+00> : vector<256x8xf32>
    %18 = tpu.matmul %15, %17, %cst_26 {dimension_numbers = #tpu.dot_dimension_numbers<[1], [0], [0], [1], [0, 0, 1, 1], [], []>} : vector<256x4xf32>, vector<4x8xf32>, vector<256x8xf32> -> vector<256x8xf32>
    %19 = arith.addf %13, %18 : vector<256x8xf32>
    %c0_27 = arith.constant 0 : index
    %c9 = arith.constant 9 : index
    %c0_28 = arith.constant 0 : index
    %20 = vector.load %arg9[%c0_27, %c9, %c0_28] : memref<18x32x4xf32, #tpu.memory_space<vmem>>, vector<16x16x4xf32>
    %21 = vector.shape_cast %20 : vector<16x16x4xf32> to vector<256x4xf32>
    %c0_29 = arith.constant 0 : index
    %c2 = arith.constant 2 : index
    %c0_30 = arith.constant 0 : index
    %c0_31 = arith.constant 0 : index
    %22 = vector.load %arg2[%c0_29, %c2, %c0_30, %c0_31] : memref<3x3x4x8xf32, #tpu.memory_space<vmem>>, vector<1x1x4x8xf32>
    %23 = vector.shape_cast %22 : vector<1x1x4x8xf32> to vector<4x8xf32>
    %cst_32 = arith.constant dense<0.000000e+00> : vector<256x8xf32>
    %24 = tpu.matmul %21, %23, %cst_32 {dimension_numbers = #tpu.dot_dimension_numbers<[1], [0], [0], [1], [0, 0, 1, 1], [], []>} : vector<256x4xf32>, vector<4x8xf32>, vector<256x8xf32> -> vector<256x8xf32>
    %25 = arith.addf %19, %24 : vector<256x8xf32>
    %c1_33 = arith.constant 1 : index
    %c7_34 = arith.constant 7 : index
    %c0_35 = arith.constant 0 : index
    %26 = vector.load %arg9[%c1_33, %c7_34, %c0_35] : memref<18x32x4xf32, #tpu.memory_space<vmem>>, vector<16x16x4xf32>
    %27 = vector.shape_cast %26 : vector<16x16x4xf32> to vector<256x4xf32>
    %c1_36 = arith.constant 1 : index
    %c0_37 = arith.constant 0 : index
    %c0_38 = arith.constant 0 : index
    %c0_39 = arith.constant 0 : index
    %28 = vector.load %arg2[%c1_36, %c0_37, %c0_38, %c0_39] : memref<3x3x4x8xf32, #tpu.memory_space<vmem>>, vector<1x1x4x8xf32>
    %29 = vector.shape_cast %28 : vector<1x1x4x8xf32> to vector<4x8xf32>
    %cst_40 = arith.constant dense<0.000000e+00> : vector<256x8xf32>
    %30 = tpu.matmul %27, %29, %cst_40 {dimension_numbers = #tpu.dot_dimension_numbers<[1], [0], [0], [1], [0, 0, 1, 1], [], []>} : vector<256x4xf32>, vector<4x8xf32>, vector<256x8xf32> -> vector<256x8xf32>
    %31 = arith.addf %25, %30 : vector<256x8xf32>
    %c1_41 = arith.constant 1 : index
    %c8_42 = arith.constant 8 : index
    %c0_43 = arith.constant 0 : index
    %32 = vector.load %arg9[%c1_41, %c8_42, %c0_43] : memref<18x32x4xf32, #tpu.memory_space<vmem>>, vector<16x16x4xf32>
    %33 = vector.shape_cast %32 : vector<16x16x4xf32> to vector<256x4xf32>
    %c1_44 = arith.constant 1 : index
    %c1_45 = arith.constant 1 : index
    %c0_46 = arith.constant 0 : index
    %c0_47 = arith.constant 0 : index
    %34 = vector.load %arg2[%c1_44, %c1_45, %c0_46, %c0_47] : memref<3x3x4x8xf32, #tpu.memory_space<vmem>>, vector<1x1x4x8xf32>
    %35 = vector.shape_cast %34 : vector<1x1x4x8xf32> to vector<4x8xf32>
    %cst_48 = arith.constant dense<0.000000e+00> : vector<256x8xf32>
    %36 = tpu.matmul %33, %35, %cst_48 {dimension_numbers = #tpu.dot_dimension_numbers<[1], [0], [0], [1], [0, 0, 1, 1], [], []>} : vector<256x4xf32>, vector<4x8xf32>, vector<256x8xf32> -> vector<256x8xf32>
    %37 = arith.addf %31, %36 : vector<256x8xf32>
    %c1_49 = arith.constant 1 : index
    %c9_50 = arith.constant 9 : index
    %c0_51 = arith.constant 0 : index
    %38 = vector.load %arg9[%c1_49, %c9_50, %c0_51] : memref<18x32x4xf32, #tpu.memory_space<vmem>>, vector<16x16x4xf32>
    %39 = vector.shape_cast %38 : vector<16x16x4xf32> to vector<256x4xf32>
    %c1_52 = arith.constant 1 : index
    %c2_53 = arith.constant 2 : index
    %c0_54 = arith.constant 0 : index
    %c0_55 = arith.constant 0 : index
    %40 = vector.load %arg2[%c1_52, %c2_53, %c0_54, %c0_55] : memref<3x3x4x8xf32, #tpu.memory_space<vmem>>, vector<1x1x4x8xf32>
    %41 = vector.shape_cast %40 : vector<1x1x4x8xf32> to vector<4x8xf32>
    %cst_56 = arith.constant dense<0.000000e+00> : vector<256x8xf32>
    %42 = tpu.matmul %39, %41, %cst_56 {dimension_numbers = #tpu.dot_dimension_numbers<[1], [0], [0], [1], [0, 0, 1, 1], [], []>} : vector<256x4xf32>, vector<4x8xf32>, vector<256x8xf32> -> vector<256x8xf32>
    %43 = arith.addf %37, %42 : vector<256x8xf32>
    %c2_57 = arith.constant 2 : index
    %c7_58 = arith.constant 7 : index
    %c0_59 = arith.constant 0 : index
    %44 = vector.load %arg9[%c2_57, %c7_58, %c0_59] : memref<18x32x4xf32, #tpu.memory_space<vmem>>, vector<16x16x4xf32>
    %45 = vector.shape_cast %44 : vector<16x16x4xf32> to vector<256x4xf32>
    %c2_60 = arith.constant 2 : index
    %c0_61 = arith.constant 0 : index
    %c0_62 = arith.constant 0 : index
    %c0_63 = arith.constant 0 : index
    %46 = vector.load %arg2[%c2_60, %c0_61, %c0_62, %c0_63] : memref<3x3x4x8xf32, #tpu.memory_space<vmem>>, vector<1x1x4x8xf32>
    %47 = vector.shape_cast %46 : vector<1x1x4x8xf32> to vector<4x8xf32>
    %cst_64 = arith.constant dense<0.000000e+00> : vector<256x8xf32>
    %48 = tpu.matmul %45, %47, %cst_64 {dimension_numbers = #tpu.dot_dimension_numbers<[1], [0], [0], [1], [0, 0, 1, 1], [], []>} : vector<256x4xf32>, vector<4x8xf32>, vector<256x8xf32> -> vector<256x8xf32>
    %49 = arith.addf %43, %48 : vector<256x8xf32>
    %c2_65 = arith.constant 2 : index
    %c8_66 = arith.constant 8 : index
    %c0_67 = arith.constant 0 : index
    %50 = vector.load %arg9[%c2_65, %c8_66, %c0_67] : memref<18x32x4xf32, #tpu.memory_space<vmem>>, vector<16x16x4xf32>
    %51 = vector.shape_cast %50 : vector<16x16x4xf32> to vector<256x4xf32>
    %c2_68 = arith.constant 2 : index
    %c1_69 = arith.constant 1 : index
    %c0_70 = arith.constant 0 : index
    %c0_71 = arith.constant 0 : index
    %52 = vector.load %arg2[%c2_68, %c1_69, %c0_70, %c0_71] : memref<3x3x4x8xf32, #tpu.memory_space<vmem>>, vector<1x1x4x8xf32>
    %53 = vector.shape_cast %52 : vector<1x1x4x8xf32> to vector<4x8xf32>
    %cst_72 = arith.constant dense<0.000000e+00> : vector<256x8xf32>
    %54 = tpu.matmul %51, %53, %cst_72 {dimension_numbers = #tpu.dot_dimension_numbers<[1], [0], [0], [1], [0, 0, 1, 1], [], []>} : vector<256x4xf32>, vector<4x8xf32>, vector<256x8xf32> -> vector<256x8xf32>
    %55 = arith.addf %49, %54 : vector<256x8xf32>
    %c2_73 = arith.constant 2 : index
    %c9_74 = arith.constant 9 : index
    %c0_75 = arith.constant 0 : index
    %56 = vector.load %arg9[%c2_73, %c9_74, %c0_75] : memref<18x32x4xf32, #tpu.memory_space<vmem>>, vector<16x16x4xf32>
    %57 = vector.shape_cast %56 : vector<16x16x4xf32> to vector<256x4xf32>
    %c2_76 = arith.constant 2 : index
    %c2_77 = arith.constant 2 : index
    %c0_78 = arith.constant 0 : index
    %c0_79 = arith.constant 0 : index
    %58 = vector.load %arg2[%c2_76, %c2_77, %c0_78, %c0_79] : memref<3x3x4x8xf32, #tpu.memory_space<vmem>>, vector<1x1x4x8xf32>
    %59 = vector.shape_cast %58 : vector<1x1x4x8xf32> to vector<4x8xf32>
    %cst_80 = arith.constant dense<0.000000e+00> : vector<256x8xf32>
    %60 = tpu.matmul %57, %59, %cst_80 {dimension_numbers = #tpu.dot_dimension_numbers<[1], [0], [0], [1], [0, 0, 1, 1], [], []>} : vector<256x4xf32>, vector<4x8xf32>, vector<256x8xf32> -> vector<256x8xf32>
    %61 = arith.addf %55, %60 : vector<256x8xf32>
    %c0_81 = arith.constant 0 : index
    %c0_82 = arith.constant 0 : index
    %62 = vector.load %arg3[%c0_81, %c0_82] : memref<1x8xf32, #tpu.memory_space<vmem>>, vector<1x8xf32>
    %63 = vector.broadcast %62 : vector<1x8xf32> to vector<256x8xf32>
    %64 = arith.mulf %61, %63 : vector<256x8xf32>
    %c0_83 = arith.constant 0 : index
    %c0_84 = arith.constant 0 : index
    %65 = vector.load %arg4[%c0_83, %c0_84] : memref<1x8xf32, #tpu.memory_space<vmem>>, vector<1x8xf32>
    %66 = vector.broadcast %65 : vector<1x8xf32> to vector<256x8xf32>
    %67 = arith.addf %64, %66 : vector<256x8xf32>
    %cst_85 = arith.constant 0.000000e+00 : f32
    %68 = vector.broadcast %cst_85 : f32 to vector<256x8xf32>
    %69 = arith.maximumf %67, %68 : vector<256x8xf32>
    %70 = vector.shape_cast %69 : vector<256x8xf32> to vector<16x16x8xf32>
    %c1_86 = arith.constant 1 : index
    %c8_87 = arith.constant 8 : index
    %c0_88 = arith.constant 0 : index
    %71 = vector.load %arg10[%c1_86, %c8_87, %c0_88] : memref<18x32x8xf32, #tpu.memory_space<vmem>>, vector<16x16x8xf32>
    tpu.vector_store %arg10[%c1_86, %c8_87, %c0_88], %70 {strides = array<i32>} : memref<18x32x8xf32, #tpu.memory_space<vmem>>, vector<16x16x8xf32>,
    %cst_89 = arith.constant 0.000000e+00 : f32
    %72 = vector.broadcast %cst_89 : f32 to vector<256x8xf32>
    %c0_90 = arith.constant 0 : index
    %c7_91 = arith.constant 7 : index
    %c0_92 = arith.constant 0 : index
    %73 = vector.load %arg10[%c0_90, %c7_91, %c0_92] : memref<18x32x8xf32, #tpu.memory_space<vmem>>, vector<16x16x8xf32>
    %74 = vector.shape_cast %73 : vector<16x16x8xf32> to vector<256x8xf32>
    %c0_93 = arith.constant 0 : index
    %c0_94 = arith.constant 0 : index
    %c0_95 = arith.constant 0 : index
    %c0_96 = arith.constant 0 : index
    %75 = vector.load %arg5[%c0_93, %c0_94, %c0_95, %c0_96] : memref<3x3x8x8xf32, #tpu.memory_space<vmem>>, vector<1x1x8x8xf32>
    %76 = vector.shape_cast %75 : vector<1x1x8x8xf32> to vector<8x8xf32>
    %cst_97 = arith.constant dense<0.000000e+00> : vector<256x8xf32>
    %77 = tpu.matmul %74, %76, %cst_97 {dimension_numbers = #tpu.dot_dimension_numbers<[1], [0], [0], [1], [0, 0, 1, 1], [], []>} : vector<256x8xf32>, vector<8x8xf32>, vector<256x8xf32> -> vector<256x8xf32>
    %78 = arith.addf %72, %77 : vector<256x8xf32>
    %c0_98 = arith.constant 0 : index
    %c8_99 = arith.constant 8 : index
    %c0_100 = arith.constant 0 : index
    %79 = vector.load %arg10[%c0_98, %c8_99, %c0_100] : memref<18x32x8xf32, #tpu.memory_space<vmem>>, vector<16x16x8xf32>
    %80 = vector.shape_cast %79 : vector<16x16x8xf32> to vector<256x8xf32>
    %c0_101 = arith.constant 0 : index
    %c1_102 = arith.constant 1 : index
    %c0_103 = arith.constant 0 : index
    %c0_104 = arith.constant 0 : index
    %81 = vector.load %arg5[%c0_101, %c1_102, %c0_103, %c0_104] : memref<3x3x8x8xf32, #tpu.memory_space<vmem>>, vector<1x1x8x8xf32>
    %82 = vector.shape_cast %81 : vector<1x1x8x8xf32> to vector<8x8xf32>
    %cst_105 = arith.constant dense<0.000000e+00> : vector<256x8xf32>
    %83 = tpu.matmul %80, %82, %cst_105 {dimension_numbers = #tpu.dot_dimension_numbers<[1], [0], [0], [1], [0, 0, 1, 1], [], []>} : vector<256x8xf32>, vector<8x8xf32>, vector<256x8xf32> -> vector<256x8xf32>
    %84 = arith.addf %78, %83 : vector<256x8xf32>
    %c0_106 = arith.constant 0 : index
    %c9_107 = arith.constant 9 : index
    %c0_108 = arith.constant 0 : index
    %85 = vector.load %arg10[%c0_106, %c9_107, %c0_108] : memref<18x32x8xf32, #tpu.memory_space<vmem>>, vector<16x16x8xf32>
    %86 = vector.shape_cast %85 : vector<16x16x8xf32> to vector<256x8xf32>
    %c0_109 = arith.constant 0 : index
    %c2_110 = arith.constant 2 : index
    %c0_111 = arith.constant 0 : index
    %c0_112 = arith.constant 0 : index
    %87 = vector.load %arg5[%c0_109, %c2_110, %c0_111, %c0_112] : memref<3x3x8x8xf32, #tpu.memory_space<vmem>>, vector<1x1x8x8xf32>
    %88 = vector.shape_cast %87 : vector<1x1x8x8xf32> to vector<8x8xf32>
    %cst_113 = arith.constant dense<0.000000e+00> : vector<256x8xf32>
    %89 = tpu.matmul %86, %88, %cst_113 {dimension_numbers = #tpu.dot_dimension_numbers<[1], [0], [0], [1], [0, 0, 1, 1], [], []>} : vector<256x8xf32>, vector<8x8xf32>, vector<256x8xf32> -> vector<256x8xf32>
    %90 = arith.addf %84, %89 : vector<256x8xf32>
    %c1_114 = arith.constant 1 : index
    %c7_115 = arith.constant 7 : index
    %c0_116 = arith.constant 0 : index
    %91 = vector.load %arg10[%c1_114, %c7_115, %c0_116] : memref<18x32x8xf32, #tpu.memory_space<vmem>>, vector<16x16x8xf32>
    %92 = vector.shape_cast %91 : vector<16x16x8xf32> to vector<256x8xf32>
    %c1_117 = arith.constant 1 : index
    %c0_118 = arith.constant 0 : index
    %c0_119 = arith.constant 0 : index
    %c0_120 = arith.constant 0 : index
    %93 = vector.load %arg5[%c1_117, %c0_118, %c0_119, %c0_120] : memref<3x3x8x8xf32, #tpu.memory_space<vmem>>, vector<1x1x8x8xf32>
    %94 = vector.shape_cast %93 : vector<1x1x8x8xf32> to vector<8x8xf32>
    %cst_121 = arith.constant dense<0.000000e+00> : vector<256x8xf32>
    %95 = tpu.matmul %92, %94, %cst_121 {dimension_numbers = #tpu.dot_dimension_numbers<[1], [0], [0], [1], [0, 0, 1, 1], [], []>} : vector<256x8xf32>, vector<8x8xf32>, vector<256x8xf32> -> vector<256x8xf32>
    %96 = arith.addf %90, %95 : vector<256x8xf32>
    %c1_122 = arith.constant 1 : index
    %c8_123 = arith.constant 8 : index
    %c0_124 = arith.constant 0 : index
    %97 = vector.load %arg10[%c1_122, %c8_123, %c0_124] : memref<18x32x8xf32, #tpu.memory_space<vmem>>, vector<16x16x8xf32>
    %98 = vector.shape_cast %97 : vector<16x16x8xf32> to vector<256x8xf32>
    %c1_125 = arith.constant 1 : index
    %c1_126 = arith.constant 1 : index
    %c0_127 = arith.constant 0 : index
    %c0_128 = arith.constant 0 : index
    %99 = vector.load %arg5[%c1_125, %c1_126, %c0_127, %c0_128] : memref<3x3x8x8xf32, #tpu.memory_space<vmem>>, vector<1x1x8x8xf32>
    %100 = vector.shape_cast %99 : vector<1x1x8x8xf32> to vector<8x8xf32>
    %cst_129 = arith.constant dense<0.000000e+00> : vector<256x8xf32>
    %101 = tpu.matmul %98, %100, %cst_129 {dimension_numbers = #tpu.dot_dimension_numbers<[1], [0], [0], [1], [0, 0, 1, 1], [], []>} : vector<256x8xf32>, vector<8x8xf32>, vector<256x8xf32> -> vector<256x8xf32>
    %102 = arith.addf %96, %101 : vector<256x8xf32>
    %c1_130 = arith.constant 1 : index
    %c9_131 = arith.constant 9 : index
    %c0_132 = arith.constant 0 : index
    %103 = vector.load %arg10[%c1_130, %c9_131, %c0_132] : memref<18x32x8xf32, #tpu.memory_space<vmem>>, vector<16x16x8xf32>
    %104 = vector.shape_cast %103 : vector<16x16x8xf32> to vector<256x8xf32>
    %c1_133 = arith.constant 1 : index
    %c2_134 = arith.constant 2 : index
    %c0_135 = arith.constant 0 : index
    %c0_136 = arith.constant 0 : index
    %105 = vector.load %arg5[%c1_133, %c2_134, %c0_135, %c0_136] : memref<3x3x8x8xf32, #tpu.memory_space<vmem>>, vector<1x1x8x8xf32>
    %106 = vector.shape_cast %105 : vector<1x1x8x8xf32> to vector<8x8xf32>
    %cst_137 = arith.constant dense<0.000000e+00> : vector<256x8xf32>
    %107 = tpu.matmul %104, %106, %cst_137 {dimension_numbers = #tpu.dot_dimension_numbers<[1], [0], [0], [1], [0, 0, 1, 1], [], []>} : vector<256x8xf32>, vector<8x8xf32>, vector<256x8xf32> -> vector<256x8xf32>
    %108 = arith.addf %102, %107 : vector<256x8xf32>
    %c2_138 = arith.constant 2 : index
    %c7_139 = arith.constant 7 : index
    %c0_140 = arith.constant 0 : index
    %109 = vector.load %arg10[%c2_138, %c7_139, %c0_140] : memref<18x32x8xf32, #tpu.memory_space<vmem>>, vector<16x16x8xf32>
    %110 = vector.shape_cast %109 : vector<16x16x8xf32> to vector<256x8xf32>
    %c2_141 = arith.constant 2 : index
    %c0_142 = arith.constant 0 : index
    %c0_143 = arith.constant 0 : index
    %c0_144 = arith.constant 0 : index
    %111 = vector.load %arg5[%c2_141, %c0_142, %c0_143, %c0_144] : memref<3x3x8x8xf32, #tpu.memory_space<vmem>>, vector<1x1x8x8xf32>
    %112 = vector.shape_cast %111 : vector<1x1x8x8xf32> to vector<8x8xf32>
    %cst_145 = arith.constant dense<0.000000e+00> : vector<256x8xf32>
    %113 = tpu.matmul %110, %112, %cst_145 {dimension_numbers = #tpu.dot_dimension_numbers<[1], [0], [0], [1], [0, 0, 1, 1], [], []>} : vector<256x8xf32>, vector<8x8xf32>, vector<256x8xf32> -> vector<256x8xf32>
    %114 = arith.addf %108, %113 : vector<256x8xf32>
    %c2_146 = arith.constant 2 : index
    %c8_147 = arith.constant 8 : index
    %c0_148 = arith.constant 0 : index
    %115 = vector.load %arg10[%c2_146, %c8_147, %c0_148] : memref<18x32x8xf32, #tpu.memory_space<vmem>>, vector<16x16x8xf32>
    %116 = vector.shape_cast %115 : vector<16x16x8xf32> to vector<256x8xf32>
    %c2_149 = arith.constant 2 : index
    %c1_150 = arith.constant 1 : index
    %c0_151 = arith.constant 0 : index
    %c0_152 = arith.constant 0 : index
    %117 = vector.load %arg5[%c2_149, %c1_150, %c0_151, %c0_152] : memref<3x3x8x8xf32, #tpu.memory_space<vmem>>, vector<1x1x8x8xf32>
    %118 = vector.shape_cast %117 : vector<1x1x8x8xf32> to vector<8x8xf32>
    %cst_153 = arith.constant dense<0.000000e+00> : vector<256x8xf32>
    %119 = tpu.matmul %116, %118, %cst_153 {dimension_numbers = #tpu.dot_dimension_numbers<[1], [0], [0], [1], [0, 0, 1, 1], [], []>} : vector<256x8xf32>, vector<8x8xf32>, vector<256x8xf32> -> vector<256x8xf32>
    %120 = arith.addf %114, %119 : vector<256x8xf32>
    %c2_154 = arith.constant 2 : index
    %c9_155 = arith.constant 9 : index
    %c0_156 = arith.constant 0 : index
    %121 = vector.load %arg10[%c2_154, %c9_155, %c0_156] : memref<18x32x8xf32, #tpu.memory_space<vmem>>, vector<16x16x8xf32>
    %122 = vector.shape_cast %121 : vector<16x16x8xf32> to vector<256x8xf32>
    %c2_157 = arith.constant 2 : index
    %c2_158 = arith.constant 2 : index
    %c0_159 = arith.constant 0 : index
    %c0_160 = arith.constant 0 : index
    %123 = vector.load %arg5[%c2_157, %c2_158, %c0_159, %c0_160] : memref<3x3x8x8xf32, #tpu.memory_space<vmem>>, vector<1x1x8x8xf32>
    %124 = vector.shape_cast %123 : vector<1x1x8x8xf32> to vector<8x8xf32>
    %cst_161 = arith.constant dense<0.000000e+00> : vector<256x8xf32>
    %125 = tpu.matmul %122, %124, %cst_161 {dimension_numbers = #tpu.dot_dimension_numbers<[1], [0], [0], [1], [0, 0, 1, 1], [], []>} : vector<256x8xf32>, vector<8x8xf32>, vector<256x8xf32> -> vector<256x8xf32>
    %126 = arith.addf %120, %125 : vector<256x8xf32>
    %c0_162 = arith.constant 0 : index
    %c0_163 = arith.constant 0 : index
    %127 = vector.load %arg6[%c0_162, %c0_163] : memref<1x8xf32, #tpu.memory_space<vmem>>, vector<1x8xf32>
    %128 = vector.broadcast %127 : vector<1x8xf32> to vector<256x8xf32>
    %129 = arith.mulf %126, %128 : vector<256x8xf32>
    %c0_164 = arith.constant 0 : index
    %c0_165 = arith.constant 0 : index
    %130 = vector.load %arg7[%c0_164, %c0_165] : memref<1x8xf32, #tpu.memory_space<vmem>>, vector<1x8xf32>
    %131 = vector.broadcast %130 : vector<1x8xf32> to vector<256x8xf32>
    %132 = arith.addf %129, %131 : vector<256x8xf32>
    %cst_166 = arith.constant 0.000000e+00 : f32
    %133 = vector.broadcast %cst_166 : f32 to vector<256x8xf32>
    %134 = arith.maximumf %132, %133 : vector<256x8xf32>
    %135 = vector.shape_cast %134 : vector<256x8xf32> to vector<16x16x8xf32>
    %c0_167 = arith.constant 0 : index
    %c0_168 = arith.constant 0 : index
    %c0_169 = arith.constant 0 : index
    %c0_170 = arith.constant 0 : index
    %136 = vector.load %arg8[%c0_167, %c0_168, %c0_169, %c0_170] : memref<1x16x16x8xf32, #tpu.memory_space<vmem>>, vector<1x16x16x8xf32>
    %137 = vector.shape_cast %136 : vector<1x16x16x8xf32> to vector<16x16x8xf32>
    %138 = vector.shape_cast %135 : vector<16x16x8xf32> to vector<1x16x16x8xf32>
    tpu.vector_store %arg8[%c0_167, %c0_168, %c0_169, %c0_170], %138 {strides = array<i32>} : memref<1x16x16x8xf32, #tpu.memory_space<vmem>>, vector<1x16x16x8xf32>,
    return
  }
  func.func @transform_0(%arg0: i32) -> (i32, i32, i32, i32) {
    %c0_i32 = arith.constant 0 : i32
    %c0_i32_0 = arith.constant 0 : i32
    %c0_i32_1 = arith.constant 0 : i32
    %c0_i32_2 = arith.constant 0 : i32
    return %arg0, %c0_i32, %c0_i32_0, %c0_i32_1 : i32, i32, i32, i32
  }
  func.func @transform_1(%arg0: i32) -> (i32, i32, i32, i32) {
    %c0_i32 = arith.constant 0 : i32
    %c0_i32_0 = arith.constant 0 : i32
    %c0_i32_1 = arith.constant 0 : i32
    %c0_i32_2 = arith.constant 0 : i32
    %c0_i32_3 = arith.constant 0 : i32
    return %c0_i32, %c0_i32_0, %c0_i32_1, %c0_i32_2 : i32, i32, i32, i32
  }
  func.func @transform_2(%arg0: i32) -> (i32, i32) {
    %c0_i32 = arith.constant 0 : i32
    %c0_i32_0 = arith.constant 0 : i32
    %c0_i32_1 = arith.constant 0 : i32
    return %c0_i32, %c0_i32_0 : i32, i32
  }
  func.func @transform_3(%arg0: i32) -> (i32, i32) {
    %c0_i32 = arith.constant 0 : i32
    %c0_i32_0 = arith.constant 0 : i32
    %c0_i32_1 = arith.constant 0 : i32
    return %c0_i32, %c0_i32_0 : i32, i32
  }
  func.func @transform_4(%arg0: i32) -> (i32, i32, i32, i32) {
    %c0_i32 = arith.constant 0 : i32
    %c0_i32_0 = arith.constant 0 : i32
    %c0_i32_1 = arith.constant 0 : i32
    %c0_i32_2 = arith.constant 0 : i32
    %c0_i32_3 = arith.constant 0 : i32
    return %c0_i32, %c0_i32_0, %c0_i32_1, %c0_i32_2 : i32, i32, i32, i32
  }
  func.func @transform_5(%arg0: i32) -> (i32, i32) {
    %c0_i32 = arith.constant 0 : i32
    %c0_i32_0 = arith.constant 0 : i32
    %c0_i32_1 = arith.constant 0 : i32
    return %c0_i32, %c0_i32_0 : i32, i32
  }
  func.func @transform_6(%arg0: i32) -> (i32, i32) {
    %c0_i32 = arith.constant 0 : i32
    %c0_i32_0 = arith.constant 0 : i32
    %c0_i32_1 = arith.constant 0 : i32
    return %c0_i32, %c0_i32_0 : i32, i32
  }
  func.func @transform_7(%arg0: i32) -> (i32, i32, i32, i32) {
    %c0_i32 = arith.constant 0 : i32
    %c0_i32_0 = arith.constant 0 : i32
    %c0_i32_1 = arith.constant 0 : i32
    %c0_i32_2 = arith.constant 0 : i32
    return %arg0, %c0_i32, %c0_i32_0, %c0_i32_1 : i32, i32, i32, i32
  }
}

</mosaic_0001>

<bundles_post_ra>
// kernel: tpu_custom_call.1
= control target key start
LH: loop header
LB: loop body
LE: loop exit
PB: predicated region body
PF: predicated region fallthrough
CT: control target
= control target key end

     0   :  { %s6351_s24 = smov 0   ;;  %s9117_s0 = inlined_call_operand.vmem [shape: f32[2,16,16,4], index: 0, kind: input, shape index: {}]   ;;  %s9118_s1 = inlined_call_operand.vmem [shape: f32[3,3,4,8], index: 1, kind: input, shape index: {}]   ;;  %s9119_s2 = inlined_call_operand.vmem [shape: f32[1,8], index: 2, kind: input, shape index: {}]   ;;  %s9120_s3 = inlined_call_operand.vmem [shape: f32[1,8], index: 3, kind: input, shape index: {}]   ;;  %s9121_s4 = inlined_call_operand.vmem [shape: f32[3,3,8,8], index: 4, kind: input, shape index: {}]   ;;  %s9122_s5 = inlined_call_operand.vmem [shape: f32[1,8], index: 5, kind: input, shape index: {}]   ;;  %s9123_s6 = inlined_call_operand.vmem [shape: f32[1,8], index: 6, kind: input, shape index: {}]   ;;  %s9124_s7 = inlined_call_operand.vmem [shape: f32[2,16,16,8], index: 7, kind: output, shape index: {}]  }
   0x1 LB: > { %s5668_s25 = sadd.s32 4294967295, %s6308_s24   ;;  %p5672_p0 = scmp.ge.s32.totalorder %s6308_s24, 1  ;;  %s6308_s24 = sphi %s6351_s24, %s17_s24  }
   0x2   : > { %p237_p1 = scmp.lt.s32.totalorder %s6308_s24, 3 }
   0x4   : > { %p238_p2 = pnand %p5672_p0, %p237_p1 }
   0x6   : > { %241 = sbr.rel (%p238_p2) target bundleno = 1518 (0x5ee), region = 48 }
   0xb   : > { %v5677_v0 = vld [vmem:[%s9118_s1 + $0x4] sm:$0xf]  ;;  %vm653_vm0 = vcmask 1043456   ;;  %vm279_vm1 = vcmask 31744   ;;  %v9125_v1 = vmov 0.0   ;;  %p269_p3 = scmp.lt.s32.totalorder %s5668_s25, 1 }
   0xc   : > { %5678 = vmatpush.msk.msra.mxu0 %vm653_vm0, %v5677_v0  ;;  %281 = vst.msk [vmem:[#allocation2 + $0x8] sm:$0xff] %vm279_vm1, %v9125_v1  ;;  %6282 = vmatpush.msk.msra.mxu2 %vm653_vm0, %v5677_v0  ;;  %v522_v3 = vld [vmem:[%s9118_s1] sm:$0xf]  ;;  %v5744_v4 = vld [vmem:[%s9118_s1 + $0x8] sm:$0xf]  ;;  %vm352_vm2 = vcmask 64512  }
   0xd   : > { %280 = vst.msk [vmem:[#allocation2] sm:$0xff] %vm279_vm1, %v9125_v1  ;;  %6283 = vmatpush.msk.msra.mxu3 %vm653_vm0, %v522_v3  ;;  %5711 = vmatpush.msk.msra.mxu1 %vm653_vm0, %v522_v3  ;;  %v5778_v6 = vld [vmem:[%s9118_s1 + $0xc] sm:$0xf]  ;;  %v5812_v8 = vld [vmem:[%s9118_s1 + $0x10] sm:$0xf]  ;;  %s9425_s25 = smov (!%p269_p3, %s5668_s25), 1 }
   0xe   : > { %282 = vst.msk [vmem:[#allocation2 + $0x10] sm:$0xff] %vm279_vm1, %v9125_v1  ;;  %5745 = vmatpush.msk.msrb.mxu2 %vm653_vm0, %v5744_v4  ;;  %5813 = vmatpush.msk.msrb.mxu0 %vm653_vm0, %v5812_v8  ;;  %s6280_s13 = sshll.u32 %s9425_s25, 8 }
   0xf   : > { %283 = vst.msk [vmem:[#allocation2 + $0x18] sm:$0xff] %vm279_vm1, %v9125_v1  ;;  %5779 = vmatpush.msk.msrb.mxu3 %vm653_vm0, %v5778_v6  ;;  %s6531_s16 = scalar_lea.vmem %s9117_s0, %s6280_s13  ;;  %s8854_s17 = scalar_lea.vmem %s9124_s7, %s6280_s13 }
  0x10   : > { %284 = vst.msk [vmem:[#allocation2 + $0x20] sm:$0xff] %vm279_vm1, %v9125_v1  ;;  %v439_v10 = vld [vmem:[%s6531_s16 + $0x70] sm:$0xff]  ;;  %v440_v11 = vld [vmem:[%s6531_s16 + $0x78] sm:$0xff]  ;;  %v425_v12 = vld [vmem:[%s6531_s16] sm:$0xff] }
  0x11   : > { %285 = vst.msk [vmem:[#allocation2 + $0x28] sm:$0xff] %vm279_vm1, %v9125_v1  ;;  %v441_v13 = vld [vmem:[%s6531_s16 + $0x80] sm:$0xff]  ;;  %v426_v14 = vld [vmem:[%s6531_s16 + $0x8] sm:$0xff]  ;;  %v427_v16 = vld [vmem:[%s6531_s16 + $0x10] sm:$0xff] }
  0x12   : > { %286 = vst.msk [vmem:[#allocation2 + $0x30] sm:$0xff] %vm279_vm1, %v9125_v1  ;;  %v442_v15 = vld [vmem:[%s6531_s16 + $0x88] sm:$0xff]  ;;  %v443_v17 = vld [vmem:[%s6531_s16 + $0x90] sm:$0xff]  ;;  %v428_v18 = vld [vmem:[%s6531_s16 + $0x18] sm:$0xff] }
  0x13   : > { %v523_v2 = vld [vmem:[#allocation2 + $0x8] sm:$0xff]  ;;  %287 = vst.msk [vmem:[#allocation2 + $0x38] sm:$0xff] %vm279_vm1, %v9125_v1  ;;  %v444_v21 = vld [vmem:[%s6531_s16 + $0x98] sm:$0xff]  ;;  %v429_v24 = vld [vmem:[%s6531_s16 + $0x20] sm:$0xff] }
  0x14   : > { %5679 = vmatmul.msk.f32.vlgmr.msra.gmra.mxu0 %vm279_vm1, %v523_v2  ;;  %288 = vst.msk [vmem:[#allocation2 + $0x40] sm:$0xff] %vm279_vm1, %v9125_v1  ;;  %v490_v7 = vld [vmem:[#allocation2 + $0x7] sm:$0xff]  ;;  %v431_v36 = vld [vmem:[%s6531_s16 + $0x30] sm:$0xff]  ;;  %v432_v42 = vld [vmem:[%s6531_s16 + $0x38] sm:$0xff] }
  0x15   : > { %289 = vst.msk [vmem:[#allocation2 + $0x48] sm:$0xff] %vm279_vm1, %v9125_v1  ;;  %v524_v5 = vld [vmem:[#allocation2 + $0x10] sm:$0xff]  ;;  %5712 = vmatmul.msk.f32.vlgmr.msra.gmra.mxu1 %vm279_vm1, %v490_v7  ;;  %v445_v29 = vld [vmem:[%s6531_s16 + $0xa0] sm:$0xff]  ;;  %v430_v30 = vld [vmem:[%s6531_s16 + $0x28] sm:$0xff] }
  0x16   : > { %290 = vst.msk [vmem:[#allocation2 + $0x50] sm:$0xff] %vm279_vm1, %v9125_v1  ;;  %v491_v9 = vld [vmem:[#allocation2 + $0xf] sm:$0xff]  ;;  %v448_v47 = vld [vmem:[%s6531_s16 + $0xb8] sm:$0xff]  ;;  %v433_v48 = vld [vmem:[%s6531_s16 + $0x40] sm:$0xff] }
  0x17   : > { %291 = vst.msk [vmem:[#allocation2 + $0x58] sm:$0xff] %vm279_vm1, %v9125_v1  ;;  %v446_v35 = vld [vmem:[%s6531_s16 + $0xa8] sm:$0xff]  ;;  %v447_v41 = vld [vmem:[%s6531_s16 + $0xb0] sm:$0xff]  ;;  %v449_v53 = vld [vmem:[%s6531_s16 + $0xc0] sm:$0xff] }
  0x18   : > { %292 = vst.msk [vmem:[#allocation2 + $0x60] sm:$0xff] %vm279_vm1, %v9125_v1  ;;  %v434_v54 = vld [vmem:[%s6531_s16 + $0x48] sm:$0xff]  ;;  %v435_v60 = vld [vmem:[%s6531_s16 + $0x50] sm:$0xff]  ;;  %v436_v3 = vld [vmem:[%s6531_s16 + $0x58] sm:$0xff] }
  0x19   : > { %293 = vst.msk [vmem:[#allocation2 + $0x68] sm:$0xff] %vm279_vm1, %v9125_v1  ;;  %v450_v59 = vld [vmem:[%s6531_s16 + $0xc8] sm:$0xff]  ;;  %v451_v2 = vld [vmem:[%s6531_s16 + $0xd0] sm:$0xff]  ;;  %v452_v8 = vld [vmem:[%s6531_s16 + $0xd8] sm:$0xff] }
  0x1a   : > { %294 = vst.msk [vmem:[#allocation2 + $0x70] sm:$0xff] %vm279_vm1, %v9125_v1 }
  0x1b   : > { %295 = vst.msk [vmem:[#allocation2 + $0x78] sm:$0xff] %vm279_vm1, %v9125_v1 }
  0x1c   : > { %296 = vst.msk [vmem:[#allocation2 + $0x80] sm:$0xff] %vm279_vm1, %v9125_v1  ;;  %5680 = vmatmul.msk.f32.gmra.mxu0 %vm279_vm1, %v524_v5 }
  0x1d   : > { %297 = vst.msk [vmem:[#allocation2 + $0x88] sm:$0xff] %vm279_vm1, %v9125_v1  ;;  %5713 = vmatmul.msk.f32.gmra.mxu1 %vm279_vm1, %v491_v9  ;;  %v437_v9 = vld [vmem:[%s6531_s16 + $0x60] sm:$0xff] }
  0x1e   : > { %298 = vst.msk [vmem:[#allocation2 + $0x90] sm:$0xff] %vm279_vm1, %v9125_v1 }
  0x1f   : > { %299 = vst.msk [vmem:[#allocation2 + $0x98] sm:$0xff] %vm279_vm1, %v9125_v1 }
  0x20   : > { %300 = vst.msk [vmem:[#allocation2 + $0xa0] sm:$0xff] %vm279_vm1, %v9125_v1 }
  0x21   : > { %301 = vst.msk [vmem:[#allocation2 + $0xa8] sm:$0xff] %vm279_vm1, %v9125_v1 }
  0x22   : > { %302 = vst.msk [vmem:[#allocation2 + $0xb0] sm:$0xff] %vm279_vm1, %v9125_v1 }
  0x23   : > { %303 = vst.msk [vmem:[#allocation2 + $0xb8] sm:$0xff] %vm279_vm1, %v9125_v1 }
  0x24   : > { %304 = vst.msk [vmem:[#allocation2 + $0xc0] sm:$0xff] %vm279_vm1, %v9125_v1 }
  0x25   : > { %305 = vst.msk [vmem:[#allocation2 + $0xc8] sm:$0xff] %vm279_vm1, %v9125_v1 }
  0x26   : > { %306 = vst.msk [vmem:[#allocation2 + $0xd0] sm:$0xff] %vm279_vm1, %v9125_v1 }
  0x27   : > { %307 = vst.msk [vmem:[#allocation2 + $0xd8] sm:$0xff] %vm279_vm1, %v9125_v1 }
  0x28   : > { %308 = vst.msk [vmem:[#allocation2 + $0xe0] sm:$0xff] %vm279_vm1, %v9125_v1 }
  0x29   : > { %309 = vst.msk [vmem:[#allocation2 + $0xe8] sm:$0xff] %vm279_vm1, %v9125_v1 }
  0x2a   : > { %310 = vst.msk [vmem:[#allocation2 + $0xf0] sm:$0xff] %vm279_vm1, %v9125_v1 }
  0x2b   : > { %311 = vst.msk [vmem:[#allocation2 + $0xf8] sm:$0xff] %vm279_vm1, %v9125_v1 }
  0x2c   : > { %312 = vst.msk [vmem:[#allocation2 + $0x100] sm:$0xff] %vm279_vm1, %v9125_v1 }
  0x2d   : > { %313 = vst.msk [vmem:[#allocation2 + $0x108] sm:$0xff] %vm279_vm1, %v9125_v1 }
  0x2e   : > { %314 = vst.msk [vmem:[#allocation2 + $0x110] sm:$0xff] %vm279_vm1, %v9125_v1 }
  0x2f   : > { %315 = vst.msk [vmem:[#allocation2 + $0x118] sm:$0xff] %vm279_vm1, %v9125_v1 }
  0x30   : > { %316 = vst.msk [vmem:[#allocation2 + $0x120] sm:$0xff] %vm279_vm1, %v9125_v1 }
  0x31   : > { %317 = vst.msk [vmem:[#allocation2 + $0x128] sm:$0xff] %vm279_vm1, %v9125_v1 }
  0x32   : > { %318 = vst.msk [vmem:[#allocation2 + $0x130] sm:$0xff] %vm279_vm1, %v9125_v1 }
  0x33   : > { %319 = vst.msk [vmem:[#allocation2 + $0x138] sm:$0xff] %vm279_vm1, %v9125_v1 }
  0x34   : > { %320 = vst.msk [vmem:[#allocation2 + $0x140] sm:$0xff] %vm279_vm1, %v9125_v1 }
  0x35   : > { %321 = vst.msk [vmem:[#allocation2 + $0x148] sm:$0xff] %vm279_vm1, %v9125_v1 }
  0x36   : > { %322 = vst.msk [vmem:[#allocation2 + $0x150] sm:$0xff] %vm279_vm1, %v9125_v1 }
  0x37   : > { %323 = vst.msk [vmem:[#allocation2 + $0x158] sm:$0xff] %vm279_vm1, %v9125_v1 }
  0x38   : > { %324 = vst.msk [vmem:[#allocation2 + $0x160] sm:$0xff] %vm279_vm1, %v9125_v1 }
  0x39   : > { %325 = vst.msk [vmem:[#allocation2 + $0x168] sm:$0xff] %vm279_vm1, %v9125_v1 }
  0x3a   : > { %326 = vst.msk [vmem:[#allocation2 + $0x170] sm:$0xff] %vm279_vm1, %v9125_v1 }
  0x3b   : > { %327 = vst.msk [vmem:[#allocation2 + $0x178] sm:$0xff] %vm279_vm1, %v9125_v1 }
  0x3c   : > { %328 = vst.msk [vmem:[#allocation2 + $0x180] sm:$0xff] %vm279_vm1, %v9125_v1 }
  0x3d   : > { %329 = vst.msk [vmem:[#allocation2 + $0x188] sm:$0xff] %vm279_vm1, %v9125_v1 }
  0x3e   : > { %330 = vst.msk [vmem:[#allocation2 + $0x190] sm:$0xff] %vm279_vm1, %v9125_v1 }
  0x3f   : > { %331 = vst.msk [vmem:[#allocation2 + $0x198] sm:$0xff] %vm279_vm1, %v9125_v1 }
  0x40   : > { %332 = vst.msk [vmem:[#allocation2 + $0x1a0] sm:$0xff] %vm279_vm1, %v9125_v1 }
  0x41   : > { %333 = vst.msk [vmem:[#allocation2 + $0x1a8] sm:$0xff] %vm279_vm1, %v9125_v1 }
  0x42   : > { %334 = vst.msk [vmem:[#allocation2 + $0x1b0] sm:$0xff] %vm279_vm1, %v9125_v1 }
  0x43   : > { %335 = vst.msk [vmem:[#allocation2 + $0x1b8] sm:$0xff] %vm279_vm1, %v9125_v1 }
  0x44   : > { %336 = vst.msk [vmem:[#allocation2 + $0x1c0] sm:$0xff] %vm279_vm1, %v9125_v1 }
  0x45   : > { %337 = vst.msk [vmem:[#allocation2 + $0x1c8] sm:$0xff] %vm279_vm1, %v9125_v1 }
  0x46   : > { %338 = vst.msk [vmem:[#allocation2 + $0x1d0] sm:$0xff] %vm279_vm1, %v9125_v1 }
  0x47   : > { %339 = vst.msk [vmem:[#allocation2 + $0x1d8] sm:$0xff] %vm279_vm1, %v9125_v1 }
  0x48   : > { %340 = vst.msk [vmem:[#allocation2 + $0x1e0] sm:$0xff] %vm279_vm1, %v9125_v1 }
  0x49   : > { %341 = vst.msk [vmem:[#allocation2 + $0x1e8] sm:$0xff] %vm279_vm1, %v9125_v1 }
  0x4a   : > { %342 = vst.msk [vmem:[#allocation2 + $0x1f0] sm:$0xff] %vm279_vm1, %v9125_v1 }
  0x4b   : > { %343 = vst.msk [vmem:[#allocation2 + $0x1f8] sm:$0xff] %vm279_vm1, %v9125_v1 }
  0x4c   : > { %344 = vst.msk [vmem:[#allocation2 + $0x200] sm:$0xff] %vm279_vm1, %v9125_v1 }
  0x4d   : > { %345 = vst.msk [vmem:[#allocation2 + $0x208] sm:$0xff] %vm279_vm1, %v9125_v1 }
  0x4e   : > { %346 = vst.msk [vmem:[#allocation2 + $0x210] sm:$0xff] %vm279_vm1, %v9125_v1 }
  0x4f   : > { %347 = vst.msk [vmem:[#allocation2 + $0x218] sm:$0xff] %vm279_vm1, %v9125_v1 }
  0x50   : > { %348 = vst.msk [vmem:[#allocation2 + $0x220] sm:$0xff] %vm279_vm1, %v9125_v1 }
  0x51   : > { %349 = vst.msk [vmem:[#allocation2 + $0x228] sm:$0xff] %vm279_vm1, %v9125_v1 }
  0x52   : > { %350 = vst.msk [vmem:[#allocation2 + $0x230] sm:$0xff] %vm279_vm1, %v9125_v1 }
  0x53   : > { %351 = vst.msk [vmem:[#allocation2 + $0x238] sm:$0xff] %vm279_vm1, %v9125_v1 }
  0x54   : > { %472 = vst.msk [vmem:[#allocation2 + $0x108] sm:$0xff] %vm279_vm1, %v439_v10 }
  0x55   : > { %473 = vst.msk [vmem:[#allocation2 + $0x110] sm:$0xff] %vm279_vm1, %v440_v11 }
  0x56   : > { %458 = vst.msk [vmem:[#allocation2 + $0x28] sm:$0xff] %vm279_vm1, %v425_v12 }
  0x57   : > { %474 = vst.msk [vmem:[#allocation2 + $0x128] sm:$0xff] %vm279_vm1, %v441_v13 }
  0x58   : > { %459 = vst.msk [vmem:[#allocation2 + $0x30] sm:$0xff] %vm279_vm1, %v426_v14  ;;  %v453_v14 = vld [vmem:[%s6531_s16 + $0xe0] sm:$0xff] }
  0x59   : > { %475 = vst.msk [vmem:[#allocation2 + $0x130] sm:$0xff] %vm279_vm1, %v442_v15  ;;  %v438_v15 = vld [vmem:[%s6531_s16 + $0x68] sm:$0xff] }
  0x5a   : > { %460 = vst.msk [vmem:[#allocation2 + $0x48] sm:$0xff] %vm279_vm1, %v427_v16 }
  0x5b   : > { %v6559_v19 = vld [vmem:[#allocation2 + $0x108] sm:$0xff]  ;;  %476 = vst.msk [vmem:[#allocation2 + $0x148] sm:$0xff] %vm279_vm1, %v443_v17 }
  0x5c   : > { %v6561_v20 = vld [vmem:[#allocation2 + $0x107] sm:$0xff]  ;;  %5695 = vmatmul.msk.f32.vlgmr.msra.gmra.mxu2 %vm279_vm1, %v6559_v19  ;;  %461 = vst.msk [vmem:[#allocation2 + $0x50] sm:$0xff] %vm279_vm1, %v428_v18  ;;  %v6581_v25 = vld [vmem:[#allocation2 + $0x110] sm:$0xff] }
  0x5d   : > { %5728 = vmatmul.msk.f32.vlgmr.msra.gmra.mxu3 %vm279_vm1, %v6561_v20  ;;  %v6570_v22 = vld [vmem:[#allocation2 + $0x28] sm:$0xff]  ;;  %477 = vst.msk [vmem:[#allocation2 + $0x150] sm:$0xff] %vm279_vm1, %v444_v21 }
  0x5e   : > { %v6572_v23 = vld [vmem:[#allocation2 + $0x27] sm:$0xff]  ;;  %5681 = vmatmul.msk.f32.gmra.mxu0 %vm279_vm1, %v6570_v22  ;;  %462 = vst.msk [vmem:[#allocation2 + $0x68] sm:$0xff] %vm279_vm1, %v429_v24  ;;  %v6583_v26 = vld [vmem:[#allocation2 + $0x10f] sm:$0xff] }
  0x5f   : > { %5714 = vmatmul.msk.f32.gmra.mxu1 %vm279_vm1, %v6572_v23  ;;  %v6585_v27 = vld [vmem:[#allocation2 + $0x30] sm:$0xff]  ;;  %478 = vst.msk [vmem:[#allocation2 + $0x168] sm:$0xff] %vm279_vm1, %v445_v29  ;;  %v6601_v31 = vld [vmem:[#allocation2 + $0x128] sm:$0xff] }
  0x60   : > { %v6587_v28 = vld [vmem:[#allocation2 + $0x2f] sm:$0xff]  ;;  %463 = vst.msk [vmem:[#allocation2 + $0x70] sm:$0xff] %vm279_vm1, %v430_v30  ;;  %v6603_v32 = vld [vmem:[#allocation2 + $0x127] sm:$0xff] }
  0x61   : > { %v6605_v33 = vld [vmem:[#allocation2 + $0x48] sm:$0xff]  ;;  %479 = vst.msk [vmem:[#allocation2 + $0x170] sm:$0xff] %vm279_vm1, %v446_v35  ;;  %v6621_v37 = vld [vmem:[#allocation2 + $0x130] sm:$0xff] }
  0x62   : > { %v6607_v34 = vld [vmem:[#allocation2 + $0x47] sm:$0xff]  ;;  %464 = vst.msk [vmem:[#allocation2 + $0x88] sm:$0xff] %vm279_vm1, %v431_v36  ;;  %v6623_v38 = vld [vmem:[#allocation2 + $0x12f] sm:$0xff] }
  0x63   : > { %v6625_v39 = vld [vmem:[#allocation2 + $0x50] sm:$0xff]  ;;  %480 = vst.msk [vmem:[#allocation2 + $0x188] sm:$0xff] %vm279_vm1, %v447_v41  ;;  %v6641_v43 = vld [vmem:[#allocation2 + $0x148] sm:$0xff] }
  0x64   : > { %5696 = vmatmul.msk.f32.gmra.mxu2 %vm279_vm1, %v6581_v25  ;;  %v6627_v40 = vld [vmem:[#allocation2 + $0x4f] sm:$0xff]  ;;  %465 = vst.msk [vmem:[#allocation2 + $0x90] sm:$0xff] %vm279_vm1, %v432_v42  ;;  %v6643_v44 = vld [vmem:[#allocation2 + $0x147] sm:$0xff] }
  0x65   : > { %5729 = vmatmul.msk.f32.gmra.mxu3 %vm279_vm1, %v6583_v26  ;;  %v6645_v45 = vld [vmem:[#allocation2 + $0x68] sm:$0xff]  ;;  %481 = vst.msk [vmem:[#allocation2 + $0x190] sm:$0xff] %vm279_vm1, %v448_v47  ;;  %v6661_v49 = vld [vmem:[#allocation2 + $0x150] sm:$0xff] }
  0x66   : > { %5682 = vmatmul.msk.f32.gmra.mxu0 %vm279_vm1, %v6585_v27  ;;  %v6647_v46 = vld [vmem:[#allocation2 + $0x67] sm:$0xff]  ;;  %466 = vst.msk [vmem:[#allocation2 + $0xa8] sm:$0xff] %vm279_vm1, %v433_v48  ;;  %v6663_v50 = vld [vmem:[#allocation2 + $0x14f] sm:$0xff] }
  0x67   : > { %5715 = vmatmul.msk.f32.gmra.mxu1 %vm279_vm1, %v6587_v28  ;;  %v6665_v51 = vld [vmem:[#allocation2 + $0x70] sm:$0xff]  ;;  %482 = vst.msk [vmem:[#allocation2 + $0x1a8] sm:$0xff] %vm279_vm1, %v449_v53  ;;  %v6681_v55 = vld [vmem:[#allocation2 + $0x168] sm:$0xff]  ;;  %v5880_v53 = vld [vmem:[%s9118_s1 + $0x18] sm:$0xf] }
  0x68   : > { %v6667_v52 = vld [vmem:[#allocation2 + $0x6f] sm:$0xff]  ;;  %467 = vst.msk [vmem:[#allocation2 + $0xb0] sm:$0xff] %vm279_vm1, %v434_v54  ;;  %v6683_v56 = vld [vmem:[#allocation2 + $0x167] sm:$0xff]  ;;  %v5914_v54 = vld [vmem:[%s9118_s1 + $0x1c] sm:$0xf]  ;;  %5881 = vmatpush.msk.msra.mxu2 %vm653_vm0, %v5880_v53 }
  0x69   : > { %v6685_v57 = vld [vmem:[#allocation2 + $0x88] sm:$0xff]  ;;  %483 = vst.msk [vmem:[#allocation2 + $0x1b0] sm:$0xff] %vm279_vm1, %v450_v59  ;;  %v6701_v61 = vld [vmem:[#allocation2 + $0x170] sm:$0xff]  ;;  %5915 = vmatpush.msk.msra.mxu3 %vm653_vm0, %v5914_v54 }
  0x6a   : > { %v6687_v58 = vld [vmem:[#allocation2 + $0x87] sm:$0xff]  ;;  %468 = vst.msk [vmem:[#allocation2 + $0xc8] sm:$0xff] %vm279_vm1, %v435_v60  ;;  %v6703_v62 = vld [vmem:[#allocation2 + $0x16f] sm:$0xff] }
  0x6b   : > { %v6705_v63 = vld [vmem:[#allocation2 + $0x90] sm:$0xff]  ;;  %484 = vst.msk [vmem:[#allocation2 + $0x1c8] sm:$0xff] %vm279_vm1, %v451_v2  ;;  %v6721_v4 = vld [vmem:[#allocation2 + $0x188] sm:$0xff] }
  0x6c   : > { %5697 = vmatmul.msk.f32.gmra.mxu2 %vm279_vm1, %v6601_v31  ;;  %v6707_v0 = vld [vmem:[#allocation2 + $0x8f] sm:$0xff]  ;;  %469 = vst.msk [vmem:[#allocation2 + $0xd0] sm:$0xff] %vm279_vm1, %v436_v3  ;;  %v6723_v5 = vld [vmem:[#allocation2 + $0x187] sm:$0xff] }
  0x6d   : > { %5730 = vmatmul.msk.f32.gmra.mxu3 %vm279_vm1, %v6603_v32  ;;  %v6725_v6 = vld [vmem:[#allocation2 + $0xa8] sm:$0xff]  ;;  %485 = vst.msk [vmem:[#allocation2 + $0x1d0] sm:$0xff] %vm279_vm1, %v452_v8  ;;  %v6741_v10 = vld [vmem:[#allocation2 + $0x190] sm:$0xff] }
  0x6e   : > { %5683 = vmatmul.msk.f32.gmra.mxu0 %vm279_vm1, %v6605_v33  ;;  %v6727_v7 = vld [vmem:[#allocation2 + $0xa7] sm:$0xff]  ;;  %470 = vst.msk [vmem:[#allocation2 + $0xe8] sm:$0xff] %vm279_vm1, %v437_v9  ;;  %v6743_v11 = vld [vmem:[#allocation2 + $0x18f] sm:$0xff]  ;;  %v5948_v9 = vld [vmem:[%s9118_s1 + $0x20] sm:$0xf] }
  0x6f   : > { %5716 = vmatmul.msk.f32.gmra.mxu1 %vm279_vm1, %v6607_v34  ;;  %v6745_v12 = vld [vmem:[#allocation2 + $0xb0] sm:$0xff]  ;;  %486 = vst.msk [vmem:[#allocation2 + $0x1e8] sm:$0xff] %vm279_vm1, %v453_v14  ;;  %v6761_v16 = vld [vmem:[#allocation2 + $0x1a8] sm:$0xff]  ;;  %5949 = vmatpush.msk.msra.mxu0 %vm653_vm0, %v5948_v9 }
  0x70   : > { %v6747_v13 = vld [vmem:[#allocation2 + $0xaf] sm:$0xff]  ;;  %471 = vst.msk [vmem:[#allocation2 + $0xf0] sm:$0xff] %vm279_vm1, %v438_v15  ;;  %v6763_v17 = vld [vmem:[#allocation2 + $0x1a7] sm:$0xff] }
  0x71   : > { %9199 = vst [vmem:[#allocation4_spill] sm:$0xff] %v6763_v17  ;;  %v6765_v18 = vld [vmem:[#allocation2 + $0xc8] sm:$0xff]  ;;  %v6779_v29 = vld [vmem:[#allocation2 + $0x1b0] sm:$0xff] }
  0x72   : > { %v6767_v21 = vld [vmem:[#allocation2 + $0xc7] sm:$0xff]  ;;  %9200 = vst [vmem:[#allocation5_spill] sm:$0xff] %v6779_v29  ;;  %v6781_v30 = vld [vmem:[#allocation2 + $0x1af] sm:$0xff] }
  0x73   : > { %v454_v24 = vld [vmem:[%s6531_s16 + $0xe8] sm:$0xff]  ;;  %9201 = vst [vmem:[#allocation6_spill] sm:$0xff] %v6781_v30  ;;  %v6783_v35 = vld [vmem:[#allocation2 + $0xd0] sm:$0xff] }
  0x74   : > { %5698 = vmatmul.msk.f32.gmra.mxu2 %vm279_vm1, %v6621_v37  ;;  %487 = vst.msk [vmem:[#allocation2 + $0x1f0] sm:$0xff] %vm279_vm1, %v454_v24  ;;  %v6785_v36 = vld [vmem:[#allocation2 + $0xcf] sm:$0xff]  ;;  %v6797_v42 = vld [vmem:[#allocation2 + $0x1c7] sm:$0xff] }
  0x75   : > { %5731 = vmatmul.msk.f32.gmra.mxu3 %vm279_vm1, %v6623_v38  ;;  %v6795_v41 = vld [vmem:[#allocation2 + $0x1c8] sm:$0xff]  ;;  %9203 = vst [vmem:[#allocation8_spill] sm:$0xff] %v6797_v42  ;;  %v6819_v59 = vld [vmem:[#allocation2 + $0x1d0] sm:$0xff] }
  0x76   : > { %5684 = vmatmul.msk.f32.gmra.mxu0 %vm279_vm1, %v6625_v39  ;;  %9202 = vst [vmem:[#allocation7_spill] sm:$0xff] %v6795_v41  ;;  %v6799_v47 = vld [vmem:[#allocation2 + $0xe8] sm:$0xff]  ;;  %v5846_v8 = vld [vmem:[%s9118_s1 + $0x14] sm:$0xf] }
  0x77   : > { %5717 = vmatmul.msk.f32.gmra.mxu1 %vm279_vm1, %v6627_v40  ;;  %v6801_v48 = vld [vmem:[#allocation2 + $0xe7] sm:$0xff]  ;;  %9204 = vst [vmem:[#allocation9_spill] sm:$0xff] %v6819_v59  ;;  %v6821_v60 = vld [vmem:[#allocation2 + $0x1cf] sm:$0xff] }
  0x78   : > { %9205 = vst [vmem:[#allocation10_spill] sm:$0xff] %v6821_v60  ;;  %v6823_v2 = vld [vmem:[#allocation2 + $0xf0] sm:$0xff]  ;;  %5847 = vmatpush.msk.msrb.mxu1 %vm653_vm0, %v5846_v8  ;;  %v6847_v24 = vld [vmem:[#allocation2 + $0x1e8] sm:$0xff] }
  0x79   : > { %v6825_v3 = vld [vmem:[#allocation2 + $0xef] sm:$0xff]  ;;  %9206 = vst [vmem:[#allocation11_spill] sm:$0xff] %v6847_v24  ;;  %v6849_v53 = vld [vmem:[#allocation2 + $0x1e7] sm:$0xff] }
  0x7a   : > { %9207 = vst [vmem:[#allocation12_spill] sm:$0xff] %v6849_v53  ;;  %v1816_v54 = vld [vmem:[#allocation2 + $0x29] sm:$0xff] }
  0x7b   : > { %v6858_v8 = vld [vmem:[#allocation2 + $0x1f0] sm:$0xff] }
  0x7c   : > { %5699 = vmatmul.msk.f32.gmra.mxu2 %vm279_vm1, %v6641_v43  ;;  %9208 = vst [vmem:[#allocation13_spill] sm:$0xff] %v6858_v8  ;;  %v6860_v9 = vld [vmem:[#allocation2 + $0x1ef] sm:$0xff] }
  0x7d   : > { %5732 = vmatmul.msk.f32.gmra.mxu3 %vm279_vm1, %v6643_v44  ;;  %9209 = vst [vmem:[#allocation14_spill] sm:$0xff] %v6860_v9 }
  0x7e   : > { %5685 = vmatmul.msk.f32.gmra.mxu0 %vm279_vm1, %v6645_v45 }
  0x7f   : > { %5718 = vmatmul.msk.f32.gmra.mxu1 %vm279_vm1, %v6647_v46 }
  0x84   : > { %5700 = vmatmul.msk.f32.gmra.mxu2 %vm279_vm1, %v6661_v49 }
  0x85   : > { %5733 = vmatmul.msk.f32.gmra.mxu3 %vm279_vm1, %v6663_v50 }
  0x86   : > { %5686 = vmatmul.msk.f32.gmra.mxu0 %vm279_vm1, %v6665_v51 }
  0x87   : > { %5719 = vmatmul.msk.f32.gmra.mxu1 %vm279_vm1, %v6667_v52 }
  0x8c   : > { %5701 = vmatmul.msk.f32.gmra.mxu2 %vm279_vm1, %v6681_v55 }
  0x8d   : > { %5734 = vmatmul.msk.f32.gmra.mxu3 %vm279_vm1, %v6683_v56 }
  0x8e   : > { %5687 = vmatmul.msk.f32.gmra.mxu0 %vm279_vm1, %v6685_v57 }
  0x8f   : > { %5720 = vmatmul.msk.f32.gmra.mxu1 %vm279_vm1, %v6687_v58 }
  0x91   : > { %v6843_v14 = vpop.f32.mrf.mxu0 }
  0x92   : > { %v6845_v15 = vpop.f32.mrf.mxu1 }
  0x94   : > { %5702 = vmatmul.msk.f32.gmra.mxu2 %vm279_vm1, %v6701_v61 }
  0x95   : > { %5735 = vmatmul.msk.f32.gmra.mxu3 %vm279_vm1, %v6703_v62 }
  0x96   : > { %5688 = vmatmul.msk.f32.gmra.mxu0 %vm279_vm1, %v6705_v63 }
  0x97   : > { %5721 = vmatmul.msk.f32.gmra.mxu1 %vm279_vm1, %v6707_v0 }
  0x99   : > { %v6862_v1 = vpop.f32.mrf.mxu0 }
  0x9c   : > { %5703 = vmatmul.msk.f32.gmra.mxu2 %vm279_vm1, %v6721_v4 }
  0x9d   : > { %5736 = vmatmul.msk.f32.gmra.mxu3 %vm279_vm1, %v6723_v5 }
  0x9e   : > { %5689 = vmatmul.msk.f32.gmra.mxu0 %vm279_vm1, %v6725_v6 }
  0x9f   : > { %5722 = vmatmul.msk.f32.gmra.mxu1 %vm279_vm1, %v6727_v7 }
  0xa4   : > { %5704 = vmatmul.msk.f32.gmra.mxu2 %vm279_vm1, %v6741_v10 }
  0xa5   : > { %5737 = vmatmul.msk.f32.gmra.mxu3 %vm279_vm1, %v6743_v11 }
  0xa6   : > { %5690 = vmatmul.msk.f32.gmra.mxu0 %vm279_vm1, %v6745_v12 }
  0xa7   : > { %5723 = vmatmul.msk.f32.gmra.mxu1 %vm279_vm1, %v6747_v13 }
  0xac   : > { %5705 = vmatmul.msk.f32.gmra.mxu2 %vm279_vm1, %v6761_v16 }
  0xad   : > { %5738 = vmatmul.msk.f32.gmra.mxu3 %vm279_vm1, %v6763_v17 }
  0xae   : > { %5691 = vmatmul.msk.f32.gmra.mxu0 %vm279_vm1, %v6765_v18 }
  0xaf   : > { %5724 = vmatmul.msk.f32.gmra.mxu1 %vm279_vm1, %v6767_v21 }
  0xb4   : > { %5706 = vmatmul.msk.f32.gmra.mxu2 %vm279_vm1, %v6779_v29  ;;  %v6892_v29 = vld [vmem:[#allocation2 + $0x51] sm:$0xff] }
  0xb5   : > { %5739 = vmatmul.msk.f32.gmra.mxu3 %vm279_vm1, %v6781_v30  ;;  %v983_v30 = vld [vmem:[#allocation2 + $0x11] sm:$0xff]  ;;  %9212 = vst [vmem:[#allocation17_spill] sm:$0xff] %v6892_v29 }
  0xb6   : > { %5692 = vmatmul.msk.f32.gmra.mxu0 %vm279_vm1, %v6783_v35 }
  0xb7   : > { %5725 = vmatmul.msk.f32.gmra.mxu1 %vm279_vm1, %v6785_v36 }
  0xbc   : > { %5707 = vmatmul.msk.f32.gmra.mxu2 %vm279_vm1, %v6795_v41 }
  0xbd   : > { %5740 = vmatmul.msk.f32.gmra.mxu3 %vm279_vm1, %v6797_v42  ;;  %v1817_v42 = vld [vmem:[#allocation2 + $0x31] sm:$0xff] }
  0xbe   : > { %5693 = vmatmul.msk.f32.gmra.mxu0 %vm279_vm1, %v6799_v47 }
  0xbf   : > { %5726 = vmatmul.msk.f32.gmra.mxu1 %vm279_vm1, %v6801_v48 }
  0xc4   : > { %5708 = vmatmul.msk.f32.gmra.mxu2 %vm279_vm1, %v6819_v59  ;;  %v6877_v59 = vld [vmem:[#allocation2 + $0x49] sm:$0xff] }
  0xc5   : > { %5741 = vmatmul.msk.f32.gmra.mxu3 %vm279_vm1, %v6821_v60  ;;  %v6864_v60 = vpop.f32.mrf.mxu1  ;;  %9210 = vst [vmem:[#allocation15_spill] sm:$0xff] %v6877_v59 }
  0xc6   : > { %5694 = vmatmul.msk.f32.gmra.mxu0 %vm279_vm1, %v6823_v2 }
  0xc7   : > { %5727 = vmatmul.msk.f32.gmra.mxu1 %vm279_vm1, %v6825_v3 }
  0xcc   : > { %5709 = vmatmul.msk.f32.gmra.mxu2 %vm279_vm1, %v6847_v24 }
  0xcd   : > { %5742 = vmatmul.msk.f32.gmra.mxu3 %vm279_vm1, %v6849_v53 }
  0xce   : > { %5814 = vmatmul.msk.f32.vlgmr.msrb.gmra.mxu0 %vm279_vm1, %v6570_v22  ;;  %v982_v22 = vld [vmem:[#allocation2 + $0x9] sm:$0xff] }
  0xcf   : > { %5848 = vmatmul.msk.f32.vlgmr.msrb.gmra.mxu1 %vm279_vm1, %v1816_v54 }
  0xd4   : > { %5710 = vmatmul.msk.f32.gmra.mxu2 %vm279_vm1, %v6858_v8 }
  0xd5   : > { %5743 = vmatmul.msk.f32.gmra.mxu3 %vm279_vm1, %v6860_v9 }
  0xd6   : > { %5815 = vmatmul.msk.f32.gmra.mxu0 %vm279_vm1, %v6585_v27 }
  0xd7   : > { %5849 = vmatmul.msk.f32.gmra.mxu1 %vm279_vm1, %v1817_v42 }
  0xdb   : > { %v6873_v53 = vpop.f32.mrf.mxu0 }
  0xdc   : > { %v6875_v24 = vpop.f32.mrf.mxu1  ;;  %5746 = vmatmul.msk.f32.vlgmr.msrb.gmra.mxu2 %vm279_vm1, %v982_v22 }
  0xdd   : > { %5780 = vmatmul.msk.f32.vlgmr.msrb.gmra.mxu3 %vm279_vm1, %v6572_v23 }
  0xde   : > { %5816 = vmatmul.msk.f32.gmra.mxu0 %vm279_vm1, %v6605_v33 }
  0xdf   : > { %5850 = vmatmul.msk.f32.gmra.mxu1 %vm279_vm1, %v6877_v59  ;;  %v722_v27 = vpop.f32.mrf.mxu2 }
  0xe0   : > { %v934_v9 = vpop.f32.mrf.mxu3 }
  0xe1   : > { %v6886_v8 = vadd.f32 %v934_v9, %v722_v27 }
  0xe3   : > { %9211 = vst [vmem:[#allocation16_spill] sm:$0xff] %v6886_v8  ;;  %v6888_v41 = vpop.f32.mrf.mxu0  ;;  %v6907_v8 = vld [vmem:[#allocation2 + $0x69] sm:$0xff] }
  0xe4   : > { %v6890_v17 = vpop.f32.mrf.mxu1  ;;  %5747 = vmatmul.msk.f32.gmra.mxu2 %vm279_vm1, %v983_v30  ;;  %9214 = vst [vmem:[#allocation19_spill] sm:$0xff] %v6907_v8 }
  0xe5   : > { %5781 = vmatmul.msk.f32.gmra.mxu3 %vm279_vm1, %v6587_v28 }
  0xe6   : > { %5817 = vmatmul.msk.f32.gmra.mxu0 %vm279_vm1, %v6625_v39 }
  0xe7   : > { %5851 = vmatmul.msk.f32.gmra.mxu1 %vm279_vm1, %v6892_v29  ;;  %v725_v23 = vpop.f32.mrf.mxu2 }
  0xe8   : > { %v937_v33 = vpop.f32.mrf.mxu3 }
  0xe9   : > { %v6901_v9 = vadd.f32 %v937_v33, %v725_v23 }
  0xeb   : > { %9213 = vst [vmem:[#allocation18_spill] sm:$0xff] %v6901_v9  ;;  %v6903_v22 = vpop.f32.mrf.mxu0  ;;  %v6922_v9 = vld [vmem:[#allocation2 + $0x71] sm:$0xff] }
  0xec   : > { %v6905_v27 = vpop.f32.mrf.mxu1  ;;  %5748 = vmatmul.msk.f32.gmra.mxu2 %vm279_vm1, %v1816_v54  ;;  %9216 = vst [vmem:[#allocation21_spill] sm:$0xff] %v6922_v9 }
  0xed   : > { %5782 = vmatmul.msk.f32.gmra.mxu3 %vm279_vm1, %v6607_v34 }
  0xee   : > { %5818 = vmatmul.msk.f32.gmra.mxu0 %vm279_vm1, %v6645_v45 }
  0xef   : > { %5852 = vmatmul.msk.f32.gmra.mxu1 %vm279_vm1, %v6907_v8  ;;  %v728_v28 = vpop.f32.mrf.mxu2 }
  0xf0   : > { %v940_v39 = vpop.f32.mrf.mxu3 }
  0xf1   : > { %v6916_v30 = vadd.f32 %v940_v39, %v728_v28 }
  0xf3   : > { %9215 = vst [vmem:[#allocation20_spill] sm:$0xff] %v6916_v30  ;;  %v6918_v23 = vpop.f32.mrf.mxu0  ;;  %v6937_v30 = vld [vmem:[#allocation2 + $0x89] sm:$0xff] }
  0xf4   : > { %v6920_v33 = vpop.f32.mrf.mxu1  ;;  %5749 = vmatmul.msk.f32.gmra.mxu2 %vm279_vm1, %v1817_v42  ;;  %9218 = vst [vmem:[#allocation23_spill] sm:$0xff] %v6937_v30 }
  0xf5   : > { %5783 = vmatmul.msk.f32.gmra.mxu3 %vm279_vm1, %v6627_v40 }
  0xf6   : > { %5819 = vmatmul.msk.f32.gmra.mxu0 %vm279_vm1, %v6665_v51 }
  0xf7   : > { %5853 = vmatmul.msk.f32.gmra.mxu1 %vm279_vm1, %v6922_v9  ;;  %v731_v34 = vpop.f32.mrf.mxu2 }
  0xf8   : > { %v943_v45 = vpop.f32.mrf.mxu3 }
  0xf9   : > { %v6931_v54 = vadd.f32 %v943_v45, %v731_v34 }
  0xfb   : > { %9217 = vst [vmem:[#allocation22_spill] sm:$0xff] %v6931_v54  ;;  %v6933_v28 = vpop.f32.mrf.mxu0  ;;  %v6953_v54 = vld [vmem:[#allocation2 + $0x91] sm:$0xff] }
  0xfc   : > { %v6935_v39 = vpop.f32.mrf.mxu1  ;;  %5750 = vmatmul.msk.f32.gmra.mxu2 %vm279_vm1, %v6877_v59  ;;  %9220 = vst [vmem:[#allocation25_spill] sm:$0xff] %v6953_v54  ;;  %v6969_v59 = vld [vmem:[#allocation2 + $0xa9] sm:$0xff] }
  0xfd   : > { %5784 = vmatmul.msk.f32.gmra.mxu3 %vm279_vm1, %v6647_v46  ;;  %9222 = vst [vmem:[#allocation27_spill] sm:$0xff] %v6969_v59 }
  0xfe   : > { %5820 = vmatmul.msk.f32.gmra.mxu0 %vm279_vm1, %v6685_v57 }
  0xff   : > { %5854 = vmatmul.msk.f32.gmra.mxu1 %vm279_vm1, %v6937_v30  ;;  %v734_v40 = vpop.f32.mrf.mxu2 }
 0x100   : > { %v946_v51 = vpop.f32.mrf.mxu3 }
 0x101   : > { %v6947_v42 = vadd.f32 %v946_v51, %v734_v40 }
 0x103   : > { %9219 = vst [vmem:[#allocation24_spill] sm:$0xff] %v6947_v42  ;;  %v6949_v34 = vpop.f32.mrf.mxu0 }
 0x104   : > { %v6951_v45 = vpop.f32.mrf.mxu1  ;;  %5751 = vmatmul.msk.f32.gmra.mxu2 %vm279_vm1, %v6892_v29  ;;  %v6985_v29 = vld [vmem:[#allocation2 + $0xb1] sm:$0xff] }
 0x105   : > { %5785 = vmatmul.msk.f32.gmra.mxu3 %vm279_vm1, %v6667_v52  ;;  %9224 = vst [vmem:[#allocation29_spill] sm:$0xff] %v6985_v29 }
 0x106   : > { %5821 = vmatmul.msk.f32.gmra.mxu0 %vm279_vm1, %v6705_v63 }
 0x107   : > { %5855 = vmatmul.msk.f32.gmra.mxu1 %vm279_vm1, %v6953_v54  ;;  %v737_v46 = vpop.f32.mrf.mxu2 }
 0x108   : > { %v949_v57 = vpop.f32.mrf.mxu3 }
 0x109   : > { %v6963_v40 = vadd.f32 %v949_v57, %v737_v46 }
 0x10b   : > { %9221 = vst [vmem:[#allocation26_spill] sm:$0xff] %v6963_v40  ;;  %v6965_v51 = vpop.f32.mrf.mxu0 }
 0x10c   : > { %v6967_v42 = vpop.f32.mrf.mxu1  ;;  %5752 = vmatmul.msk.f32.gmra.mxu2 %vm279_vm1, %v6907_v8  ;;  %v7001_v8 = vld [vmem:[#allocation2 + $0xc9] sm:$0xff] }
 0x10d   : > { %5786 = vmatmul.msk.f32.gmra.mxu3 %vm279_vm1, %v6687_v58  ;;  %9226 = vst [vmem:[#allocation31_spill] sm:$0xff] %v7001_v8 }
 0x10e   : > { %5822 = vmatmul.msk.f32.gmra.mxu0 %vm279_vm1, %v6725_v6 }
 0x10f   : > { %5856 = vmatmul.msk.f32.gmra.mxu1 %vm279_vm1, %v6969_v59  ;;  %v740_v52 = vpop.f32.mrf.mxu2 }
 0x110   : > { %v952_v63 = vpop.f32.mrf.mxu3 }
 0x111   : > { %v6979_v46 = vadd.f32 %v952_v63, %v740_v52 }
 0x113   : > { %9223 = vst [vmem:[#allocation28_spill] sm:$0xff] %v6979_v46  ;;  %v6981_v57 = vpop.f32.mrf.mxu0 }
 0x114   : > { %v6983_v40 = vpop.f32.mrf.mxu1  ;;  %5753 = vmatmul.msk.f32.gmra.mxu2 %vm279_vm1, %v6922_v9  ;;  %v7132_v9 = vld [vmem:[#allocation2 + $0x151] sm:$0xff] }
 0x115   : > { %5787 = vmatmul.msk.f32.gmra.mxu3 %vm279_vm1, %v6707_v0 }
 0x116   : > { %5823 = vmatmul.msk.f32.gmra.mxu0 %vm279_vm1, %v6745_v12 }
 0x117   : > { %5857 = vmatmul.msk.f32.gmra.mxu1 %vm279_vm1, %v6985_v29  ;;  %v743_v58 = vpop.f32.mrf.mxu2 }
 0x118   : > { %v955_v6 = vpop.f32.mrf.mxu3 }
 0x119   : > { %v6995_v52 = vadd.f32 %v955_v6, %v743_v58 }
 0x11b   : > { %9225 = vst [vmem:[#allocation30_spill] sm:$0xff] %v6995_v52  ;;  %v6997_v63 = vpop.f32.mrf.mxu0  ;;  %v7015_v52 = vld [vmem:[#allocation2 + $0xd1] sm:$0xff] }
 0x11c   : > { %v6999_v46 = vpop.f32.mrf.mxu1  ;;  %5754 = vmatmul.msk.f32.gmra.mxu2 %vm279_vm1, %v6937_v30  ;;  %9228 = vst [vmem:[#allocation33_spill] sm:$0xff] %v7015_v52  ;;  %v7031_v30 = vld [vmem:[#allocation2 + $0xe9] sm:$0xff] }
 0x11d   : > { %5788 = vmatmul.msk.f32.gmra.mxu3 %vm279_vm1, %v6727_v7  ;;  %9230 = vst [vmem:[#allocation35_spill] sm:$0xff] %v7031_v30 }
 0x11e   : > { %5824 = vmatmul.msk.f32.gmra.mxu0 %vm279_vm1, %v6765_v18 }
 0x11f   : > { %5858 = vmatmul.msk.f32.gmra.mxu1 %vm279_vm1, %v7001_v8  ;;  %v746_v0 = vpop.f32.mrf.mxu2 }
 0x120   : > { %v958_v12 = vpop.f32.mrf.mxu3 }
 0x121   : > { %v7011_v58 = vadd.f32 %v958_v12, %v746_v0 }
 0x123   : > { %9227 = vst [vmem:[#allocation32_spill] sm:$0xff] %v7011_v58  ;;  %v7013_v6 = vpop.f32.mrf.mxu0 }
 0x124   : > { %5755 = vmatmul.msk.f32.gmra.mxu2 %vm279_vm1, %v6953_v54  ;;  %v7021_v7 = vpop.f32.mrf.mxu1  ;;  %v7047_v54 = vld [vmem:[#allocation2 + $0xf1] sm:$0xff] }
 0x125   : > { %5789 = vmatmul.msk.f32.gmra.mxu3 %vm279_vm1, %v6747_v13  ;;  %9232 = vst [vmem:[#allocation37_spill] sm:$0xff] %v7047_v54 }
 0x126   : > { %5825 = vmatmul.msk.f32.gmra.mxu0 %vm279_vm1, %v6783_v35 }
 0x127   : > { %5859 = vmatmul.msk.f32.gmra.mxu1 %vm279_vm1, %v7015_v52  ;;  %v749_v18 = vpop.f32.mrf.mxu2 }
 0x128   : > { %v961_v0 = vpop.f32.mrf.mxu3 }
 0x129   : > { %v7027_v12 = vadd.f32 %v961_v0, %v749_v18 }
 0x12b   : > { %9229 = vst [vmem:[#allocation34_spill] sm:$0xff] %v7027_v12  ;;  %v7029_v58 = vpop.f32.mrf.mxu0 }
 0x12c   : > { %5756 = vmatmul.msk.f32.gmra.mxu2 %vm279_vm1, %v6969_v59  ;;  %v7039_v13 = vpop.f32.mrf.mxu1  ;;  %v7063_v59 = vld [vmem:[#allocation2 + $0x109] sm:$0xff] }
 0x12d   : > { %5790 = vmatmul.msk.f32.gmra.mxu3 %vm279_vm1, %v6767_v21  ;;  %9234 = vst [vmem:[#allocation39_spill] sm:$0xff] %v7063_v59 }
 0x12e   : > { %5826 = vmatmul.msk.f32.gmra.mxu0 %vm279_vm1, %v6799_v47 }
 0x12f   : > { %5860 = vmatmul.msk.f32.gmra.mxu1 %vm279_vm1, %v7031_v30  ;;  %v752_v35 = vpop.f32.mrf.mxu2 }
 0x130   : > { %v964_v18 = vpop.f32.mrf.mxu3 }
 0x131   : > { %v7043_v0 = vadd.f32 %v964_v18, %v752_v35 }
 0x133   : > { %9231 = vst [vmem:[#allocation36_spill] sm:$0xff] %v7043_v0  ;;  %v7045_v12 = vpop.f32.mrf.mxu0 }
 0x134   : > { %5757 = vmatmul.msk.f32.gmra.mxu2 %vm279_vm1, %v6985_v29  ;;  %v7059_v18 = vpop.f32.mrf.mxu1  ;;  %v7079_v29 = vld [vmem:[#allocation2 + $0x111] sm:$0xff] }
 0x135   : > { %5791 = vmatmul.msk.f32.gmra.mxu3 %vm279_vm1, %v6785_v36  ;;  %9236 = vst [vmem:[#allocation41_spill] sm:$0xff] %v7079_v29 }
 0x136   : > { %5827 = vmatmul.msk.f32.gmra.mxu0 %vm279_vm1, %v6823_v2 }
 0x137   : > { %5861 = vmatmul.msk.f32.gmra.mxu1 %vm279_vm1, %v7047_v54  ;;  %v755_v21 = vpop.f32.mrf.mxu2 }
 0x138   : > { %v967_v47 = vpop.f32.mrf.mxu3 }
 0x139   : > { %v7057_v35 = vadd.f32 %v967_v47, %v755_v21 }
 0x13b   : > { %9233 = vst [vmem:[#allocation38_spill] sm:$0xff] %v7057_v35  ;;  %v7061_v0 = vpop.f32.mrf.mxu0 }
 0x13c   : > { %5758 = vmatmul.msk.f32.gmra.mxu2 %vm279_vm1, %v7001_v8  ;;  %v7075_v47 = vpop.f32.mrf.mxu1 }
 0x13d   : > { %5792 = vmatmul.msk.f32.gmra.mxu3 %vm279_vm1, %v6801_v48 }
 0x13e   : > { %5828 = vmatmul.msk.f32.gmra.mxu0 %vm279_vm1, %v6559_v19  ;;  %v5982_v19 = vld [vmem:[%s9121_s4 + $0x8] sm:$0xff] }
 0x13f   : > { %5862 = vmatmul.msk.f32.gmra.mxu1 %vm279_vm1, %v7063_v59  ;;  %v758_v36 = vpop.f32.mrf.mxu2 }
 0x140   : > { %v970_v2 = vpop.f32.mrf.mxu3  ;;  %3244 = vmatpush.msra.mxu1 %v5982_v19 }
 0x141   : > { %v7073_v21 = vadd.f32 %v970_v2, %v758_v36 }
 0x143   : > { %9235 = vst [vmem:[#allocation40_spill] sm:$0xff] %v7073_v21  ;;  %v7077_v35 = vpop.f32.mrf.mxu0 }
 0x144   : > { %5759 = vmatmul.msk.f32.gmra.mxu2 %vm279_vm1, %v7015_v52  ;;  %v7094_v52 = vld [vmem:[#allocation2 + $0x129] sm:$0xff] }
 0x145   : > { %5793 = vmatmul.msk.f32.gmra.mxu3 %vm279_vm1, %v6825_v3  ;;  %v7100_v3 = vpop.f32.mrf.mxu1 }
 0x146   : > { %5829 = vmatmul.msk.f32.gmra.mxu0 %vm279_vm1, %v6581_v25 }
 0x147   : > { %5863 = vmatmul.msk.f32.gmra.mxu1 %vm279_vm1, %v7079_v29  ;;  %v761_v48 = vpop.f32.mrf.mxu2 }
 0x148   : > { %v973_v36 = vpop.f32.mrf.mxu3 }
 0x149   : > { %v7092_v2 = vadd.f32 %v973_v36, %v761_v48 }
 0x14b   : > { %9237 = vst [vmem:[#allocation42_spill] sm:$0xff] %v7092_v2  ;;  %v1688_v21 = vpop.f32.mrf.mxu0  ;;  %v7108_v2 = vld [vmem:[#allocation2 + $0x131] sm:$0xff] }
 0x14c   : > { %5760 = vmatmul.msk.f32.gmra.mxu2 %vm279_vm1, %v7031_v30 }
 0x14d   : > { %5794 = vmatmul.msk.f32.gmra.mxu3 %vm279_vm1, %v6561_v20  ;;  %v1966_v20 = vpop.f32.mrf.mxu1 }
 0x14e   : > { %5830 = vmatmul.msk.f32.gmra.mxu0 %vm279_vm1, %v6601_v31 }
 0x14f   : > { %5864 = vmatmul.msk.f32.gmra.mxu1 %vm279_vm1, %v7094_v52  ;;  %v764_v25 = vpop.f32.mrf.mxu2 }
 0x150   : > { %v976_v19 = vpop.f32.mrf.mxu3 }
 0x151   : > { %v7106_v48 = vadd.f32 %v976_v19, %v764_v25 }
 0x153   : > { %9238 = vst [vmem:[#allocation43_spill] sm:$0xff] %v7106_v48  ;;  %v1691_v36 = vpop.f32.mrf.mxu0  ;;  %v7120_v48 = vld [vmem:[#allocation2 + $0x149] sm:$0xff] }
 0x154   : > { %5761 = vmatmul.msk.f32.gmra.mxu2 %vm279_vm1, %v7047_v54 }
 0x155   : > { %5795 = vmatmul.msk.f32.gmra.mxu3 %vm279_vm1, %v6583_v26  ;;  %v887_v26 = vadd.f32 %v6845_v15, %v6843_v14 }
 0x156   : > { %5831 = vmatmul.msk.f32.gmra.mxu0 %vm279_vm1, %v6621_v37  ;;  %v1969_v37 = vpop.f32.mrf.mxu1 }
 0x157   : > { %5865 = vmatmul.msk.f32.gmra.mxu1 %vm279_vm1, %v7108_v2  ;;  %v767_v31 = vpop.f32.mrf.mxu2 }
 0x158   : > { %v979_v30 = vpop.f32.mrf.mxu3 }
 0x159   : > { %v7118_v25 = vadd.f32 %v979_v30, %v767_v31 }
 0x15b   : > { %9239 = vst [vmem:[#allocation44_spill] sm:$0xff] %v7118_v25  ;;  %v1694_v19 = vpop.f32.mrf.mxu0 }
 0x15c   : > { %5762 = vmatmul.msk.f32.gmra.mxu2 %vm279_vm1, %v7063_v59  ;;  %v7146_v59 = vld [vmem:[#allocation2 + $0x169] sm:$0xff] }
 0x15d   : > { %5796 = vmatmul.msk.f32.gmra.mxu3 %vm279_vm1, %v6603_v32 }
 0x15e   : > { %5832 = vmatmul.msk.f32.gmra.mxu0 %vm279_vm1, %v6641_v43  ;;  %v890_v43 = vadd.f32 %v6864_v60, %v6862_v1 }
 0x15f   : > { %5866 = vmatmul.msk.f32.gmra.mxu1 %vm279_vm1, %v7120_v48  ;;  %v1132_v30 = vpop.f32.mrf.mxu2 }
 0x160   : > { %v1410_v31 = vpop.f32.mrf.mxu3  ;;  %v1228_v25 = vadd.f32 %v1132_v30, %v887_v26  ;;  %v1972_v30 = vpop.f32.mrf.mxu1 }
 0x162   : > { %v1506_v54 = vadd.f32 %v1410_v31, %v1228_v25 }
 0x163   : > { %v1697_v8 = vpop.f32.mrf.mxu0 }
 0x164   : > { %5763 = vmatmul.msk.f32.gmra.mxu2 %vm279_vm1, %v7079_v29  ;;  %v1784_v32 = vadd.f32 %v1688_v21, %v1506_v54 }
 0x165   : > { %5797 = vmatmul.msk.f32.gmra.mxu3 %vm279_vm1, %v6623_v38  ;;  %v893_v38 = vadd.f32 %v6875_v24, %v6873_v53 }
 0x166   : > { %v7140_v14 = vadd.f32 %v1966_v20, %v1784_v32  ;;  %5833 = vmatmul.msk.f32.gmra.mxu0 %vm279_vm1, %v6661_v49 }
 0x167   : > { %5867 = vmatmul.msk.f32.gmra.mxu1 %vm279_vm1, %v7132_v9  ;;  %v1135_v15 = vpop.f32.mrf.mxu2 }
 0x168   : > { %v1413_v25 = vpop.f32.mrf.mxu3  ;;  %v1229_v26 = vadd.f32 %v1135_v15, %v890_v43  ;;  %v1975_v32 = vpop.f32.mrf.mxu1  ;;  %v7160_v15 = vld [vmem:[#allocation2 + $0x171] sm:$0xff] }
 0x16a   : > { %v1507_v31 = vadd.f32 %v1413_v25, %v1229_v26 }
 0x16b   : > { %v1700_v29 = vpop.f32.mrf.mxu0 }
 0x16c   : > { %5764 = vmatmul.msk.f32.gmra.mxu2 %vm279_vm1, %v7094_v52  ;;  %v1785_v1 = vadd.f32 %v1691_v36, %v1507_v31  ;;  %v7174_v31 = vld [vmem:[#allocation2 + $0x189] sm:$0xff] }
 0x16d   : > { %5798 = vmatmul.msk.f32.gmra.mxu3 %vm279_vm1, %v6643_v44 }
 0x16e   : > { %v7154_v49 = vadd.f32 %v1969_v37, %v1785_v1  ;;  %5834 = vmatmul.msk.f32.gmra.mxu0 %vm279_vm1, %v6681_v55  ;;  %v896_v55 = vadd.f32 %v6890_v17, %v6888_v41 }
 0x16f   : > { %5868 = vmatmul.msk.f32.gmra.mxu1 %vm279_vm1, %v7146_v59  ;;  %v1138_v60 = vpop.f32.mrf.mxu2 }
 0x170   : > { %v1416_v54 = vpop.f32.mrf.mxu3  ;;  %v1230_v21 = vadd.f32 %v1138_v60, %v893_v38  ;;  %v1978_v17 = vpop.f32.mrf.mxu1 }
 0x172   : > { %v1508_v20 = vadd.f32 %v1416_v54, %v1230_v21  ;;  %v7188_v54 = vld [vmem:[#allocation2 + $0x191] sm:$0xff] }
 0x173   : > { %v1703_v43 = vpop.f32.mrf.mxu0 }
 0x174   : > { %5765 = vmatmul.msk.f32.gmra.mxu2 %vm279_vm1, %v7108_v2  ;;  %v1786_v44 = vadd.f32 %v1694_v19, %v1508_v20 }
 0x175   : > { %5799 = vmatmul.msk.f32.gmra.mxu3 %vm279_vm1, %v6663_v50 }
 0x176   : > { %v7168_v24 = vadd.f32 %v1972_v30, %v1786_v44  ;;  %5835 = vmatmul.msk.f32.gmra.mxu0 %vm279_vm1, %v6701_v61  ;;  %v899_v61 = vadd.f32 %v6905_v27, %v6903_v22 }
 0x177   : > { %5869 = vmatmul.msk.f32.gmra.mxu1 %vm279_vm1, %v7160_v15  ;;  %v1141_v53 = vpop.f32.mrf.mxu2 }
 0x178   : > { %v1419_v36 = vpop.f32.mrf.mxu3  ;;  %v1231_v37 = vadd.f32 %v1141_v53, %v896_v55  ;;  %v1981_v22 = vpop.f32.mrf.mxu1  ;;  %v7202_v55 = vld [vmem:[#allocation2 + $0x1a9] sm:$0xff] }
 0x17a   : > { %v1509_v25 = vadd.f32 %v1419_v36, %v1231_v37 }
 0x17b   : > { %v1706_v26 = vpop.f32.mrf.mxu0 }
 0x17c   : > { %5766 = vmatmul.msk.f32.gmra.mxu2 %vm279_vm1, %v7120_v48  ;;  %v1787_v50 = vadd.f32 %v1697_v8, %v1509_v25 }
 0x17d   : > { %5800 = vmatmul.msk.f32.gmra.mxu3 %vm279_vm1, %v6683_v56 }
 0x17e   : > { %v7182_v41 = vadd.f32 %v1975_v32, %v1787_v50  ;;  %5836 = vmatmul.msk.f32.gmra.mxu0 %vm279_vm1, %v6721_v4  ;;  %v902_v4 = vadd.f32 %v6920_v33, %v6918_v23  ;;  %v1841_v50 = vld [vmem:[#allocation2 + $0x1b1] sm:$0xff] }
 0x17f   : > { %5870 = vmatmul.msk.f32.gmra.mxu1 %vm279_vm1, %v7174_v31  ;;  %v1144_v19 = vpop.f32.mrf.mxu2 }
 0x180   : > { %v1422_v30 = vpop.f32.mrf.mxu3  ;;  %v1232_v1 = vadd.f32 %v1144_v19, %v899_v61  ;;  %v1984_v36 = vpop.f32.mrf.mxu1 }
 0x182   : > { %v1510_v38 = vadd.f32 %v1422_v30, %v1232_v1 }
 0x183   : > { %v1709_v60 = vpop.f32.mrf.mxu0 }
 0x184   : > { %5767 = vmatmul.msk.f32.gmra.mxu2 %vm279_vm1, %v7132_v9  ;;  %v1788_v56 = vadd.f32 %v1700_v29, %v1510_v38  ;;  %v1842_v38 = vld [vmem:[#allocation2 + $0x1c9] sm:$0xff] }
 0x185   : > { %5801 = vmatmul.msk.f32.gmra.mxu3 %vm279_vm1, %v6703_v62 }
 0x186   : > { %v7196_v8 = vadd.f32 %v1978_v17, %v1788_v56  ;;  %5837 = vmatmul.msk.f32.gmra.mxu0 %vm279_vm1, %v6741_v10  ;;  %v905_v10 = vadd.f32 %v6935_v39, %v6933_v28  ;;  %v9240_v39 = vld [vmem:[#allocation5_spill] sm:$0xff] }
 0x187   : > { %5871 = vmatmul.msk.f32.gmra.mxu1 %vm279_vm1, %v7188_v54  ;;  %v1147_v27 = vpop.f32.mrf.mxu2 }
 0x188   : > { %v1425_v21 = vpop.f32.mrf.mxu3  ;;  %v1233_v20 = vadd.f32 %v1147_v27, %v902_v4  ;;  %v1987_v30 = vpop.f32.mrf.mxu1  ;;  %v9242_v4 = vld [vmem:[#allocation7_spill] sm:$0xff] }
 0x18a   : > { %v1511_v32 = vadd.f32 %v1425_v21, %v1233_v20 }
 0x18b   : > { %v1712_v44 = vpop.f32.mrf.mxu0 }
 0x18c   : > { %5768 = vmatmul.msk.f32.gmra.mxu2 %vm279_vm1, %v7146_v59  ;;  %v1789_v62 = vadd.f32 %v1703_v43, %v1511_v32 }
 0x18d   : > { %5802 = vmatmul.msk.f32.gmra.mxu3 %vm279_vm1, %v6723_v5 }
 0x18e   : > { %v7210_v29 = vadd.f32 %v1981_v22, %v1789_v62  ;;  %5838 = vmatmul.msk.f32.gmra.mxu0 %vm279_vm1, %v6761_v16  ;;  %v908_v16 = vadd.f32 %v6951_v45, %v6949_v34  ;;  %v455_v45 = vld [vmem:[%s6531_s16 + $0xf0] sm:$0xff] }
 0x18f   : > { %5872 = vmatmul.msk.f32.gmra.mxu1 %vm279_vm1, %v7202_v55  ;;  %v1150_v23 = vpop.f32.mrf.mxu2  ;;  %488 = vst.msk [vmem:[#allocation2 + $0x208] sm:$0xff] %vm279_vm1, %v455_v45  ;;  %v9243_v62 = vld [vmem:[#allocation6_spill] sm:$0xff] }
 0x190   : > { %v1428_v33 = vpop.f32.mrf.mxu3  ;;  %v1234_v53 = vadd.f32 %v1150_v23, %v905_v10  ;;  %v914_v10 = vadd.f32 %v6983_v40, %v6981_v57  ;;  %v9244_v23 = vld [vmem:[#allocation9_spill] sm:$0xff]  ;;  %v917_v57 = vadd.f32 %v6999_v46, %v6997_v63  ;;  %v920_v46 = vadd.f32 %v7021_v7, %v7013_v6 }
 0x191   : > { %v9248_v63 = vld [vmem:[#allocation13_spill] sm:$0xff]  ;;  %v923_v6 = vadd.f32 %v7039_v13, %v7029_v58  ;;  %v926_v58 = vadd.f32 %v7059_v18, %v7045_v12  ;;  %v9251_v12 = vld [vmem:[#allocation15_spill] sm:$0xff] }
 0x192   : > { %v1512_v37 = vadd.f32 %v1428_v33, %v1234_v53 }
 0x193   : > { %v1715_v25 = vpop.f32.mrf.mxu0 }
 0x194   : > { %5769 = vmatmul.msk.f32.gmra.mxu2 %vm279_vm1, %v7160_v15  ;;  %v1790_v5 = vadd.f32 %v1706_v26, %v1512_v37  ;;  %v911_v26 = vadd.f32 %v6967_v42, %v6965_v51  ;;  %v456_v51 = vld [vmem:[%s6531_s16 + $0xf8] sm:$0xff] }
 0x195   : > { %5803 = vmatmul.msk.f32.gmra.mxu3 %vm279_vm1, %v6743_v11  ;;  %v9241_v11 = vld [vmem:[#allocation4_spill] sm:$0xff]  ;;  %489 = vst.msk [vmem:[#allocation2 + $0x210] sm:$0xff] %vm279_vm1, %v456_v51 }
 0x196   : > { %v7222_v28 = vadd.f32 %v1984_v36, %v1790_v5  ;;  %5839 = vmatmul.msk.f32.gmra.mxu0 %vm279_vm1, %v9240_v39  ;;  %v9246_v39 = vld [vmem:[#allocation11_spill] sm:$0xff] }
 0x197   : > { %5873 = vmatmul.msk.f32.gmra.mxu1 %vm279_vm1, %v1841_v50  ;;  %v1153_v43 = vpop.f32.mrf.mxu2 }
 0x198   : > { %v1431_v17 = vpop.f32.mrf.mxu3  ;;  %v1235_v61 = vadd.f32 %v1153_v43, %v908_v16  ;;  %v1844_v16 = vld [vmem:[#allocation2 + $0x1e9] sm:$0xff] }
 0x19a   : > { %v1513_v19 = vadd.f32 %v1431_v17, %v1235_v61 }
 0x19b   : > { %v1718_v1 = vpop.f32.mrf.mxu0 }
 0x19c   : > { %5770 = vmatmul.msk.f32.gmra.mxu2 %vm279_vm1, %v7174_v31  ;;  %v1791_v34 = vadd.f32 %v1709_v60, %v1513_v19  ;;  %v1843_v60 = vld [vmem:[#allocation2 + $0x1d1] sm:$0xff] }
 0x19d   : > { %5804 = vmatmul.msk.f32.gmra.mxu3 %vm279_vm1, %v9241_v11  ;;  %v1845_v11 = vld [vmem:[#allocation2 + $0x1f1] sm:$0xff] }
 0x19e   : > { %v7234_v56 = vadd.f32 %v1987_v30, %v1791_v34  ;;  %5840 = vmatmul.msk.f32.gmra.mxu0 %vm279_vm1, %v9242_v4  ;;  %v9247_v34 = vld [vmem:[#allocation10_spill] sm:$0xff] }
 0x19f   : > { %5874 = vmatmul.msk.f32.gmra.mxu1 %vm279_vm1, %v1842_v38  ;;  %v1156_v22 = vpop.f32.mrf.mxu2 }
 0x1a0   : > { %v1434_v27 = vpop.f32.mrf.mxu3  ;;  %v1236_v21 = vadd.f32 %v1156_v22, %v911_v26 }
 0x1a2   : > { %v1514_v20 = vadd.f32 %v1434_v27, %v1236_v21  ;;  %v1568_v21 = vld [vmem:[#allocation2 + $0x208] sm:$0xff] }
 0x1a3   : > { %v1721_v32 = vpop.f32.mrf.mxu0 }
 0x1a4   : > { %5771 = vmatmul.msk.f32.gmra.mxu2 %vm279_vm1, %v7188_v54  ;;  %v7244_v42 = vadd.f32 %v1712_v44, %v1514_v20  ;;  %v9245_v44 = vld [vmem:[#allocation8_spill] sm:$0xff] }
 0x1a5   : > { %5805 = vmatmul.msk.f32.gmra.mxu3 %vm279_vm1, %v9243_v62  ;;  %v9249_v20 = vld [vmem:[#allocation12_spill] sm:$0xff] }
 0x1a6   : > { %5841 = vmatmul.msk.f32.gmra.mxu0 %vm279_vm1, %v9244_v23 }
 0x1a7   : > { %5875 = vmatmul.msk.f32.gmra.mxu1 %vm279_vm1, %v1843_v60  ;;  %v1159_v33 = vpop.f32.mrf.mxu2 }
 0x1a8   : > { %v1437_v53 = vpop.f32.mrf.mxu3  ;;  %v1237_v36 = vadd.f32 %v1159_v33, %v914_v10  ;;  %v1569_v33 = vld [vmem:[#allocation2 + $0x210] sm:$0xff] }
 0x1aa   : > { %v1515_v37 = vadd.f32 %v1437_v53, %v1237_v36  ;;  %v1847_v53 = vld [vmem:[#allocation2 + $0x211] sm:$0xff] }
 0x1ab   : > { %v1724_v5 = vpop.f32.mrf.mxu0 }
 0x1ac   : > { %5772 = vmatmul.msk.f32.gmra.mxu2 %vm279_vm1, %v7202_v55  ;;  %v7257_v40 = vadd.f32 %v1715_v25, %v1515_v37 }
 0x1ad   : > { %5806 = vmatmul.msk.f32.gmra.mxu3 %vm279_vm1, %v9245_v44  ;;  %v1290_v44 = vld [vmem:[#allocation2 + $0x207] sm:$0xff] }
 0x1ae   : > { %5842 = vmatmul.msk.f32.gmra.mxu0 %vm279_vm1, %v9246_v39 }
 0x1af   : > { %5876 = vmatmul.msk.f32.gmra.mxu1 %vm279_vm1, %v1844_v16  ;;  %v1162_v43 = vpop.f32.mrf.mxu2 }
 0x1b0   : > { %v1440_v17 = vpop.f32.mrf.mxu3  ;;  %v1238_v61 = vadd.f32 %v1162_v43, %v917_v57 }
 0x1b2   : > { %v1516_v19 = vadd.f32 %v1440_v17, %v1238_v61  ;;  %v1291_v61 = vld [vmem:[#allocation2 + $0x20f] sm:$0xff] }
 0x1b3   : > { %v1727_v30 = vpop.f32.mrf.mxu0 }
 0x1b4   : > { %5773 = vmatmul.msk.f32.gmra.mxu2 %vm279_vm1, %v1841_v50  ;;  %v7267_v25 = vadd.f32 %v1718_v1, %v1516_v19  ;;  %v1846_v50 = vld [vmem:[#allocation2 + $0x209] sm:$0xff] }
 0x1b5   : > { %5807 = vmatmul.msk.f32.gmra.mxu3 %vm279_vm1, %v9247_v34 }
 0x1b6   : > { %5843 = vmatmul.msk.f32.gmra.mxu0 %vm279_vm1, %v9248_v63 }
 0x1b7   : > { %5877 = vmatmul.msk.f32.gmra.mxu1 %vm279_vm1, %v1845_v11  ;;  %v1165_v45 = vpop.f32.mrf.mxu2 }
 0x1b8   : > { %v1443_v26 = vpop.f32.mrf.mxu3  ;;  %v1239_v4 = vadd.f32 %v1165_v45, %v920_v46  ;;  %v9252_v46 = vld [vmem:[#allocation17_spill] sm:$0xff] }
 0x1b9   : > { %v2095_v45 = vld [vmem:[#allocation2 + $0x47] sm:$0xff] }
 0x1ba   : > { %v1517_v22 = vadd.f32 %v1443_v26, %v1239_v4  ;;  %v2373_v26 = vld [vmem:[#allocation2 + $0x48] sm:$0xff] }
 0x1bb   : > { %v1730_v27 = vpop.f32.mrf.mxu0 }
 0x1bc   : > { %5774 = vmatmul.msk.f32.gmra.mxu2 %vm279_vm1, %v1842_v38  ;;  %v7277_v1 = vadd.f32 %v1721_v32, %v1517_v22  ;;  %v9250_v38 = vld [vmem:[#allocation14_spill] sm:$0xff] }
 0x1bd   : > { %5808 = vmatmul.msk.f32.gmra.mxu3 %vm279_vm1, %v9249_v20  ;;  %v2096_v20 = vld [vmem:[#allocation2 + $0x4f] sm:$0xff] }
 0x1be   : > { %5844 = vmatmul.msk.f32.gmra.mxu0 %vm279_vm1, %v1568_v21  ;;  %v9254_v21 = vld [vmem:[#allocation16_spill] sm:$0xff] }
 0x1bf   : > { %5878 = vmatmul.msk.f32.gmra.mxu1 %vm279_vm1, %v1846_v50  ;;  %v1168_v7 = vpop.f32.mrf.mxu2 }
 0x1c0   : > { %v1446_v62 = vpop.f32.mrf.mxu3  ;;  %v1240_v51 = vadd.f32 %v1168_v7, %v923_v6  ;;  %v2374_v6 = vld [vmem:[#allocation2 + $0x50] sm:$0xff] }
 0x1c2   : > { %v1518_v10 = vadd.f32 %v1446_v62, %v1240_v51 }
 0x1c3   : > { %v1733_v23 = vpop.f32.mrf.mxu0 }
 0x1c4   : > { %5775 = vmatmul.msk.f32.gmra.mxu2 %vm279_vm1, %v1843_v60  ;;  %v7286_v32 = vadd.f32 %v1724_v5, %v1518_v10  ;;  %v929_v5 = vadd.f32 %v7075_v47, %v7061_v0  ;;  %v9255_v10 = vld [vmem:[#allocation21_spill] sm:$0xff] }
 0x1c5   : > { %5809 = vmatmul.msk.f32.gmra.mxu3 %vm279_vm1, %v9250_v38 }
 0x1c6   : > { %5845 = vmatmul.msk.f32.gmra.mxu0 %vm279_vm1, %v1569_v33 }
 0x1c7   : > { %5879 = vmatmul.msk.f32.gmra.mxu1 %vm279_vm1, %v1847_v53  ;;  %v1171_v13 = vpop.f32.mrf.mxu2  ;;  %v9256_v53 = vld [vmem:[#allocation18_spill] sm:$0xff] }
 0x1c8   : > { %v1449_v36 = vpop.f32.mrf.mxu3  ;;  %v1241_v37 = vadd.f32 %v1171_v13, %v926_v58  ;;  %v2097_v58 = vld [vmem:[#allocation2 + $0x67] sm:$0xff] }
 0x1c9   : > { %v2375_v13 = vld [vmem:[#allocation2 + $0x68] sm:$0xff] }
 0x1ca   : > { %v1519_v57 = vadd.f32 %v1449_v36, %v1241_v37 }
 0x1cb   : > { %v1736_v39 = vpop.f32.mrf.mxu0 }
 0x1cc   : > { %5776 = vmatmul.msk.f32.gmra.mxu2 %vm279_vm1, %v1844_v16  ;;  %v7294_v60 = vadd.f32 %v1727_v30, %v1519_v57  ;;  %v932_v30 = vadd.f32 %v7100_v3, %v7077_v35  ;;  %v9257_v57 = vld [vmem:[#allocation23_spill] sm:$0xff] }
 0x1cd   : > { %5810 = vmatmul.msk.f32.gmra.mxu3 %vm279_vm1, %v1290_v44 }
 0x1ce   : > { %5950 = vmatmul.msk.f32.vlgmr.msra.gmra.mxu0 %vm279_vm1, %v9251_v12  ;;  %v9258_v12 = vld [vmem:[#allocation20_spill] sm:$0xff] }
 0x1cf   : > { %v1174_v18 = vpop.f32.mrf.mxu2 }
 0x1d0   : > { %v1452_v43 = vpop.f32.mrf.mxu3  ;;  %v1242_v17 = vadd.f32 %v1174_v18, %v929_v5 }
 0x1d2   : > { %v1520_v19 = vadd.f32 %v1452_v43, %v1242_v17  ;;  %v2098_v43 = vld [vmem:[#allocation2 + $0x6f] sm:$0xff] }
 0x1d3   : > { %v1739_v34 = vpop.f32.mrf.mxu0  ;;  %v2376_v17 = vld [vmem:[#allocation2 + $0x70] sm:$0xff] }
 0x1d4   : > { %5777 = vmatmul.msk.f32.gmra.mxu2 %vm279_vm1, %v1845_v11  ;;  %v7302_v16 = vadd.f32 %v1730_v27, %v1520_v19  ;;  %v9253_v27 = vld [vmem:[#allocation19_spill] sm:$0xff] }
 0x1d5   : > { %5811 = vmatmul.msk.f32.gmra.mxu3 %vm279_vm1, %v1291_v61 }
 0x1d6   : > { %5951 = vmatmul.msk.f32.gmra.mxu0 %vm279_vm1, %v9252_v46  ;;  %v9259_v46 = vld [vmem:[#allocation25_spill] sm:$0xff] }
 0x1d7   : > { %v1177_v0 = vpop.f32.mrf.mxu2 }
 0x1d8   : > { %v1455_v47 = vpop.f32.mrf.mxu3  ;;  %v1243_v63 = vadd.f32 %v1177_v0, %v932_v30 }
 0x1da   : > { %v1521_v4 = vadd.f32 %v1455_v47, %v1243_v63  ;;  %v9260_v47 = vld [vmem:[#allocation22_spill] sm:$0xff] }
 0x1db   : > { %v1742_v22 = vpop.f32.mrf.mxu0 }
 0x1dc   : > { %5882 = vmatmul.msk.f32.vlgmr.msra.gmra.mxu2 %vm279_vm1, %v2095_v45  ;;  %v7310_v11 = vadd.f32 %v1733_v23, %v1521_v4  ;;  %v2099_v45 = vld [vmem:[#allocation2 + $0x87] sm:$0xff] }
 0x1dd   : > { %5916 = vmatmul.msk.f32.vlgmr.msra.gmra.mxu3 %vm279_vm1, %v2373_v26  ;;  %v2377_v26 = vld [vmem:[#allocation2 + $0x88] sm:$0xff] }
 0x1de   : > { %5952 = vmatmul.msk.f32.gmra.mxu0 %vm279_vm1, %v9253_v27 }
 0x1df   : > { %v1180_v35 = vpop.f32.mrf.mxu2 }
 0x1e0   : > { %v1458_v3 = vpop.f32.mrf.mxu3  ;;  %v1244_v50 = vadd.f32 %v1180_v35, %v9254_v21 }
 0x1e2   : > { %v1522_v7 = vadd.f32 %v1458_v3, %v1244_v50  ;;  %v7340_v3 = vpop.f32.mrf.mxu1 }
 0x1e3   : > { %v1745_v62 = vpop.f32.mrf.mxu0 }
 0x1e4   : > { %5883 = vmatmul.msk.f32.gmra.mxu2 %vm279_vm1, %v2096_v20  ;;  %v7317_v51 = vadd.f32 %v1736_v39, %v1522_v7  ;;  %v9262_v20 = vld [vmem:[#allocation24_spill] sm:$0xff]  ;;  %v2100_v7 = vld [vmem:[#allocation2 + $0x8f] sm:$0xff] }
 0x1e5   : > { %5917 = vmatmul.msk.f32.gmra.mxu3 %vm279_vm1, %v2374_v6 }
 0x1e6   : > { %5953 = vmatmul.msk.f32.gmra.mxu0 %vm279_vm1, %v9255_v10  ;;  %v2378_v10 = vld [vmem:[#allocation2 + $0x90] sm:$0xff] }
 0x1e7   : > { %v1183_v23 = vpop.f32.mrf.mxu2 }
 0x1e8   : > { %v1461_v33 = vpop.f32.mrf.mxu3  ;;  %v1245_v38 = vadd.f32 %v1183_v23, %v9256_v53 }
 0x1ea   : > { %v1523_v36 = vadd.f32 %v1461_v33, %v1245_v38 }
 0x1eb   : > { %v1748_v37 = vpop.f32.mrf.mxu0 }
 0x1ec   : > { %5884 = vmatmul.msk.f32.gmra.mxu2 %vm279_vm1, %v2097_v58  ;;  %v7324_v44 = vadd.f32 %v1739_v34, %v1523_v36  ;;  %v9264_v36 = vld [vmem:[#allocation26_spill] sm:$0xff] }
 0x1ed   : > { %5918 = vmatmul.msk.f32.gmra.mxu3 %vm279_vm1, %v2375_v13  ;;  %v7351_v13 = vpop.f32.mrf.mxu1 }
 0x1ee   : > { %5954 = vmatmul.msk.f32.gmra.mxu0 %vm279_vm1, %v9257_v57 }
 0x1ef   : > { %v1186_v39 = vpop.f32.mrf.mxu2 }
 0x1f0   : > { %v1464_v5 = vpop.f32.mrf.mxu3  ;;  %v1246_v18 = vadd.f32 %v1186_v39, %v9258_v12  ;;  %v2101_v39 = vld [vmem:[#allocation2 + $0xa7] sm:$0xff] }
 0x1f2   : > { %v1524_v61 = vadd.f32 %v1464_v5, %v1246_v18  ;;  %v2379_v5 = vld [vmem:[#allocation2 + $0xa8] sm:$0xff] }
 0x1f3   : > { %v1751_v19 = vpop.f32.mrf.mxu0 }
 0x1f4   : > { %5885 = vmatmul.msk.f32.gmra.mxu2 %vm279_vm1, %v2098_v43  ;;  %v7331_v30 = vadd.f32 %v1742_v22, %v1524_v61  ;;  %v9261_v22 = vld [vmem:[#allocation27_spill] sm:$0xff] }
 0x1f5   : > { %5919 = vmatmul.msk.f32.gmra.mxu3 %vm279_vm1, %v2376_v17 }
 0x1f6   : > { %5955 = vmatmul.msk.f32.gmra.mxu0 %vm279_vm1, %v9259_v46  ;;  %v9266_v46 = vld [vmem:[#allocation28_spill] sm:$0xff] }
 0x1f7   : > { %v1189_v34 = vpop.f32.mrf.mxu2 }
 0x1f8   : > { %v1467_v0 = vpop.f32.mrf.mxu3  ;;  %v1247_v63 = vadd.f32 %v1189_v34, %v9260_v47  ;;  %v2380_v47 = vld [vmem:[#allocation2 + $0xb0] sm:$0xff] }
 0x1fa   : > { %v1525_v4 = vadd.f32 %v1467_v0, %v1247_v63  ;;  %v2102_v0 = vld [vmem:[#allocation2 + $0xaf] sm:$0xff]  ;;  %v7361_v63 = vpop.f32.mrf.mxu1 }
 0x1fb   : > { %v1754_v27 = vpop.f32.mrf.mxu0 }
 0x1fc   : > { %5886 = vmatmul.msk.f32.gmra.mxu2 %vm279_vm1, %v2099_v45  ;;  %v7338_v35 = vadd.f32 %v1745_v62, %v1525_v4  ;;  %v9263_v62 = vld [vmem:[#allocation29_spill] sm:$0xff] }
 0x1fd   : > { %5920 = vmatmul.msk.f32.gmra.mxu3 %vm279_vm1, %v2377_v26 }
 0x1fe   : > { %5956 = vmatmul.msk.f32.gmra.mxu0 %vm279_vm1, %v9261_v22 }
 0x1ff   : > { %v1192_v21 = vpop.f32.mrf.mxu2 }
 0x200   : > { %v1470_v50 = vpop.f32.mrf.mxu3  ;;  %v1248_v6 = vadd.f32 %v1192_v21, %v9262_v20 }
 0x202   : > { %v1526_v23 = vadd.f32 %v1470_v50, %v1248_v6  ;;  %v9268_v50 = vld [vmem:[#allocation30_spill] sm:$0xff]  ;;  %v2103_v6 = vld [vmem:[#allocation2 + $0xc7] sm:$0xff] }
 0x203   : > { %v1757_v33 = vpop.f32.mrf.mxu0 }
 0x204   : > { %5887 = vmatmul.msk.f32.gmra.mxu2 %vm279_vm1, %v2100_v7  ;;  %v7347_v53 = vadd.f32 %v1748_v37, %v1526_v23  ;;  %v9265_v37 = vld [vmem:[#allocation31_spill] sm:$0xff]  ;;  %v2381_v7 = vld [vmem:[#allocation2 + $0xc8] sm:$0xff] }
 0x205   : > { %5921 = vmatmul.msk.f32.gmra.mxu3 %vm279_vm1, %v2378_v10 }
 0x206   : > { %5957 = vmatmul.msk.f32.gmra.mxu0 %vm279_vm1, %v9263_v62  ;;  %v7370_v62 = vpop.f32.mrf.mxu1 }
 0x207   : > { %v1195_v38 = vpop.f32.mrf.mxu2 }
 0x208   : > { %v1473_v58 = vpop.f32.mrf.mxu3  ;;  %v1249_v57 = vadd.f32 %v1195_v38, %v9264_v36 }
 0x20a   : > { %v1527_v12 = vadd.f32 %v1473_v58, %v1249_v57  ;;  %v9270_v57 = vld [vmem:[#allocation32_spill] sm:$0xff] }
 0x20b   : > { %v1760_v18 = vpop.f32.mrf.mxu0 }
 0x20c   : > { %5888 = vmatmul.msk.f32.gmra.mxu2 %vm279_vm1, %v2101_v39  ;;  %v7356_v43 = vadd.f32 %v1751_v19, %v1527_v12  ;;  %v9267_v19 = vld [vmem:[#allocation33_spill] sm:$0xff]  ;;  %v2382_v12 = vld [vmem:[#allocation2 + $0xd0] sm:$0xff] }
 0x20d   : > { %5922 = vmatmul.msk.f32.gmra.mxu3 %vm279_vm1, %v2379_v5  ;;  %v2104_v5 = vld [vmem:[#allocation2 + $0xcf] sm:$0xff] }
 0x20e   : > { %5958 = vmatmul.msk.f32.gmra.mxu0 %vm279_vm1, %v9265_v37 }
 0x20f   : > { %v1198_v17 = vpop.f32.mrf.mxu2 }
 0x210   : > { %v1476_v61 = vpop.f32.mrf.mxu3  ;;  %v1250_v34 = vadd.f32 %v1198_v17, %v9266_v46  ;;  %v7383_v46 = vpop.f32.mrf.mxu1 }
 0x212   : > { %v1528_v45 = vadd.f32 %v1476_v61, %v1250_v34 }
 0x213   : > { %v1763_v26 = vpop.f32.mrf.mxu0 }
 0x214   : > { %5889 = vmatmul.msk.f32.gmra.mxu2 %vm279_vm1, %v2102_v0  ;;  %v7365_v4 = vadd.f32 %v1754_v27, %v1528_v45  ;;  %v9269_v27 = vld [vmem:[#allocation35_spill] sm:$0xff] }
 0x215   : > { %5923 = vmatmul.msk.f32.gmra.mxu3 %vm279_vm1, %v2380_v47  ;;  %v9272_v47 = vld [vmem:[#allocation34_spill] sm:$0xff] }
 0x216   : > { %5959 = vmatmul.msk.f32.gmra.mxu0 %vm279_vm1, %v9267_v19  ;;  %v2105_v19 = vld [vmem:[#allocation2 + $0xe7] sm:$0xff] }
 0x217   : > { %v1201_v22 = vpop.f32.mrf.mxu2 }
 0x218   : > { %v1479_v21 = vpop.f32.mrf.mxu3  ;;  %v1251_v20 = vadd.f32 %v1201_v22, %v9268_v50  ;;  %v2383_v22 = vld [vmem:[#allocation2 + $0xe8] sm:$0xff] }
 0x21a   : > { %v1529_v10 = vadd.f32 %v1479_v21, %v1251_v20 }
 0x21b   : > { %v1766_v23 = vpop.f32.mrf.mxu0 }
 0x21c   : > { %5890 = vmatmul.msk.f32.gmra.mxu2 %vm279_vm1, %v2103_v6  ;;  %v7374_v38 = vadd.f32 %v1757_v33, %v1529_v10  ;;  %v9271_v33 = vld [vmem:[#allocation37_spill] sm:$0xff]  ;;  %v7394_v10 = vpop.f32.mrf.mxu1 }
 0x21d   : > { %5924 = vmatmul.msk.f32.gmra.mxu3 %vm279_vm1, %v2381_v7 }
 0x21e   : > { %5960 = vmatmul.msk.f32.gmra.mxu0 %vm279_vm1, %v9269_v27  ;;  %v9274_v27 = vld [vmem:[#allocation36_spill] sm:$0xff] }
 0x21f   : > { %v1204_v58 = vpop.f32.mrf.mxu2 }
 0x220   : > { %v1482_v36 = vpop.f32.mrf.mxu3  ;;  %v1252_v39 = vadd.f32 %v1204_v58, %v9270_v57  ;;  %v2384_v57 = vld [vmem:[#allocation2 + $0xf0] sm:$0xff] }
 0x222   : > { %v1530_v37 = vadd.f32 %v1482_v36, %v1252_v39  ;;  %v2106_v36 = vld [vmem:[#allocation2 + $0xef] sm:$0xff] }
 0x223   : > { %v1769_v17 = vpop.f32.mrf.mxu0 }
 0x224   : > { %5891 = vmatmul.msk.f32.gmra.mxu2 %vm279_vm1, %v2104_v5  ;;  %v7381_v61 = vadd.f32 %v1760_v18, %v1530_v37  ;;  %v9273_v18 = vld [vmem:[#allocation39_spill] sm:$0xff] }
 0x225   : > { %5925 = vmatmul.msk.f32.gmra.mxu3 %vm279_vm1, %v2382_v12 }
 0x226   : > { %5961 = vmatmul.msk.f32.gmra.mxu0 %vm279_vm1, %v9271_v33 }
 0x227   : > { %v1207_v34 = vpop.f32.mrf.mxu2 }
 0x228   : > { %v1485_v0 = vpop.f32.mrf.mxu3  ;;  %v1253_v45 = vadd.f32 %v1207_v34, %v9272_v47  ;;  %v9276_v34 = vld [vmem:[#allocation38_spill] sm:$0xff]  ;;  %v2107_v47 = vld [vmem:[#allocation2 + $0x107] sm:$0xff] }
 0x22a   : > { %v1531_v21 = vadd.f32 %v1485_v0, %v1253_v45  ;;  %v2385_v45 = vld [vmem:[#allocation2 + $0x108] sm:$0xff] }
 0x22b   : > { %v1772_v50 = vpop.f32.mrf.mxu0 }
 0x22c   : > { %5892 = vmatmul.msk.f32.gmra.mxu2 %vm279_vm1, %v2105_v19  ;;  %v7390_v20 = vadd.f32 %v1763_v26, %v1531_v21  ;;  %v9275_v26 = vld [vmem:[#allocation41_spill] sm:$0xff]  ;;  %v7404_v19 = vpop.f32.mrf.mxu1  ;;  %v3098_v21 = vld [vmem:[%s9121_s4] sm:$0xff] }
 0x22d   : > { %5926 = vmatmul.msk.f32.gmra.mxu3 %vm279_vm1, %v2383_v22  ;;  %3453 = vmatpush.msrb.mxu2 %v3098_v21  ;;  %v2387_v21 = vld [vmem:[#allocation2 + $0x128] sm:$0xff] }
 0x22e   : > { %5962 = vmatmul.msk.f32.gmra.mxu0 %vm279_vm1, %v9273_v18 }
 0x22f   : > { %v1210_v6 = vpop.f32.mrf.mxu2 }
 0x230   : > { %v1488_v7 = vpop.f32.mrf.mxu3  ;;  %v1254_v58 = vadd.f32 %v1210_v6, %v9274_v27 }
 0x232   : > { %v1532_v39 = vadd.f32 %v1488_v7, %v1254_v58  ;;  %v9277_v7 = vmov 0.0  }
 0x233   : > { %v1775_v5 = vpop.f32.mrf.mxu0  ;;  %358 = vst.msk [vmem:[#allocation3 + $0x28] sm:$0xff] %vm352_vm2, %v9277_v7 }
 0x234   : > { %5893 = vmatmul.msk.f32.gmra.mxu2 %vm279_vm1, %v2106_v36  ;;  %v7399_v12 = vadd.f32 %v1766_v23, %v1532_v39  ;;  %v6047_v23 = vld [vmem:[%s9121_s4 + $0x10] sm:$0xff]  ;;  %353 = vst.msk [vmem:[#allocation3] sm:$0xff] %vm352_vm2, %v9277_v7  ;;  %v9278_v36 = vld [vmem:[#allocation40_spill] sm:$0xff] }
 0x235   : > { %5927 = vmatmul.msk.f32.gmra.mxu3 %vm279_vm1, %v2384_v57  ;;  %354 = vst.msk [vmem:[#allocation3 + $0x8] sm:$0xff] %vm352_vm2, %v9277_v7  ;;  %v2108_v57 = vld [vmem:[#allocation2 + $0x10f] sm:$0xff] }
 0x236   : > { %5963 = vmatmul.msk.f32.gmra.mxu0 %vm279_vm1, %v9275_v26  ;;  %3696 = vmatpush.msrb.mxu3 %v6047_v23  ;;  %355 = vst.msk [vmem:[#allocation3 + $0x10] sm:$0xff] %vm352_vm2, %v9277_v7  ;;  %v2386_v39 = vld [vmem:[#allocation2 + $0x110] sm:$0xff] }
 0x237   : > { %v1213_v37 = vpop.f32.mrf.mxu2  ;;  %356 = vst.msk [vmem:[#allocation3 + $0x18] sm:$0xff] %vm352_vm2, %v9277_v7 }
 0x238   : > { %v1491_v33 = vpop.f32.mrf.mxu3  ;;  %v1255_v0 = vadd.f32 %v1213_v37, %v9276_v34  ;;  %357 = vst.msk [vmem:[#allocation3 + $0x20] sm:$0xff] %vm352_vm2, %v9277_v7  ;;  %v7439_v37 = vpop.f32.mrf.mxu1 }
 0x239   : > { %359 = vst.msk [vmem:[#allocation3 + $0x30] sm:$0xff] %vm352_vm2, %v9277_v7 }
 0x23a   : > { %v1533_v22 = vadd.f32 %v1491_v33, %v1255_v0  ;;  %360 = vst.msk [vmem:[#allocation3 + $0x38] sm:$0xff] %vm352_vm2, %v9277_v7 }
 0x23b   : > { %v7412_v18 = vpop.f32.mrf.mxu0  ;;  %361 = vst.msk [vmem:[#allocation3 + $0x40] sm:$0xff] %vm352_vm2, %v9277_v7 }
 0x23c   : > { %5894 = vmatmul.msk.f32.gmra.mxu2 %vm279_vm1, %v2107_v47  ;;  %v7416_v6 = vadd.f32 %v1769_v17, %v1533_v22  ;;  %362 = vst.msk [vmem:[#allocation3 + $0x48] sm:$0xff] %vm352_vm2, %v9277_v7  ;;  %v3099_v34 = vld [vmem:[#allocation3 + $0x8] sm:$0xff] }
 0x23d   : > { %5928 = vmatmul.msk.f32.gmra.mxu3 %vm279_vm1, %v2385_v45  ;;  %363 = vst.msk [vmem:[#allocation3 + $0x50] sm:$0xff] %vm352_vm2, %v9277_v7  ;;  %5983 = vmatmul.msk.f32.vlgmr.msra.gmra.mxu1 %vm352_vm2, %v3099_v34  ;;  %v2109_v22 = vld [vmem:[#allocation2 + $0x127] sm:$0xff] }
 0x23e   : > { %5964 = vmatmul.msk.f32.gmra.mxu0 %vm279_vm1, %v7094_v52  ;;  %364 = vst.msk [vmem:[#allocation3 + $0x58] sm:$0xff] %vm352_vm2, %v9277_v7 }
 0x23f   : > { %v1216_v27 = vpop.f32.mrf.mxu2  ;;  %365 = vst.msk [vmem:[#allocation3 + $0x60] sm:$0xff] %vm352_vm2, %v9277_v7 }
 0x240   : > { %v1494_v58 = vpop.f32.mrf.mxu3  ;;  %v1256_v17 = vadd.f32 %v1216_v27, %v9278_v36  ;;  %366 = vst.msk [vmem:[#allocation3 + $0x68] sm:$0xff] %vm352_vm2, %v9277_v7 }
 0x241   : > { %367 = vst.msk [vmem:[#allocation3 + $0x70] sm:$0xff] %vm352_vm2, %v9277_v7 }
 0x242   : > { %v1534_v26 = vadd.f32 %v1494_v58, %v1256_v17  ;;  %368 = vst.msk [vmem:[#allocation3 + $0x78] sm:$0xff] %vm352_vm2, %v9277_v7  ;;  %v7475_v58 = vpop.f32.mrf.mxu1 }
 0x243   : > { %v7435_v52 = vpop.f32.mrf.mxu0  ;;  %369 = vst.msk [vmem:[#allocation3 + $0x80] sm:$0xff] %vm352_vm2, %v9277_v7 }
 0x244   : > { %5895 = vmatmul.msk.f32.gmra.mxu2 %vm279_vm1, %v2108_v57  ;;  %v7443_v33 = vadd.f32 %v1772_v50, %v1534_v26  ;;  %v9279_v50 = vld [vmem:[#allocation42_spill] sm:$0xff]  ;;  %370 = vst.msk [vmem:[#allocation3 + $0x88] sm:$0xff] %vm352_vm2, %v9277_v7 }
 0x245   : > { %5929 = vmatmul.msk.f32.gmra.mxu3 %vm279_vm1, %v2386_v39  ;;  %371 = vst.msk [vmem:[#allocation3 + $0x90] sm:$0xff] %vm352_vm2, %v9277_v7  ;;  %v2110_v39 = vld [vmem:[#allocation2 + $0x12f] sm:$0xff] }
 0x246   : > { %5965 = vmatmul.msk.f32.gmra.mxu0 %vm279_vm1, %v7108_v2  ;;  %372 = vst.msk [vmem:[#allocation3 + $0x98] sm:$0xff] %vm352_vm2, %v9277_v7  ;;  %v2388_v26 = vld [vmem:[#allocation2 + $0x130] sm:$0xff] }
 0x247   : > { %v1219_v0 = vpop.f32.mrf.mxu2  ;;  %373 = vst.msk [vmem:[#allocation3 + $0xa0] sm:$0xff] %vm352_vm2, %v9277_v7 }
 0x248   : > { %v1497_v47 = vpop.f32.mrf.mxu3  ;;  %v1257_v45 = vadd.f32 %v1219_v0, %v9279_v50  ;;  %374 = vst.msk [vmem:[#allocation3 + $0xa8] sm:$0xff] %vm352_vm2, %v9277_v7 }
 0x249   : > { %375 = vst.msk [vmem:[#allocation3 + $0xb0] sm:$0xff] %vm352_vm2, %v9277_v7 }
 0x24a   : > { %v1535_v2 = vadd.f32 %v1497_v47, %v1257_v45  ;;  %376 = vst.msk [vmem:[#allocation3 + $0xb8] sm:$0xff] %vm352_vm2, %v9277_v7  ;;  %v7509_v45 = vpop.f32.mrf.mxu1 }
 0x24b   : > { %v7463_v23 = vpop.f32.mrf.mxu0  ;;  %377 = vst.msk [vmem:[#allocation3 + $0xc0] sm:$0xff] %vm352_vm2, %v9277_v7 }
 0x24c   : > { %5896 = vmatmul.msk.f32.gmra.mxu2 %vm279_vm1, %v2109_v22  ;;  %v7469_v27 = vadd.f32 %v1775_v5, %v1535_v2  ;;  %v9280_v5 = vld [vmem:[#allocation43_spill] sm:$0xff]  ;;  %378 = vst.msk [vmem:[#allocation3 + $0xc8] sm:$0xff] %vm352_vm2, %v9277_v7  ;;  %v2389_v2 = vld [vmem:[#allocation2 + $0x148] sm:$0xff] }
 0x24d   : > { %5930 = vmatmul.msk.f32.gmra.mxu3 %vm279_vm1, %v2387_v21  ;;  %379 = vst.msk [vmem:[#allocation3 + $0xd0] sm:$0xff] %vm352_vm2, %v9277_v7  ;;  %v2111_v21 = vld [vmem:[#allocation2 + $0x147] sm:$0xff] }
 0x24e   : > { %5966 = vmatmul.msk.f32.gmra.mxu0 %vm279_vm1, %v7120_v48  ;;  %380 = vst.msk [vmem:[#allocation3 + $0xd8] sm:$0xff] %vm352_vm2, %v9277_v7 }
 0x24f   : > { %v1222_v36 = vpop.f32.mrf.mxu2  ;;  %381 = vst.msk [vmem:[#allocation3 + $0xe0] sm:$0xff] %vm352_vm2, %v9277_v7 }
 0x250   : > { %v1500_v17 = vpop.f32.mrf.mxu3  ;;  %v1258_v57 = vadd.f32 %v1222_v36, %v9280_v5  ;;  %382 = vst.msk [vmem:[#allocation3 + $0xe8] sm:$0xff] %vm352_vm2, %v9277_v7  ;;  %v3100_v5 = vld [vmem:[#allocation3 + $0x10] sm:$0xff] }
 0x251   : > { %383 = vst.msk [vmem:[#allocation3 + $0xf0] sm:$0xff] %vm352_vm2, %v9277_v7  ;;  %5984 = vmatmul.msk.f32.gmra.mxu1 %vm352_vm2, %v3100_v5 }
 0x252   : > { %v1536_v34 = vadd.f32 %v1500_v17, %v1258_v57  ;;  %384 = vst.msk [vmem:[#allocation3 + $0xf8] sm:$0xff] %vm352_vm2, %v9277_v7 }
 0x253   : > { %v7490_v48 = vpop.f32.mrf.mxu0  ;;  %385 = vst.msk [vmem:[#allocation3 + $0x100] sm:$0xff] %vm352_vm2, %v9277_v7 }
 0x254   : > { %5897 = vmatmul.msk.f32.gmra.mxu2 %vm279_vm1, %v2110_v39  ;;  %v7497_v0 = vadd.f32 %v7412_v18, %v1536_v34  ;;  %v9281_v18 = vld [vmem:[#allocation44_spill] sm:$0xff]  ;;  %386 = vst.msk [vmem:[#allocation3 + $0x108] sm:$0xff] %vm352_vm2, %v9277_v7  ;;  %v2390_v34 = vld [vmem:[#allocation2 + $0x150] sm:$0xff] }
 0x255   : > { %5931 = vmatmul.msk.f32.gmra.mxu3 %vm279_vm1, %v2388_v26  ;;  %387 = vst.msk [vmem:[#allocation3 + $0x110] sm:$0xff] %vm352_vm2, %v9277_v7  ;;  %v2112_v26 = vld [vmem:[#allocation2 + $0x14f] sm:$0xff] }
 0x256   : > { %5967 = vmatmul.msk.f32.gmra.mxu0 %vm279_vm1, %v7132_v9  ;;  %388 = vst.msk [vmem:[#allocation3 + $0x118] sm:$0xff] %vm352_vm2, %v9277_v7 }
 0x257   : > { %v1225_v47 = vpop.f32.mrf.mxu2  ;;  %389 = vst.msk [vmem:[#allocation3 + $0x120] sm:$0xff] %vm352_vm2, %v9277_v7 }
 0x258   : > { %v1503_v50 = vpop.f32.mrf.mxu3  ;;  %v1259_v22 = vadd.f32 %v1225_v47, %v9281_v18  ;;  %390 = vst.msk [vmem:[#allocation3 + $0x128] sm:$0xff] %vm352_vm2, %v9277_v7  ;;  %v7543_v47 = vpop.f32.mrf.mxu1 }
 0x259   : > { %391 = vst.msk [vmem:[#allocation3 + $0x130] sm:$0xff] %vm352_vm2, %v9277_v7 }
 0x25a   : > { %v1537_v9 = vadd.f32 %v1503_v50, %v1259_v22  ;;  %392 = vst.msk [vmem:[#allocation3 + $0x138] sm:$0xff] %vm352_vm2, %v9277_v7  ;;  %v7560_v22 = vld [vmem:[%s9120_s3] ss:$0 sm:$0xff] }
 0x25b   : > { %v7520_v36 = vpop.f32.mrf.mxu0  ;;  %393 = vst.msk [vmem:[#allocation3 + $0x140] sm:$0xff] %vm352_vm2, %v9277_v7 }
 0x25c   : > { %5898 = vmatmul.msk.f32.gmra.mxu2 %vm279_vm1, %v2111_v21  ;;  %v7525_v17 = vadd.f32 %v7435_v52, %v1537_v9  ;;  %v6080_v21 = vld [vmem:[%s9121_s4 + $0x18] sm:$0xff]  ;;  %394 = vst.msk [vmem:[#allocation3 + $0x148] sm:$0xff] %vm352_vm2, %v9277_v7 }
 0x25d   : > { %5932 = vmatmul.msk.f32.gmra.mxu3 %vm279_vm1, %v2389_v2  ;;  %3971 = vmatpush.msrb.mxu0 %v6080_v21  ;;  %395 = vst.msk [vmem:[#allocation3 + $0x150] sm:$0xff] %vm352_vm2, %v9277_v7 }
 0x25e   : > { %5968 = vmatmul.msk.f32.gmra.mxu0 %vm279_vm1, %v7146_v59  ;;  %v7548_v59 = vld [vmem:[%s9119_s2] ss:$0 sm:$0xff]  ;;  %396 = vst.msk [vmem:[#allocation3 + $0x158] sm:$0xff] %vm352_vm2, %v9277_v7 }
 0x25f   : > { %v2245_v57 = vpop.f32.mrf.mxu2  ;;  %397 = vst.msk [vmem:[#allocation3 + $0x160] sm:$0xff] %vm352_vm2, %v9277_v7 }
 0x260   : > { %v2523_v39 = vpop.f32.mrf.mxu3  ;;  %v2341_v52 = vadd.f32 %v2245_v57, %v7140_v14  ;;  %398 = vst.msk [vmem:[#allocation3 + $0x168] sm:$0xff] %vm352_vm2, %v9277_v7 }
 0x261   : > { %399 = vst.msk [vmem:[#allocation3 + $0x170] sm:$0xff] %vm352_vm2, %v9277_v7 }
 0x262   : > { %v2619_v50 = vadd.f32 %v2523_v39, %v2341_v52  ;;  %v2113_v39 = vld [vmem:[#allocation2 + $0x167] sm:$0xff]  ;;  %400 = vst.msk [vmem:[#allocation3 + $0x178] sm:$0xff] %vm352_vm2, %v9277_v7 }
 0x263   : > { %v7554_v14 = vpop.f32.mrf.mxu0  ;;  %v2391_v52 = vld [vmem:[#allocation2 + $0x168] sm:$0xff]  ;;  %401 = vst.msk [vmem:[#allocation3 + $0x180] sm:$0xff] %vm352_vm2, %v9277_v7 }
 0x264   : > { %v2897_v18 = vadd.f32 %v7463_v23, %v2619_v50  ;;  %5899 = vmatmul.msk.f32.gmra.mxu2 %vm279_vm1, %v2112_v26  ;;  %v6113_v23 = vld [vmem:[%s9121_s4 + $0x20] sm:$0xff]  ;;  %402 = vst.msk [vmem:[#allocation3 + $0x188] sm:$0xff] %vm352_vm2, %v9277_v7 }
 0x265   : > { %5933 = vmatmul.msk.f32.gmra.mxu3 %vm279_vm1, %v2390_v34  ;;  %4246 = vmatpush.msrb.mxu1 %v6113_v23  ;;  %v7592_v34 = vpop.f32.mrf.mxu1  ;;  %403 = vst.msk [vmem:[#allocation3 + $0x190] sm:$0xff] %vm352_vm2, %v9277_v7 }
 0x266   : > { %v2933_v2 = vmul.f32 %v7548_v59, %v2897_v18  ;;  %5969 = vmatmul.msk.f32.gmra.mxu0 %vm279_vm1, %v7160_v15  ;;  %404 = vst.msk [vmem:[#allocation3 + $0x198] sm:$0xff] %vm352_vm2, %v9277_v7 }
 0x267   : > { %v2248_v9 = vpop.f32.mrf.mxu2  ;;  %405 = vst.msk [vmem:[#allocation3 + $0x1a0] sm:$0xff] %vm352_vm2, %v9277_v7 }
 0x268   : > { %v2526_v5 = vpop.f32.mrf.mxu3  ;;  %v2969_v57 = vadd.f32 %v7560_v22, %v2933_v2  ;;  %v2342_v50 = vadd.f32 %v2248_v9, %v7154_v49  ;;  %v2114_v2 = vld [vmem:[#allocation2 + $0x16f] sm:$0xff]  ;;  %406 = vst.msk [vmem:[#allocation3 + $0x1a8] sm:$0xff] %vm352_vm2, %v9277_v7 }
 0x269   : > { %v2392_v9 = vld [vmem:[#allocation2 + $0x170] sm:$0xff]  ;;  %407 = vst.msk [vmem:[#allocation3 + $0x1b0] sm:$0xff] %vm352_vm2, %v9277_v7 }
 0x26a   : > { %v3001_v26 = vmax.f32 %v2969_v57, 0.0  ;;  %v2620_v49 = vadd.f32 %v2526_v5, %v2342_v50  ;;  %408 = vst.msk [vmem:[#allocation3 + $0x1b8] sm:$0xff] %vm352_vm2, %v9277_v7 }
 0x26b   : > { %v7590_v15 = vpop.f32.mrf.mxu0  ;;  %409 = vst.msk [vmem:[#allocation3 + $0x1c0] sm:$0xff] %vm352_vm2, %v9277_v7 }
 0x26c   : > { %3034 = vst.msk [vmem:[#allocation3 + $0x28] sm:$0xff] %vm352_vm2, %v3001_v26  ;;  %5900 = vmatmul.msk.f32.gmra.mxu2 %vm279_vm1, %v2113_v39 }
 0x26d   : > { %5934 = vmatmul.msk.f32.gmra.mxu3 %vm279_vm1, %v2391_v52  ;;  %v7625_v5 = vpop.f32.mrf.mxu1  ;;  %410 = vst.msk [vmem:[#allocation3 + $0x1c8] sm:$0xff] %vm352_vm2, %v9277_v7 }
 0x26e   : > { %5970 = vmatmul.msk.f32.gmra.mxu0 %vm279_vm1, %v7174_v31  ;;  %411 = vst.msk [vmem:[#allocation3 + $0x1d0] sm:$0xff] %vm352_vm2, %v9277_v7 }
 0x26f   : > { %v2251_v18 = vpop.f32.mrf.mxu2  ;;  %412 = vst.msk [vmem:[#allocation3 + $0x1d8] sm:$0xff] %vm352_vm2, %v9277_v7 }
 0x270   : > { %v2529_v21 = vpop.f32.mrf.mxu3  ;;  %v2343_v23 = vadd.f32 %v2251_v18, %v7168_v24  ;;  %v2898_v24 = vadd.f32 %v7490_v48, %v2620_v49  ;;  %413 = vst.msk [vmem:[#allocation3 + $0x1e0] sm:$0xff] %vm352_vm2, %v9277_v7 }
 0x271   : > { %414 = vst.msk [vmem:[#allocation3 + $0x1e8] sm:$0xff] %vm352_vm2, %v9277_v7 }
 0x272   : > { %v2621_v31 = vadd.f32 %v2529_v21, %v2343_v23  ;;  %v2934_v18 = vmul.f32 %v7548_v59, %v2898_v24  ;;  %v2115_v21 = vld [vmem:[#allocation2 + $0x187] sm:$0xff]  ;;  %415 = vst.msk [vmem:[#allocation3 + $0x1f0] sm:$0xff] %vm352_vm2, %v9277_v7 }
 0x273   : > { %v3101_v57 = vld [vmem:[#allocation3 + $0x28] sm:$0xff]  ;;  %v7615_v39 = vpop.f32.mrf.mxu0  ;;  %416 = vst.msk [vmem:[#allocation3 + $0x1f8] sm:$0xff] %vm352_vm2, %v9277_v7 }
 0x274   : > { %5901 = vmatmul.msk.f32.gmra.mxu2 %vm279_vm1, %v2114_v2  ;;  %5985 = vmatmul.msk.f32.gmra.mxu1 %vm352_vm2, %v3101_v57  ;;  %v2899_v52 = vadd.f32 %v7520_v36, %v2621_v31  ;;  %v2393_v36 = vld [vmem:[#allocation2 + $0x188] sm:$0xff]  ;;  %417 = vst.msk [vmem:[#allocation3 + $0x200] sm:$0xff] %vm352_vm2, %v9277_v7  ;;  %v2970_v2 = vadd.f32 %v7560_v22, %v2934_v18 }
 0x275   : > { %5935 = vmatmul.msk.f32.gmra.mxu3 %vm279_vm1, %v2392_v9  ;;  %418 = vst.msk [vmem:[#allocation3 + $0x208] sm:$0xff] %vm352_vm2, %v9277_v7  ;;  %v7663_v24 = vpop.f32.mrf.mxu1 }
 0x276   : > { %5971 = vmatmul.msk.f32.gmra.mxu0 %vm279_vm1, %v7188_v54  ;;  %v2935_v54 = vmul.f32 %v7548_v59, %v2899_v52  ;;  %419 = vst.msk [vmem:[#allocation3 + $0x210] sm:$0xff] %vm352_vm2, %v9277_v7 }
 0x277   : > { %v2254_v26 = vpop.f32.mrf.mxu2  ;;  %420 = vst.msk [vmem:[#allocation3 + $0x218] sm:$0xff] %vm352_vm2, %v9277_v7 }
 0x278   : > { %v2532_v50 = vpop.f32.mrf.mxu3  ;;  %v2344_v48 = vadd.f32 %v2254_v26, %v7182_v41  ;;  %v2971_v9 = vadd.f32 %v7560_v22, %v2935_v54  ;;  %421 = vst.msk [vmem:[#allocation3 + $0x220] sm:$0xff] %vm352_vm2, %v9277_v7 }
 0x279   : > { %422 = vst.msk [vmem:[#allocation3 + $0x228] sm:$0xff] %vm352_vm2, %v9277_v7 }
 0x27a   : > { %v2622_v23 = vadd.f32 %v2532_v50, %v2344_v48  ;;  %v3002_v50 = vmax.f32 %v2970_v2, 0.0  ;;  %v2116_v48 = vld [vmem:[#allocation2 + $0x18f] sm:$0xff]  ;;  %v3003_v18 = vmax.f32 %v2971_v9, 0.0  ;;  %423 = vst.msk [vmem:[#allocation3 + $0x230] sm:$0xff] %vm352_vm2, %v9277_v7 }
 0x27b   : > { %v7645_v49 = vpop.f32.mrf.mxu0  ;;  %424 = vst.msk [vmem:[#allocation3 + $0x238] sm:$0xff] %vm352_vm2, %v9277_v7 }
 0x27c   : > { %v2900_v41 = vadd.f32 %v7554_v14, %v2622_v23  ;;  %5902 = vmatmul.msk.f32.gmra.mxu2 %vm279_vm1, %v2115_v21  ;;  %v2674_v23 = vld [vmem:[#allocation2 + $0x1b1] sm:$0xff]  ;;  %3035 = vst.msk [vmem:[#allocation3 + $0x30] sm:$0xff] %vm352_vm2, %v3002_v50 }
 0x27d   : > { %5936 = vmatmul.msk.f32.gmra.mxu3 %vm279_vm1, %v2393_v36  ;;  %3036 = vst.msk [vmem:[#allocation3 + $0x48] sm:$0xff] %vm352_vm2, %v3003_v18 }
 0x27e   : > { %v2936_v31 = vmul.f32 %v7548_v59, %v2900_v41  ;;  %5972 = vmatmul.msk.f32.gmra.mxu0 %vm279_vm1, %v7202_v55  ;;  %v2394_v55 = vld [vmem:[#allocation2 + $0x190] sm:$0xff] }
 0x27f   : > { %v2257_v14 = vpop.f32.mrf.mxu2 }
 0x280   : > { %v2535_v57 = vpop.f32.mrf.mxu3  ;;  %v2972_v52 = vadd.f32 %v7560_v22, %v2936_v31  ;;  %v2345_v26 = vadd.f32 %v2257_v14, %v7196_v8  ;;  %v2117_v31 = vld [vmem:[#allocation2 + $0x1a7] sm:$0xff] }
 0x281   : > { %v2395_v14 = vld [vmem:[#allocation2 + $0x1a8] sm:$0xff] }
 0x282   : > { %v2623_v21 = vadd.f32 %v2535_v57, %v2345_v26  ;;  %v3004_v36 = vmax.f32 %v2972_v52, 0.0  ;;  %v7687_v57 = vpop.f32.mrf.mxu1 }
 0x283   : > { %v2822_v54 = vpop.f32.mrf.mxu0 }
 0x284   : > { %v2901_v8 = vadd.f32 %v7590_v15, %v2623_v21  ;;  %5903 = vmatmul.msk.f32.gmra.mxu2 %vm279_vm1, %v2116_v48  ;;  %3037 = vst.msk [vmem:[#allocation3 + $0x50] sm:$0xff] %vm352_vm2, %v3004_v36  ;;  %v2675_v48 = vld [vmem:[#allocation2 + $0x1c9] sm:$0xff] }
 0x285   : > { %5937 = vmatmul.msk.f32.gmra.mxu3 %vm279_vm1, %v2394_v55  ;;  %v3102_v55 = vld [vmem:[#allocation3 + $0x30] sm:$0xff] }
 0x286   : > { %v2937_v41 = vmul.f32 %v7548_v59, %v2901_v8  ;;  %5973 = vmatmul.msk.f32.gmra.mxu0 %vm279_vm1, %v2674_v23  ;;  %5986 = vmatmul.msk.f32.gmra.mxu1 %vm352_vm2, %v3102_v55 }
 0x287   : > { %v2260_v2 = vpop.f32.mrf.mxu2 }
 0x288   : > { %v2538_v9 = vpop.f32.mrf.mxu3  ;;  %v2973_v7 = vadd.f32 %v7560_v22, %v2937_v41  ;;  %v2346_v15 = vadd.f32 %v2260_v2, %v7210_v29  ;;  %v2118_v41 = vld [vmem:[#allocation2 + $0x1af] sm:$0xff] }
 0x289   : > { %v2396_v2 = vld [vmem:[#allocation2 + $0x1b0] sm:$0xff] }
 0x28a   : > { %v3005_v52 = vmax.f32 %v2973_v7, 0.0  ;;  %v2624_v26 = vadd.f32 %v2538_v9, %v2346_v15  ;;  %v3103_v9 = vld [vmem:[#allocation3 + $0x48] sm:$0xff] }
 0x28b   : > { %v2825_v50 = vpop.f32.mrf.mxu0 }
 0x28c   : > { %3038 = vst.msk [vmem:[#allocation3 + $0x68] sm:$0xff] %vm352_vm2, %v3005_v52  ;;  %v2902_v18 = vadd.f32 %v7615_v39, %v2624_v26  ;;  %5904 = vmatmul.msk.f32.gmra.mxu2 %vm279_vm1, %v2117_v31  ;;  %v2676_v31 = vld [vmem:[#allocation2 + $0x1d1] sm:$0xff] }
 0x28d   : > { %5938 = vmatmul.msk.f32.gmra.mxu3 %vm279_vm1, %v2395_v14  ;;  %v7698_v14 = vpop.f32.mrf.mxu1 }
 0x28e   : > { %v2938_v29 = vmul.f32 %v7548_v59, %v2902_v18  ;;  %5974 = vmatmul.msk.f32.gmra.mxu0 %vm279_vm1, %v2675_v48  ;;  %5987 = vmatmul.msk.f32.gmra.mxu1 %vm352_vm2, %v3103_v9 }
 0x28f   : > { %v2263_v21 = vpop.f32.mrf.mxu2 }
 0x290   : > { %v2541_v36 = vpop.f32.mrf.mxu3  ;;  %v2974_v23 = vadd.f32 %v7560_v22, %v2938_v29  ;;  %v2347_v8 = vadd.f32 %v2263_v21, %v7222_v28  ;;  %v2119_v29 = vld [vmem:[#allocation2 + $0x1c7] sm:$0xff] }
 0x291   : > { %v2397_v21 = vld [vmem:[#allocation2 + $0x1c8] sm:$0xff] }
 0x292   : > { %v3006_v39 = vmax.f32 %v2974_v23, 0.0  ;;  %v2625_v7 = vadd.f32 %v2541_v36, %v2347_v8  ;;  %v3104_v36 = vld [vmem:[#allocation3 + $0x50] sm:$0xff] }
 0x293   : > { %v2828_v15 = vpop.f32.mrf.mxu0 }
 0x294   : > { %3039 = vst.msk [vmem:[#allocation3 + $0x70] sm:$0xff] %vm352_vm2, %v3006_v39  ;;  %v2903_v52 = vadd.f32 %v7645_v49, %v2625_v7  ;;  %5905 = vmatmul.msk.f32.gmra.mxu2 %vm279_vm1, %v2118_v41  ;;  %v2677_v41 = vld [vmem:[#allocation2 + $0x1e9] sm:$0xff] }
 0x295   : > { %5939 = vmatmul.msk.f32.gmra.mxu3 %vm279_vm1, %v2396_v2  ;;  %v7717_v9 = vpop.f32.mrf.mxu1 }
 0x296   : > { %v2939_v28 = vmul.f32 %v7548_v59, %v2903_v52  ;;  %5975 = vmatmul.msk.f32.gmra.mxu0 %vm279_vm1, %v2676_v31  ;;  %5988 = vmatmul.msk.f32.gmra.mxu1 %vm352_vm2, %v3104_v36 }
 0x297   : > { %v2266_v26 = vpop.f32.mrf.mxu2 }
 0x298   : > { %v2544_v48 = vpop.f32.mrf.mxu3  ;;  %v2975_v55 = vadd.f32 %v7560_v22, %v2939_v28  ;;  %v2348_v18 = vadd.f32 %v2266_v26, %v7234_v56  ;;  %v2070_v56 = vadd.f32 %v7340_v3, %v7244_v42  ;;  %v2120_v28 = vld [vmem:[#allocation2 + $0x1cf] sm:$0xff]  ;;  %v2071_v3 = vadd.f32 %v7351_v13, %v7257_v40 }
 0x299   : > { %v2398_v26 = vld [vmem:[#allocation2 + $0x1d0] sm:$0xff]  ;;  %v2072_v13 = vadd.f32 %v7361_v63, %v7267_v25  ;;  %v2073_v63 = vadd.f32 %v7370_v62, %v7277_v1  ;;  %v2074_v62 = vadd.f32 %v7383_v46, %v7286_v32  ;;  %v2075_v32 = vadd.f32 %v7394_v10, %v7294_v60  ;;  %v7783_v10 = vld [vmem:[#allocation3 + $0x27] sm:$0xff] }
 0x29a   : > { %v3007_v49 = vmax.f32 %v2975_v55, 0.0  ;;  %v2626_v23 = vadd.f32 %v2544_v48, %v2348_v18  ;;  %v3105_v48 = vld [vmem:[#allocation3 + $0x68] sm:$0xff] }
 0x29b   : > { %v7709_v8 = vpop.f32.mrf.mxu0 }
 0x29c   : > { %3040 = vst.msk [vmem:[#allocation3 + $0x88] sm:$0xff] %vm352_vm2, %v3007_v49  ;;  %v2904_v2 = vadd.f32 %v2822_v54, %v2626_v23  ;;  %5906 = vmatmul.msk.f32.gmra.mxu2 %vm279_vm1, %v2119_v29 }
 0x29d   : > { %5940 = vmatmul.msk.f32.gmra.mxu3 %vm279_vm1, %v2397_v21  ;;  %v2678_v21 = vld [vmem:[#allocation2 + $0x1f1] sm:$0xff] }
 0x29e   : > { %v2940_v39 = vmul.f32 %v7548_v59, %v2904_v2  ;;  %5976 = vmatmul.msk.f32.gmra.mxu0 %vm279_vm1, %v2677_v41  ;;  %5989 = vmatmul.msk.f32.gmra.mxu1 %vm352_vm2, %v3105_v48  ;;  %v7732_v41 = vpop.f32.mrf.mxu1 }
 0x29f   : > { %v2269_v7 = vpop.f32.mrf.mxu2 }
 0x2a0   : > { %v2547_v31 = vpop.f32.mrf.mxu3  ;;  %v2976_v52 = vadd.f32 %v7560_v22, %v2940_v39  ;;  %v2349_v54 = vadd.f32 %v2269_v7, %v2070_v56  ;;  %v2121_v56 = vld [vmem:[#allocation2 + $0x1e7] sm:$0xff]  ;;  %v3106_v7 = vld [vmem:[#allocation3 + $0x70] sm:$0xff] }
 0x2a1   : > { %v2399_v39 = vld [vmem:[#allocation2 + $0x1e8] sm:$0xff] }
 0x2a2   : > { %v3008_v55 = vmax.f32 %v2976_v52, 0.0  ;;  %v2627_v18 = vadd.f32 %v2547_v31, %v2349_v54 }
 0x2a3   : > { %v7722_v29 = vpop.f32.mrf.mxu0 }
 0x2a4   : > { %3041 = vst.msk [vmem:[#allocation3 + $0x90] sm:$0xff] %vm352_vm2, %v3008_v55  ;;  %v2905_v42 = vadd.f32 %v2825_v50, %v2627_v18  ;;  %5907 = vmatmul.msk.f32.gmra.mxu2 %vm279_vm1, %v2120_v28  ;;  %v2679_v28 = vld [vmem:[#allocation2 + $0x209] sm:$0xff] }
 0x2a5   : > { %5941 = vmatmul.msk.f32.gmra.mxu3 %vm279_vm1, %v2398_v26 }
 0x2a6   : > { %v2941_v36 = vmul.f32 %v7548_v59, %v2905_v42  ;;  %5977 = vmatmul.msk.f32.gmra.mxu0 %vm279_vm1, %v2678_v21  ;;  %5990 = vmatmul.msk.f32.gmra.mxu1 %vm352_vm2, %v3106_v7  ;;  %v2122_v42 = vld [vmem:[#allocation2 + $0x1ef] sm:$0xff] }
 0x2a7   : > { %v2272_v49 = vpop.f32.mrf.mxu2 }
 0x2a8   : > { %v2550_v23 = vpop.f32.mrf.mxu3  ;;  %v2977_v2 = vadd.f32 %v7560_v22, %v2941_v36  ;;  %v2350_v50 = vadd.f32 %v2272_v49, %v2071_v3  ;;  %v7744_v3 = vpop.f32.mrf.mxu1  ;;  %v3107_v36 = vld [vmem:[#allocation3 + $0x88] sm:$0xff] }
 0x2aa   : > { %v3009_v31 = vmax.f32 %v2977_v2, 0.0  ;;  %v2628_v52 = vadd.f32 %v2550_v23, %v2350_v50  ;;  %v2680_v50 = vld [vmem:[#allocation2 + $0x211] sm:$0xff] }
 0x2ab   : > { %v2837_v54 = vpop.f32.mrf.mxu0 }
 0x2ac   : > { %3042 = vst.msk [vmem:[#allocation3 + $0xa8] sm:$0xff] %vm352_vm2, %v3009_v31  ;;  %v2906_v40 = vadd.f32 %v2828_v15, %v2628_v52  ;;  %5908 = vmatmul.msk.f32.gmra.mxu2 %vm279_vm1, %v2121_v56  ;;  %v2400_v15 = vld [vmem:[#allocation2 + $0x1f0] sm:$0xff] }
 0x2ad   : > { %5942 = vmatmul.msk.f32.gmra.mxu3 %vm279_vm1, %v2399_v39 }
 0x2ae   : > { %v2942_v26 = vmul.f32 %v7548_v59, %v2906_v40  ;;  %5978 = vmatmul.msk.f32.gmra.mxu0 %vm279_vm1, %v2679_v28  ;;  %5991 = vmatmul.msk.f32.gmra.mxu1 %vm352_vm2, %v3107_v36  ;;  %v2123_v28 = vld [vmem:[#allocation2 + $0x207] sm:$0xff]  ;;  %v3108_v40 = vld [vmem:[#allocation3 + $0x90] sm:$0xff] }
 0x2af   : > { %v2275_v48 = vpop.f32.mrf.mxu2 }
 0x2b0   : > { %v2553_v55 = vpop.f32.mrf.mxu3  ;;  %v2978_v18 = vadd.f32 %v7560_v22, %v2942_v26  ;;  %v2351_v21 = vadd.f32 %v2275_v48, %v2072_v13 }
 0x2b2   : > { %v3010_v49 = vmax.f32 %v2978_v18, 0.0  ;;  %v2629_v23 = vadd.f32 %v2553_v55, %v2351_v21  ;;  %v2681_v55 = vld [vmem:[#allocation2 + $0x229] sm:$0xff]  ;;  %v7756_v18 = vpop.f32.mrf.mxu1 }
 0x2b3   : > { %v2840_v2 = vpop.f32.mrf.mxu0 }
 0x2b4   : > { %3043 = vst.msk [vmem:[#allocation3 + $0xb0] sm:$0xff] %vm352_vm2, %v3010_v49  ;;  %v2907_v25 = vadd.f32 %v7709_v8, %v2629_v23  ;;  %5909 = vmatmul.msk.f32.gmra.mxu2 %vm279_vm1, %v2122_v42  ;;  %v2401_v8 = vld [vmem:[#allocation2 + $0x208] sm:$0xff] }
 0x2b5   : > { %5943 = vmatmul.msk.f32.gmra.mxu3 %vm279_vm1, %v2400_v15  ;;  %v2124_v23 = vld [vmem:[#allocation2 + $0x20f] sm:$0xff] }
 0x2b6   : > { %v2943_v56 = vmul.f32 %v7548_v59, %v2907_v25  ;;  %5979 = vmatmul.msk.f32.gmra.mxu0 %vm279_vm1, %v2680_v50  ;;  %5992 = vmatmul.msk.f32.gmra.mxu1 %vm352_vm2, %v3108_v40  ;;  %v3109_v50 = vld [vmem:[#allocation3 + $0xa8] sm:$0xff] }
 0x2b7   : > { %v2278_v39 = vpop.f32.mrf.mxu2  ;;  %v2125_v40 = vld [vmem:[#allocation2 + $0x227] sm:$0xff] }
 0x2b8   : > { %v2556_v7 = vpop.f32.mrf.mxu3  ;;  %v2979_v31 = vadd.f32 %v7560_v22, %v2943_v56  ;;  %v2352_v52 = vadd.f32 %v2278_v39, %v2073_v63  ;;  %v2682_v39 = vld [vmem:[#allocation2 + $0x231] sm:$0xff] }
 0x2ba   : > { %v3011_v13 = vmax.f32 %v2979_v31, 0.0  ;;  %v2630_v26 = vadd.f32 %v2556_v7, %v2352_v52  ;;  %v7774_v46 = vpop.f32.mrf.mxu1 }
 0x2bb   : > { %v2843_v48 = vpop.f32.mrf.mxu0 }
 0x2bc   : > { %3044 = vst.msk [vmem:[#allocation3 + $0xc8] sm:$0xff] %vm352_vm2, %v3011_v13  ;;  %v2908_v1 = vadd.f32 %v7722_v29, %v2630_v26  ;;  %5910 = vmatmul.msk.f32.gmra.mxu2 %vm279_vm1, %v2123_v28  ;;  %v2402_v29 = vld [vmem:[#allocation2 + $0x210] sm:$0xff]  ;;  %v2403_v13 = vld [vmem:[#allocation2 + $0x228] sm:$0xff] }
 0x2bd   : > { %5944 = vmatmul.msk.f32.gmra.mxu3 %vm279_vm1, %v2401_v8  ;;  %v3110_v26 = vld [vmem:[#allocation3 + $0xb0] sm:$0xff] }
 0x2be   : > { %v2944_v21 = vmul.f32 %v7548_v59, %v2908_v1  ;;  %5980 = vmatmul.msk.f32.gmra.mxu0 %vm279_vm1, %v2681_v55  ;;  %5993 = vmatmul.msk.f32.gmra.mxu1 %vm352_vm2, %v3109_v50  ;;  %v2404_v50 = vld [vmem:[#allocation2 + $0x230] sm:$0xff] }
 0x2bf   : > { %v2281_v42 = vpop.f32.mrf.mxu2 }
 0x2c0   : > { %v2559_v15 = vpop.f32.mrf.mxu3  ;;  %v2980_v36 = vadd.f32 %v7560_v22, %v2944_v21  ;;  %v2353_v49 = vadd.f32 %v2281_v42, %v2074_v62  ;;  %v2076_v21 = vadd.f32 %v7404_v19, %v7302_v16  ;;  %v7797_v19 = vld [vmem:[#allocation3 + $0x2f] sm:$0xff] }
 0x2c2   : > { %v3012_v25 = vmax.f32 %v2980_v36, 0.0  ;;  %v2631_v63 = vadd.f32 %v2559_v15, %v2353_v49  ;;  %v7790_v49 = vpop.f32.mrf.mxu1 }
 0x2c3   : > { %v2846_v56 = vpop.f32.mrf.mxu0 }
 0x2c4   : > { %3045 = vst.msk [vmem:[#allocation3 + $0xd0] sm:$0xff] %vm352_vm2, %v3012_v25  ;;  %v2909_v7 = vadd.f32 %v2837_v54, %v2631_v63  ;;  %5911 = vmatmul.msk.f32.gmra.mxu2 %vm279_vm1, %v2124_v23  ;;  %v3111_v25 = vld [vmem:[#allocation3 + $0xc8] sm:$0xff] }
 0x2c5   : > { %5945 = vmatmul.msk.f32.gmra.mxu3 %vm279_vm1, %v2402_v29  ;;  %v2126_v29 = vld [vmem:[#allocation2 + $0x22f] sm:$0xff] }
 0x2c6   : > { %v2945_v31 = vmul.f32 %v7548_v59, %v2909_v7  ;;  %5981 = vmatmul.msk.f32.gmra.mxu0 %vm279_vm1, %v2682_v39  ;;  %5994 = vmatmul.msk.f32.gmra.mxu1 %vm352_vm2, %v3110_v26 }
 0x2c7   : > { %v2284_v52 = vpop.f32.mrf.mxu2 }
 0x2c8   : > { %v2562_v28 = vpop.f32.mrf.mxu3  ;;  %v2981_v8 = vadd.f32 %v7560_v22, %v2945_v31  ;;  %v2354_v54 = vadd.f32 %v2284_v52, %v2075_v32  ;;  %v2077_v32 = vadd.f32 %v7439_v37, %v7310_v11  ;;  %v7811_v37 = vld [vmem:[#allocation3 + $0x47] sm:$0xff] }
 0x2ca   : > { %v3013_v55 = vmax.f32 %v2981_v8, 0.0  ;;  %v2632_v1 = vadd.f32 %v2562_v28, %v2354_v54  ;;  %v3066_v54 = vld [vmem:[#allocation3 + $0x7] sm:$0xff] }
 0x2cb   : > { %v2849_v62 = vpop.f32.mrf.mxu0  ;;  %v3112_v26 = vld [vmem:[#allocation3 + $0xd0] sm:$0xff] }
 0x2cc   : > { %3046 = vst.msk [vmem:[#allocation3 + $0xe8] sm:$0xff] %vm352_vm2, %v3013_v55  ;;  %v2910_v60 = vadd.f32 %v2840_v2, %v2632_v1  ;;  %5912 = vmatmul.msk.f32.gmra.mxu2 %vm279_vm1, %v2125_v40  ;;  %v3551_v40 = vld [vmem:[#allocation3 + $0x9] sm:$0xff] }
 0x2cd   : > { %5946 = vmatmul.msk.f32.gmra.mxu3 %vm279_vm1, %v2403_v13  ;;  %v7805_v13 = vpop.f32.mrf.mxu1 }
 0x2ce   : > { %v2946_v42 = vmul.f32 %v7548_v59, %v2910_v60  ;;  %6081 = vmatmul.msk.f32.vlgmr.msrb.gmra.mxu0 %vm352_vm2, %v7783_v10  ;;  %5995 = vmatmul.msk.f32.gmra.mxu1 %vm352_vm2, %v3111_v25 }
 0x2cf   : > { %v2287_v15 = vpop.f32.mrf.mxu2 }
 0x2d0   : > { %v2565_v36 = vpop.f32.mrf.mxu3  ;;  %v2982_v2 = vadd.f32 %v7560_v22, %v2946_v42  ;;  %v2355_v23 = vadd.f32 %v2287_v15, %v2076_v21  ;;  %v2078_v21 = vadd.f32 %v7475_v58, %v7317_v51  ;;  %v7825_v58 = vld [vmem:[#allocation3 + $0x4f] sm:$0xff] }
 0x2d2   : > { %v3014_v63 = vmax.f32 %v2982_v2, 0.0  ;;  %v2633_v39 = vadd.f32 %v2565_v36, %v2355_v23  ;;  %v3067_v23 = vld [vmem:[#allocation3 + $0xf] sm:$0xff] }
 0x2d3   : > { %v2852_v7 = vpop.f32.mrf.mxu0 }
 0x2d4   : > { %3047 = vst.msk [vmem:[#allocation3 + $0xf0] sm:$0xff] %vm352_vm2, %v3014_v63  ;;  %v2911_v16 = vadd.f32 %v2843_v48, %v2633_v39  ;;  %5913 = vmatmul.msk.f32.gmra.mxu2 %vm279_vm1, %v2126_v29  ;;  %v3552_v29 = vld [vmem:[#allocation3 + $0x11] sm:$0xff] }
 0x2d5   : > { %5947 = vmatmul.msk.f32.gmra.mxu3 %vm279_vm1, %v2404_v50  ;;  %v3113_v50 = vld [vmem:[#allocation3 + $0xe8] sm:$0xff] }
 0x2d6   : > { %v2947_v31 = vmul.f32 %v7548_v59, %v2911_v16  ;;  %6082 = vmatmul.msk.f32.gmra.mxu0 %vm352_vm2, %v7797_v19  ;;  %5996 = vmatmul.msk.f32.gmra.mxu1 %vm352_vm2, %v3112_v26  ;;  %v7819_v16 = vpop.f32.mrf.mxu1  ;;  %v7835_v26 = vld [vmem:[#allocation3 + $0x29] sm:$0xff] }
 0x2d7   : > { %v2290_v52 = vpop.f32.mrf.mxu2 }
 0x2d8   : > { %v2568_v28 = vpop.f32.mrf.mxu3  ;;  %v2983_v48 = vadd.f32 %v7560_v22, %v2947_v31  ;;  %v2356_v8 = vadd.f32 %v2290_v52, %v2077_v32  ;;  %v2079_v32 = vadd.f32 %v7509_v45, %v7324_v44 }
 0x2da   : > { %v3015_v55 = vmax.f32 %v2983_v48, 0.0  ;;  %v2634_v1 = vadd.f32 %v2568_v28, %v2356_v8 }
 0x2db   : > { %v2855_v60 = vpop.f32.mrf.mxu0  ;;  %v7833_v8 = vld [vmem:[#allocation3 + $0xf0] sm:$0xff] }
 0x2dc   : > { %3048 = vst.msk [vmem:[#allocation3 + $0x108] sm:$0xff] %vm352_vm2, %v3015_v55  ;;  %v2912_v11 = vadd.f32 %v2846_v56, %v2634_v1  ;;  %6015 = vmatmul.msk.f32.vlgmr.msrb.gmra.mxu2 %vm352_vm2, %v3066_v54  ;;  %v7846_v1 = vld [vmem:[#allocation3 + $0x67] sm:$0xff] }
 0x2dd   : > { %6048 = vmatmul.msk.f32.vlgmr.msrb.gmra.mxu3 %vm352_vm2, %v3551_v40 }
 0x2de   : > { %v2948_v42 = vmul.f32 %v7548_v59, %v2912_v11  ;;  %6083 = vmatmul.msk.f32.gmra.mxu0 %vm352_vm2, %v7811_v37  ;;  %5997 = vmatmul.msk.f32.gmra.mxu1 %vm352_vm2, %v3113_v50  ;;  %v7838_v44 = vpop.f32.mrf.mxu1  ;;  %v2080_v11 = vadd.f32 %v7543_v47, %v7331_v30  ;;  %v7865_v47 = vld [vmem:[#allocation3 + $0x6f] sm:$0xff]  ;;  %v2081_v50 = vadd.f32 %v7592_v34, %v7338_v35  ;;  %v7886_v34 = vld [vmem:[#allocation3 + $0x87] sm:$0xff] }
 0x2df   : > { %v2293_v15 = vpop.f32.mrf.mxu2 }
 0x2e0   : > { %v2571_v36 = vpop.f32.mrf.mxu3  ;;  %v2984_v56 = vadd.f32 %v7560_v22, %v2948_v42  ;;  %v2357_v2 = vadd.f32 %v2293_v15, %v2078_v21 }
 0x2e2   : > { %v3016_v25 = vmax.f32 %v2984_v56, 0.0  ;;  %v2635_v63 = vadd.f32 %v2571_v36, %v2357_v2 }
 0x2e3   : > { %v2858_v39 = vpop.f32.mrf.mxu0  ;;  %v7854_v36 = vld [vmem:[#allocation3 + $0x108] sm:$0xff] }
 0x2e4   : > { %3049 = vst.msk [vmem:[#allocation3 + $0x110] sm:$0xff] %vm352_vm2, %v3016_v25  ;;  %v2913_v51 = vadd.f32 %v2849_v62, %v2635_v63  ;;  %6016 = vmatmul.msk.f32.gmra.mxu2 %vm352_vm2, %v3067_v23  ;;  %v7856_v23 = vld [vmem:[#allocation3 + $0x31] sm:$0xff] }
 0x2e5   : > { %6049 = vmatmul.msk.f32.gmra.mxu3 %vm352_vm2, %v3552_v29 }
 0x2e6   : > { %v2949_v31 = vmul.f32 %v7548_v59, %v2913_v51  ;;  %6084 = vmatmul.msk.f32.gmra.mxu0 %vm352_vm2, %v7825_v58  ;;  %5998 = vmatmul.msk.f32.gmra.mxu1 %vm352_vm2, %v7833_v8  ;;  %v7869_v25 = vpop.f32.mrf.mxu1 }
 0x2e7   : > { %v2296_v52 = vpop.f32.mrf.mxu2 }
 0x2e8   : > { %v2574_v28 = vpop.f32.mrf.mxu3  ;;  %v2985_v62 = vadd.f32 %v7560_v22, %v2949_v31  ;;  %v2358_v48 = vadd.f32 %v2296_v52, %v2079_v32 }
 0x2ea   : > { %v3017_v54 = vmax.f32 %v2985_v62, 0.0  ;;  %v2636_v40 = vadd.f32 %v2574_v28, %v2358_v48  ;;  %v7877_v62 = vld [vmem:[#allocation3 + $0x49] sm:$0xff] }
 0x2eb   : > { %v2861_v55 = vpop.f32.mrf.mxu0  ;;  %v7875_v31 = vld [vmem:[#allocation3 + $0x110] sm:$0xff] }
 0x2ec   : > { %3050 = vst.msk [vmem:[#allocation3 + $0x128] sm:$0xff] %vm352_vm2, %v3017_v54  ;;  %v2914_v45 = vadd.f32 %v2852_v7, %v2636_v40  ;;  %6017 = vmatmul.msk.f32.gmra.mxu2 %vm352_vm2, %v7783_v10  ;;  %v2082_v54 = vadd.f32 %v7625_v5, %v7347_v53  ;;  %v7907_v5 = vld [vmem:[#allocation3 + $0x8f] sm:$0xff] }
 0x2ed   : > { %6050 = vmatmul.msk.f32.gmra.mxu3 %vm352_vm2, %v7835_v26 }
 0x2ee   : > { %v2950_v21 = vmul.f32 %v7548_v59, %v2914_v45  ;;  %6085 = vmatmul.msk.f32.gmra.mxu0 %vm352_vm2, %v7846_v1  ;;  %5999 = vmatmul.msk.f32.gmra.mxu1 %vm352_vm2, %v7854_v36 }
 0x2ef   : > { %v2299_v7 = vpop.f32.mrf.mxu2 }
 0x2f0   : > { %v2577_v42 = vpop.f32.mrf.mxu3  ;;  %v2986_v10 = vadd.f32 %v7560_v22, %v2950_v21  ;;  %v2359_v15 = vadd.f32 %v2299_v7, %v2080_v11 }
 0x2f1   : > { %v7893_v11 = vpop.f32.mrf.mxu1 }
 0x2f2   : > { %v3018_v56 = vmax.f32 %v2986_v10, 0.0  ;;  %v2637_v2 = vadd.f32 %v2577_v42, %v2359_v15  ;;  %v7898_v15 = vld [vmem:[#allocation3 + $0x51] sm:$0xff] }
 0x2f3   : > { %v2864_v29 = vpop.f32.mrf.mxu0  ;;  %v7896_v7 = vld [vmem:[#allocation3 + $0x128] sm:$0xff] }
 0x2f4   : > { %3051 = vst.msk [vmem:[#allocation3 + $0x130] sm:$0xff] %vm352_vm2, %v3018_v56  ;;  %v2915_v30 = vadd.f32 %v2855_v60, %v2637_v2  ;;  %6018 = vmatmul.msk.f32.gmra.mxu2 %vm352_vm2, %v7797_v19  ;;  %v2083_v2 = vadd.f32 %v7663_v24, %v7356_v43  ;;  %v7928_v24 = vld [vmem:[#allocation3 + $0xa7] sm:$0xff] }
 0x2f5   : > { %6051 = vmatmul.msk.f32.gmra.mxu3 %vm352_vm2, %v7856_v23 }
 0x2f6   : > { %v2951_v63 = vmul.f32 %v7548_v59, %v2915_v30  ;;  %6086 = vmatmul.msk.f32.gmra.mxu0 %vm352_vm2, %v7865_v47  ;;  %6000 = vmatmul.msk.f32.gmra.mxu1 %vm352_vm2, %v7875_v31 }
 0x2f7   : > { %v2302_v60 = vpop.f32.mrf.mxu2 }
 0x2f8   : > { %v2580_v19 = vpop.f32.mrf.mxu3  ;;  %v2987_v51 = vadd.f32 %v7560_v22, %v2951_v63  ;;  %v2360_v32 = vadd.f32 %v2302_v60, %v2081_v50 }
 0x2fa   : > { %v3019_v52 = vmax.f32 %v2987_v51, 0.0  ;;  %v2638_v28 = vadd.f32 %v2580_v19, %v2360_v32 }
 0x2fb   : > { %v2867_v48 = vpop.f32.mrf.mxu0  ;;  %v7917_v19 = vld [vmem:[#allocation3 + $0x130] sm:$0xff] }
 0x2fc   : > { %3052 = vst.msk [vmem:[#allocation3 + $0x148] sm:$0xff] %vm352_vm2, %v3019_v52  ;;  %v2916_v35 = vadd.f32 %v2858_v39, %v2638_v28  ;;  %6019 = vmatmul.msk.f32.gmra.mxu2 %vm352_vm2, %v7811_v37  ;;  %v7919_v52 = vld [vmem:[#allocation3 + $0x69] sm:$0xff] }
 0x2fd   : > { %6052 = vmatmul.msk.f32.gmra.mxu3 %vm352_vm2, %v7877_v62 }
 0x2fe   : > { %v2952_v40 = vmul.f32 %v7548_v59, %v2916_v35  ;;  %6087 = vmatmul.msk.f32.gmra.mxu0 %vm352_vm2, %v7886_v34  ;;  %6001 = vmatmul.msk.f32.gmra.mxu1 %vm352_vm2, %v7896_v7  ;;  %v2084_v35 = vadd.f32 %v7687_v57, %v7365_v4  ;;  %v7949_v57 = vld [vmem:[#allocation3 + $0xaf] sm:$0xff] }
 0x2ff   : > { %v2305_v39 = vpop.f32.mrf.mxu2 }
 0x300   : > { %v2583_v45 = vpop.f32.mrf.mxu3  ;;  %v2988_v37 = vadd.f32 %v7560_v22, %v2952_v40  ;;  %v2361_v21 = vadd.f32 %v2305_v39, %v2082_v54 }
 0x302   : > { %v3020_v42 = vmax.f32 %v2988_v37, 0.0  ;;  %v2639_v10 = vadd.f32 %v2583_v45, %v2361_v21 }
 0x303   : > { %v2870_v56 = vpop.f32.mrf.mxu0  ;;  %v7915_v60 = vpop.f32.mrf.mxu1  ;;  %v7938_v37 = vld [vmem:[#allocation3 + $0x148] sm:$0xff] }
 0x304   : > { %3053 = vst.msk [vmem:[#allocation3 + $0x150] sm:$0xff] %vm352_vm2, %v3020_v42  ;;  %v2917_v53 = vadd.f32 %v2861_v55, %v2639_v10  ;;  %6020 = vmatmul.msk.f32.gmra.mxu2 %vm352_vm2, %v7825_v58  ;;  %v7940_v10 = vld [vmem:[#allocation3 + $0x71] sm:$0xff] }
 0x305   : > { %6053 = vmatmul.msk.f32.gmra.mxu3 %vm352_vm2, %v7898_v15 }
 0x306   : > { %v2953_v30 = vmul.f32 %v7548_v59, %v2917_v53  ;;  %6088 = vmatmul.msk.f32.gmra.mxu0 %vm352_vm2, %v7907_v5  ;;  %6002 = vmatmul.msk.f32.gmra.mxu1 %vm352_vm2, %v7917_v19 }
 0x307   : > { %v2308_v55 = vpop.f32.mrf.mxu2 }
 0x308   : > { %v2586_v50 = vpop.f32.mrf.mxu3  ;;  %v2989_v58 = vadd.f32 %v7560_v22, %v2953_v30  ;;  %v2362_v63 = vadd.f32 %v2308_v55, %v2083_v2  ;;  %v2085_v2 = vadd.f32 %v7698_v14, %v7374_v38  ;;  %v7970_v14 = vld [vmem:[#allocation3 + $0xc7] sm:$0xff] }
 0x30a   : > { %v3021_v51 = vmax.f32 %v2989_v58, 0.0  ;;  %v2640_v32 = vadd.f32 %v2586_v50, %v2362_v63 }
 0x30b   : > { %v2873_v28 = vpop.f32.mrf.mxu0  ;;  %v7936_v45 = vpop.f32.mrf.mxu1 }
 0x30c   : > { %3054 = vst.msk [vmem:[#allocation3 + $0x168] sm:$0xff] %vm352_vm2, %v3021_v51  ;;  %v2918_v43 = vadd.f32 %v2864_v29, %v2640_v32  ;;  %6021 = vmatmul.msk.f32.gmra.mxu2 %vm352_vm2, %v7846_v1  ;;  %v7959_v51 = vld [vmem:[#allocation3 + $0x150] sm:$0xff] }
 0x30d   : > { %6054 = vmatmul.msk.f32.gmra.mxu3 %vm352_vm2, %v7919_v52 }
 0x30e   : > { %v2954_v54 = vmul.f32 %v7548_v59, %v2918_v43  ;;  %6089 = vmatmul.msk.f32.gmra.mxu0 %vm352_vm2, %v7928_v24  ;;  %6003 = vmatmul.msk.f32.gmra.mxu1 %vm352_vm2, %v7938_v37 }
 0x30f   : > { %v2311_v29 = vpop.f32.mrf.mxu2 }
 0x310   : > { %v2589_v40 = vpop.f32.mrf.mxu3  ;;  %v2990_v1 = vadd.f32 %v7560_v22, %v2954_v54  ;;  %v2363_v39 = vadd.f32 %v2311_v29, %v2084_v35  ;;  %v7961_v35 = vld [vmem:[#allocation3 + $0x89] sm:$0xff]  ;;  %v2086_v29 = vadd.f32 %v7717_v9, %v7381_v61 }
 0x311   : > { %v7991_v9 = vld [vmem:[#allocation3 + $0xcf] sm:$0xff] }
 0x312   : > { %v3022_v21 = vmax.f32 %v2990_v1, 0.0  ;;  %v2641_v42 = vadd.f32 %v2589_v40, %v2363_v39 }
 0x313   : > { %v2876_v53 = vpop.f32.mrf.mxu0  ;;  %v7957_v63 = vpop.f32.mrf.mxu1 }
 0x314   : > { %3055 = vst.msk [vmem:[#allocation3 + $0x170] sm:$0xff] %vm352_vm2, %v3022_v21  ;;  %v2919_v4 = vadd.f32 %v2867_v48, %v2641_v42  ;;  %6022 = vmatmul.msk.f32.gmra.mxu2 %vm352_vm2, %v7865_v47 }
 0x315   : > { %6055 = vmatmul.msk.f32.gmra.mxu3 %vm352_vm2, %v7940_v10 }
 0x316   : > { %v2955_v30 = vmul.f32 %v7548_v59, %v2919_v4  ;;  %6090 = vmatmul.msk.f32.gmra.mxu0 %vm352_vm2, %v7949_v57  ;;  %6004 = vmatmul.msk.f32.gmra.mxu1 %vm352_vm2, %v7959_v51  ;;  %v7980_v4 = vld [vmem:[#allocation3 + $0x168] sm:$0xff] }
 0x317   : > { %v2314_v48 = vpop.f32.mrf.mxu2 }
 0x318   : > { %v2592_v55 = vpop.f32.mrf.mxu3  ;;  %v2991_v50 = vadd.f32 %v7560_v22, %v2955_v30  ;;  %v2364_v58 = vadd.f32 %v2314_v48, %v2085_v2  ;;  %v7982_v48 = vld [vmem:[#allocation3 + $0x91] sm:$0xff] }
 0x31a   : > { %v3023_v32 = vmax.f32 %v2991_v50, 0.0  ;;  %v2642_v43 = vadd.f32 %v2592_v55, %v2364_v58  ;;  %v2087_v50 = vadd.f32 %v7732_v41, %v7390_v20  ;;  %v8019_v41 = vld [vmem:[%s9119_s2] ss:$0 sm:$0xff] }
 0x31b   : > { %v2879_v54 = vpop.f32.mrf.mxu0  ;;  %v7978_v42 = vpop.f32.mrf.mxu1 }
 0x31c   : > { %3056 = vst.msk [vmem:[#allocation3 + $0x188] sm:$0xff] %vm352_vm2, %v3023_v32  ;;  %v2920_v38 = vadd.f32 %v2870_v56, %v2642_v43  ;;  %6023 = vmatmul.msk.f32.gmra.mxu2 %vm352_vm2, %v7886_v34 }
 0x31d   : > { %6056 = vmatmul.msk.f32.gmra.mxu3 %vm352_vm2, %v7961_v35 }
 0x31e   : > { %v2956_v40 = vmul.f32 %v7548_v59, %v2920_v38  ;;  %6091 = vmatmul.msk.f32.gmra.mxu0 %vm352_vm2, %v7970_v14  ;;  %6005 = vmatmul.msk.f32.gmra.mxu1 %vm352_vm2, %v7980_v4 }
 0x31f   : > { %v2317_v56 = vpop.f32.mrf.mxu2 }
 0x320   : > { %v2595_v1 = vpop.f32.mrf.mxu3  ;;  %v2992_v39 = vadd.f32 %v7560_v22, %v2956_v40  ;;  %v2365_v21 = vadd.f32 %v2317_v56, %v2086_v29  ;;  %v8001_v40 = vld [vmem:[#allocation3 + $0x170] sm:$0xff] }
 0x322   : > { %v3024_v2 = vmax.f32 %v2992_v39, 0.0  ;;  %v2643_v30 = vadd.f32 %v2595_v1, %v2365_v21  ;;  %v8003_v39 = vld [vmem:[#allocation3 + $0xa9] sm:$0xff] }
 0x323   : > { %v2882_v55 = vpop.f32.mrf.mxu0  ;;  %v7999_v29 = vpop.f32.mrf.mxu1 }
 0x324   : > { %3057 = vst.msk [vmem:[#allocation3 + $0x190] sm:$0xff] %vm352_vm2, %v3024_v2  ;;  %v2921_v61 = vadd.f32 %v2873_v28, %v2643_v30  ;;  %6024 = vmatmul.msk.f32.gmra.mxu2 %vm352_vm2, %v7907_v5 }
 0x325   : > { %6057 = vmatmul.msk.f32.gmra.mxu3 %vm352_vm2, %v7982_v48 }
 0x326   : > { %v2957_v58 = vmul.f32 %v7548_v59, %v2921_v61  ;;  %6092 = vmatmul.msk.f32.gmra.mxu0 %vm352_vm2, %v7991_v9  ;;  %6006 = vmatmul.msk.f32.gmra.mxu1 %vm352_vm2, %v8001_v40  ;;  %v8012_v59 = vld [vmem:[#allocation3 + $0xe7] sm:$0xff]  ;;  %v8027_v61 = vld [vmem:[%s9120_s3] ss:$0 sm:$0xff] }
 0x327   : > { %v2320_v28 = vpop.f32.mrf.mxu2  ;;  %9282 = vst [vmem:[#allocation5_spill] sm:$0xff] %v8012_v59 }
 0x328   : > { %v2598_v32 = vpop.f32.mrf.mxu3  ;;  %v2993_v43 = vadd.f32 %v7560_v22, %v2957_v58  ;;  %v2366_v38 = vadd.f32 %v2320_v28, %v2087_v50  ;;  %v2088_v22 = vadd.f32 %v7744_v3, %v7399_v12  ;;  %v8032_v58 = vld [vmem:[#allocation3 + $0x188] sm:$0xff] }
 0x329   : > { %9283 = vst [vmem:[#allocation4_spill] sm:$0xff] %v8032_v58 }
 0x32a   : > { %v3025_v56 = vmax.f32 %v2993_v43, 0.0  ;;  %v2644_v1 = vadd.f32 %v2598_v32, %v2366_v38  ;;  %v8034_v43 = vld [vmem:[#allocation3 + $0xb1] sm:$0xff] }
 0x32b   : > { %v2885_v21 = vpop.f32.mrf.mxu0  ;;  %v8030_v3 = vpop.f32.mrf.mxu1  ;;  %9284 = vst [vmem:[#allocation7_spill] sm:$0xff] %v8034_v43 }
 0x32c   : > { %3058 = vst.msk [vmem:[#allocation3 + $0x1a8] sm:$0xff] %vm352_vm2, %v3025_v56  ;;  %v2922_v20 = vadd.f32 %v2876_v53, %v2644_v1  ;;  %6025 = vmatmul.msk.f32.gmra.mxu2 %vm352_vm2, %v7928_v24  ;;  %v8045_v1 = vld [vmem:[#allocation3 + $0xef] sm:$0xff] }
 0x32d   : > { %6058 = vmatmul.msk.f32.gmra.mxu3 %vm352_vm2, %v8003_v39  ;;  %9285 = vst [vmem:[#allocation6_spill] sm:$0xff] %v8045_v1 }
 0x32e   : > { %v2958_v53 = vmul.f32 %v8019_v41, %v2922_v20  ;;  %6093 = vmatmul.msk.f32.gmra.mxu0 %vm352_vm2, %v8012_v59  ;;  %6007 = vmatmul.msk.f32.gmra.mxu1 %vm352_vm2, %v8032_v58  ;;  %v2089_v20 = vadd.f32 %v7756_v18, %v7416_v6  ;;  %v8057_v58 = vld [vmem:[#allocation3 + $0xc9] sm:$0xff] }
 0x32f   : > { %v2323_v2 = vpop.f32.mrf.mxu2  ;;  %9287 = vst [vmem:[#allocation8_spill] sm:$0xff] %v8057_v58  ;;  %v8068_v18 = vld [vmem:[#allocation3 + $0x107] sm:$0xff] }
 0x330   : > { %v2601_v30 = vpop.f32.mrf.mxu3  ;;  %v2994_v50 = vadd.f32 %v8027_v61, %v2958_v53  ;;  %v2367_v12 = vadd.f32 %v2323_v2, %v2088_v22  ;;  %9288 = vst [vmem:[#allocation11_spill] sm:$0xff] %v8068_v18 }
 0x332   : > { %v3026_v28 = vmax.f32 %v2994_v50, 0.0  ;;  %v2645_v32 = vadd.f32 %v2601_v30, %v2367_v12  ;;  %v8055_v12 = vld [vmem:[#allocation3 + $0x190] sm:$0xff] }
 0x333   : > { %v8036_v38 = vpop.f32.mrf.mxu0  ;;  %v8053_v50 = vpop.f32.mrf.mxu1  ;;  %9286 = vst [vmem:[#allocation9_spill] sm:$0xff] %v8055_v12 }
 0x334   : > { %3059 = vst.msk [vmem:[#allocation3 + $0x1b0] sm:$0xff] %vm352_vm2, %v3026_v28  ;;  %v2923_v56 = vadd.f32 %v2879_v54, %v2645_v32  ;;  %6026 = vmatmul.msk.f32.gmra.mxu2 %vm352_vm2, %v7949_v57 }
 0x335   : > { %6059 = vmatmul.msk.f32.gmra.mxu3 %vm352_vm2, %v8034_v43 }
 0x336   : > { %v2959_v22 = vmul.f32 %v8019_v41, %v2923_v56  ;;  %6094 = vmatmul.msk.f32.gmra.mxu0 %vm352_vm2, %v8045_v1  ;;  %6008 = vmatmul.msk.f32.gmra.mxu1 %vm352_vm2, %v8055_v12  ;;  %v2090_v56 = vadd.f32 %v7774_v46, %v7443_v33  ;;  %v8080_v12 = vld [vmem:[#allocation3 + $0xd1] sm:$0xff] }
 0x337   : > { %v2326_v54 = vpop.f32.mrf.mxu2  ;;  %9290 = vst [vmem:[#allocation13_spill] sm:$0xff] %v8080_v12  ;;  %v8091_v46 = vld [vmem:[#allocation3 + $0x10f] sm:$0xff] }
 0x338   : > { %v2604_v53 = vpop.f32.mrf.mxu3  ;;  %v2995_v2 = vadd.f32 %v8027_v61, %v2959_v22  ;;  %v2368_v30 = vadd.f32 %v2326_v54, %v2089_v20  ;;  %9291 = vst [vmem:[#allocation12_spill] sm:$0xff] %v8091_v46 }
 0x33a   : > { %v3027_v28 = vmax.f32 %v2995_v2, 0.0  ;;  %v2646_v32 = vadd.f32 %v2604_v53, %v2368_v30  ;;  %v8078_v30 = vld [vmem:[#allocation3 + $0x1a8] sm:$0xff] }
 0x33b   : > { %v8059_v43 = vpop.f32.mrf.mxu0  ;;  %v8076_v2 = vpop.f32.mrf.mxu1  ;;  %9289 = vst [vmem:[#allocation10_spill] sm:$0xff] %v8078_v30 }
 0x33c   : > { %3060 = vst.msk [vmem:[#allocation3 + $0x1c8] sm:$0xff] %vm352_vm2, %v3027_v28  ;;  %v2924_v6 = vadd.f32 %v2882_v55, %v2646_v32  ;;  %6027 = vmatmul.msk.f32.gmra.mxu2 %vm352_vm2, %v7970_v14 }
 0x33d   : > { %6060 = vmatmul.msk.f32.gmra.mxu3 %vm352_vm2, %v8057_v58 }
 0x33e   : > { %v2960_v20 = vmul.f32 %v8019_v41, %v2924_v6  ;;  %6095 = vmatmul.msk.f32.gmra.mxu0 %vm352_vm2, %v8068_v18  ;;  %6009 = vmatmul.msk.f32.gmra.mxu1 %vm352_vm2, %v8078_v30  ;;  %v6146_v6 = vld [vmem:[%s9121_s4 + $0x28] sm:$0xff] }
 0x33f   : > { %v2329_v55 = vpop.f32.mrf.mxu2  ;;  %4521 = vmatpush.msra.mxu2 %v6146_v6 }
 0x340   : > { %v2607_v22 = vpop.f32.mrf.mxu3  ;;  %v2996_v54 = vadd.f32 %v8027_v61, %v2960_v20  ;;  %v2369_v53 = vadd.f32 %v2329_v55, %v2090_v56  ;;  %v2091_v56 = vadd.f32 %v7790_v49, %v7469_v27  ;;  %v6179_v27 = vld [vmem:[%s9121_s4 + $0x30] sm:$0xff] }
 0x341   : > { %v8109_v49 = vld [vmem:[#allocation3 + $0xe9] sm:$0xff]  ;;  %4797 = vmatpush.msra.mxu3 %v6179_v27 }
 0x342   : > { %v3028_v28 = vmax.f32 %v2996_v54, 0.0  ;;  %v2647_v32 = vadd.f32 %v2607_v22, %v2369_v53  ;;  %9293 = vst [vmem:[#allocation15_spill] sm:$0xff] %v8109_v49 }
 0x343   : > { %v8082_v58 = vpop.f32.mrf.mxu0  ;;  %v8102_v53 = vpop.f32.mrf.mxu1 }
 0x344   : > { %3061 = vst.msk [vmem:[#allocation3 + $0x1d0] sm:$0xff] %vm352_vm2, %v3028_v28  ;;  %v2925_v33 = vadd.f32 %v2885_v21, %v2647_v32  ;;  %6028 = vmatmul.msk.f32.gmra.mxu2 %vm352_vm2, %v7991_v9  ;;  %v8104_v28 = vld [vmem:[#allocation3 + $0x1b0] sm:$0xff] }
 0x345   : > { %6061 = vmatmul.msk.f32.gmra.mxu3 %vm352_vm2, %v8080_v12  ;;  %9292 = vst [vmem:[#allocation14_spill] sm:$0xff] %v8104_v28 }
 0x346   : > { %v2961_v21 = vmul.f32 %v8019_v41, %v2925_v33  ;;  %6096 = vmatmul.msk.f32.gmra.mxu0 %vm352_vm2, %v8091_v46  ;;  %6010 = vmatmul.msk.f32.gmra.mxu1 %vm352_vm2, %v8104_v28 }
 0x347   : > { %v2332_v20 = vpop.f32.mrf.mxu2 }
 0x348   : > { %v2610_v55 = vpop.f32.mrf.mxu3  ;;  %v2997_v22 = vadd.f32 %v8027_v61, %v2961_v21  ;;  %v2370_v54 = vadd.f32 %v2332_v20, %v2091_v56  ;;  %v8121_v56 = vld [vmem:[#allocation3 + $0x127] sm:$0xff]  ;;  %v2092_v21 = vadd.f32 %v7805_v13, %v7497_v0  ;;  %v6212_v0 = vld [vmem:[%s9121_s4 + $0x38] sm:$0xff] }
 0x349   : > { %9294 = vst [vmem:[#allocation17_spill] sm:$0xff] %v8121_v56  ;;  %v8136_v13 = vld [vmem:[#allocation3 + $0xf1] sm:$0xff]  ;;  %5072 = vmatpush.msra.mxu0 %v6212_v0 }
 0x34a   : > { %v3029_v32 = vmax.f32 %v2997_v22, 0.0  ;;  %v2648_v30 = vadd.f32 %v2610_v55, %v2370_v54  ;;  %9296 = vst [vmem:[#allocation16_spill] sm:$0xff] %v8136_v13 }
 0x34b   : > { %v8111_v33 = vpop.f32.mrf.mxu0  ;;  %v8129_v54 = vpop.f32.mrf.mxu1  ;;  %v8159_v0 = vld [vmem:[#allocation3 + $0x1d0] sm:$0xff] }
 0x34c   : > { %3062 = vst.msk [vmem:[#allocation3 + $0x1e8] sm:$0xff] %vm352_vm2, %v3029_v32  ;;  %v2926_v6 = vadd.f32 %v8036_v38, %v2648_v30  ;;  %6029 = vmatmul.msk.f32.gmra.mxu2 %vm352_vm2, %v8012_v59  ;;  %v8131_v32 = vld [vmem:[#allocation3 + $0x1c8] sm:$0xff]  ;;  %v8404_v59 = vld [vmem:[#allocation3 + $0x1d1] sm:$0xff] }
 0x34d   : > { %6062 = vmatmul.msk.f32.gmra.mxu3 %vm352_vm2, %v8109_v49  ;;  %9295 = vst [vmem:[#allocation19_spill] sm:$0xff] %v8131_v32  ;;  %v8385_v12 = vld [vmem:[#allocation3 + $0x1c9] sm:$0xff] }
 0x34e   : > { %v2962_v20 = vmul.f32 %v8019_v41, %v2926_v6  ;;  %6097 = vmatmul.msk.f32.gmra.mxu0 %vm352_vm2, %v8121_v56  ;;  %6011 = vmatmul.msk.f32.gmra.mxu1 %vm352_vm2, %v8131_v32  ;;  %9298 = vst [vmem:[#allocation18_spill] sm:$0xff] %v8159_v0 }
 0x34f   : > { %v2335_v38 = vpop.f32.mrf.mxu2  ;;  %9335 = vst [vmem:[#allocation57_spill] sm:$0xff] %v8385_v12 }
 0x350   : > { %v2613_v30 = vpop.f32.mrf.mxu3  ;;  %v2998_v55 = vadd.f32 %v8027_v61, %v2962_v20  ;;  %v2371_v22 = vadd.f32 %v2335_v38, %v2092_v21  ;;  %v8146_v21 = vld [vmem:[#allocation3 + $0x12f] sm:$0xff]  ;;  %v6245_v20 = vld [vmem:[%s9121_s4 + $0x40] sm:$0xff]  ;;  %v2093_v38 = vadd.f32 %v7819_v16, %v7525_v17  ;;  %9338 = vst [vmem:[#allocation60_spill] sm:$0xff] %v8404_v59 }
 0x351   : > { %9297 = vst [vmem:[#allocation21_spill] sm:$0xff] %v8146_v21  ;;  %5347 = vmatpush.msra.mxu1 %v6245_v20 }
 0x352   : > { %v3030_v27 = vmax.f32 %v2998_v55, 0.0  ;;  %v2649_v28 = vadd.f32 %v2613_v30, %v2371_v22 }
 0x353   : > { %v3976_v6 = vpop.f32.mrf.mxu0 }
 0x354   : > { %3063 = vst.msk [vmem:[#allocation3 + $0x1f0] sm:$0xff] %vm352_vm2, %v3030_v27  ;;  %v2927_v49 = vadd.f32 %v8059_v43, %v2649_v28  ;;  %6030 = vmatmul.msk.f32.gmra.mxu2 %vm352_vm2, %v8045_v1  ;;  %v8157_v27 = vpop.f32.mrf.mxu1  ;;  %v8161_v1 = vld [vmem:[#allocation3 + $0x109] sm:$0xff] }
 0x355   : > { %6063 = vmatmul.msk.f32.gmra.mxu3 %vm352_vm2, %v8136_v13  ;;  %9299 = vst [vmem:[#allocation23_spill] sm:$0xff] %v8161_v1 }
 0x356   : > { %v2963_v43 = vmul.f32 %v8019_v41, %v2927_v49  ;;  %6098 = vmatmul.msk.f32.gmra.mxu0 %vm352_vm2, %v8146_v21  ;;  %6012 = vmatmul.msk.f32.gmra.mxu1 %vm352_vm2, %v8159_v0  ;;  %v8171_v49 = vld [vmem:[#allocation3 + $0x147] sm:$0xff] }
 0x357   : > { %v2338_v28 = vpop.f32.mrf.mxu2  ;;  %9300 = vst [vmem:[#allocation20_spill] sm:$0xff] %v8171_v49 }
 0x358   : > { %v2616_v30 = vpop.f32.mrf.mxu3  ;;  %v2999_v55 = vadd.f32 %v8027_v61, %v2963_v43  ;;  %v2372_v22 = vadd.f32 %v2338_v28, %v2093_v38  ;;  %v8180_v28 = vld [vmem:[#allocation3 + $0x1e8] sm:$0xff] }
 0x359   : > { %9301 = vst [vmem:[#allocation25_spill] sm:$0xff] %v8180_v28 }
 0x35a   : > { %v3031_v32 = vmax.f32 %v2999_v55, 0.0  ;;  %v2650_v13 = vadd.f32 %v2616_v30, %v2372_v22  ;;  %v8182_v22 = vld [vmem:[#allocation3 + $0x111] sm:$0xff] }
 0x35b   : > { %v3979_v17 = vpop.f32.mrf.mxu0  ;;  %9302 = vst [vmem:[#allocation22_spill] sm:$0xff] %v8182_v22 }
 0x35c   : > { %3064 = vst.msk [vmem:[#allocation3 + $0x208] sm:$0xff] %vm352_vm2, %v3031_v32  ;;  %v2928_v16 = vadd.f32 %v8082_v58, %v2650_v13  ;;  %6031 = vmatmul.msk.f32.gmra.mxu2 %vm352_vm2, %v8068_v18  ;;  %v8178_v43 = vpop.f32.mrf.mxu1  ;;  %v8366_v18 = vld [vmem:[#allocation3 + $0x1b1] sm:$0xff] }
 0x35d   : > { %6064 = vmatmul.msk.f32.gmra.mxu3 %vm352_vm2, %v8161_v1  ;;  %v8328_v1 = vld [vmem:[#allocation3 + $0x191] sm:$0xff]  ;;  %9333 = vst [vmem:[#allocation55_spill] sm:$0xff] %v8366_v18 }
 0x35e   : > { %v2964_v20 = vmul.f32 %v8019_v41, %v2928_v16  ;;  %6099 = vmatmul.msk.f32.gmra.mxu0 %vm352_vm2, %v8171_v49  ;;  %6013 = vmatmul.msk.f32.gmra.mxu1 %vm352_vm2, %v8180_v28  ;;  %v8220_v28 = vld [vmem:[#allocation3 + $0x131] sm:$0xff]  ;;  %9327 = vst [vmem:[#allocation49_spill] sm:$0xff] %v8328_v1 }
 0x35f   : > { %v3455_v38 = vpop.f32.mrf.mxu2  ;;  %9309 = vst [vmem:[#allocation33_spill] sm:$0xff] %v8220_v28 }
 0x360   : > { %v3698_v32 = vpop.f32.mrf.mxu3  ;;  %v3000_v58 = vadd.f32 %v8027_v61, %v2964_v20  ;;  %v3456_v13 = vadd.f32 %v3455_v38, %v7838_v44  ;;  %v8194_v44 = vld [vmem:[#allocation3 + $0x14f] sm:$0xff] }
 0x361   : > { %9304 = vst [vmem:[#allocation24_spill] sm:$0xff] %v8194_v44 }
 0x362   : > { %v3032_v30 = vmax.f32 %v3000_v58, 0.0  ;;  %v3794_v55 = vadd.f32 %v3698_v32, %v3456_v13  ;;  %v8201_v32 = vld [vmem:[#allocation3 + $0x1f0] sm:$0xff] }
 0x363   : > { %v3982_v0 = vpop.f32.mrf.mxu0  ;;  %9305 = vst [vmem:[#allocation29_spill] sm:$0xff] %v8201_v32  ;;  %v8203_v13 = vld [vmem:[#allocation3 + $0x129] sm:$0xff] }
 0x364   : > { %3065 = vst.msk [vmem:[#allocation3 + $0x210] sm:$0xff] %vm352_vm2, %v3032_v30  ;;  %6032 = vmatmul.msk.f32.gmra.mxu2 %vm352_vm2, %v8091_v46  ;;  %v8190_v41 = vadd.f32 %v8111_v33, %v3794_v55  ;;  %v8199_v38 = vpop.f32.mrf.mxu1  ;;  %v8347_v46 = vld [vmem:[#allocation3 + $0x1a9] sm:$0xff] }
 0x365   : > { %6065 = vmatmul.msk.f32.gmra.mxu3 %vm352_vm2, %v8182_v22  ;;  %9306 = vst [vmem:[#allocation26_spill] sm:$0xff] %v8203_v13 }
 0x366   : > { %9303 = vst [vmem:[#allocation27_spill] sm:$0xff] %v8190_v41  ;;  %6100 = vmatmul.msk.f32.gmra.mxu0 %vm352_vm2, %v8194_v44  ;;  %6014 = vmatmul.msk.f32.gmra.mxu1 %vm352_vm2, %v8201_v32 }
 0x367   : > { %v3458_v61 = vpop.f32.mrf.mxu2  ;;  %9330 = vst [vmem:[#allocation52_spill] sm:$0xff] %v8347_v46 }
 0x368   : > { %v3701_v16 = vpop.f32.mrf.mxu3  ;;  %v3459_v20 = vadd.f32 %v3458_v61, %v7869_v25  ;;  %v8213_v25 = vld [vmem:[#allocation3 + $0x167] sm:$0xff] }
 0x369   : > { %9308 = vst [vmem:[#allocation28_spill] sm:$0xff] %v8213_v25 }
 0x36a   : > { %v3795_v58 = vadd.f32 %v3701_v16, %v3459_v20 }
 0x36b   : > { %v3985_v33 = vpop.f32.mrf.mxu0 }
 0x36c   : > { %6033 = vmatmul.msk.f32.gmra.mxu2 %vm352_vm2, %v8121_v56  ;;  %v8209_v30 = vadd.f32 %v3976_v6, %v3795_v58  ;;  %v8218_v20 = vpop.f32.mrf.mxu1  ;;  %v4101_v6 = vld [vmem:[#allocation3 + $0x28] sm:$0xff] }
 0x36d   : > { %6066 = vmatmul.msk.f32.gmra.mxu3 %vm352_vm2, %v8203_v13  ;;  %v8309_v56 = vld [vmem:[#allocation3 + $0x189] sm:$0xff] }
 0x36e   : > { %9307 = vst [vmem:[#allocation31_spill] sm:$0xff] %v8209_v30  ;;  %6101 = vmatmul.msk.f32.gmra.mxu0 %vm352_vm2, %v8213_v25  ;;  %6114 = vmatmul.msk.f32.vlgmr.msrb.gmra.mxu1 %vm352_vm2, %v4101_v6  ;;  %v8229_v30 = vld [vmem:[#allocation3 + $0x16f] sm:$0xff] }
 0x36f   : > { %v3461_v55 = vpop.f32.mrf.mxu2  ;;  %9311 = vst [vmem:[#allocation35_spill] sm:$0xff] %v8229_v30 }
 0x370   : > { %v3704_v61 = vpop.f32.mrf.mxu3  ;;  %v3462_v16 = vadd.f32 %v3461_v55, %v7893_v11  ;;  %9324 = vst [vmem:[#allocation46_spill] sm:$0xff] %v8309_v56 }
 0x372   : > { %v3796_v41 = vadd.f32 %v3704_v61, %v3462_v16 }
 0x373   : > { %v3988_v13 = vpop.f32.mrf.mxu0 }
 0x374   : > { %6034 = vmatmul.msk.f32.gmra.mxu2 %vm352_vm2, %v8146_v21  ;;  %v8226_v58 = vadd.f32 %v3979_v17, %v3796_v41  ;;  %v8234_v16 = vpop.f32.mrf.mxu1  ;;  %v8236_v21 = vld [vmem:[#allocation3 + $0x149] sm:$0xff] }
 0x375   : > { %6067 = vmatmul.msk.f32.gmra.mxu3 %vm352_vm2, %v8220_v28  ;;  %9312 = vst [vmem:[#allocation32_spill] sm:$0xff] %v8236_v21  ;;  %v4102_v28 = vld [vmem:[#allocation3 + $0x30] sm:$0xff]  ;;  %v8245_v41 = vld [vmem:[#allocation3 + $0x187] sm:$0xff] }
 0x376   : > { %9310 = vst [vmem:[#allocation30_spill] sm:$0xff] %v8226_v58  ;;  %6102 = vmatmul.msk.f32.gmra.mxu0 %vm352_vm2, %v8229_v30  ;;  %6115 = vmatmul.msk.f32.gmra.mxu1 %vm352_vm2, %v4102_v28  ;;  %v8252_v58 = vld [vmem:[#allocation3 + $0x151] sm:$0xff] }
 0x377   : > { %v3464_v11 = vpop.f32.mrf.mxu2  ;;  %9314 = vst [vmem:[#allocation34_spill] sm:$0xff] %v8245_v41 }
 0x378   : > { %v3707_v55 = vpop.f32.mrf.mxu3  ;;  %v3465_v61 = vadd.f32 %v3464_v11, %v7915_v60  ;;  %9315 = vst [vmem:[#allocation39_spill] sm:$0xff] %v8252_v58 }
 0x37a   : > { %v3797_v32 = vadd.f32 %v3707_v55, %v3465_v61 }
 0x37b   : > { %v3991_v22 = vpop.f32.mrf.mxu0 }
 0x37c   : > { %6035 = vmatmul.msk.f32.gmra.mxu2 %vm352_vm2, %v8171_v49  ;;  %v8242_v17 = vadd.f32 %v3982_v0, %v3797_v32  ;;  %v8250_v55 = vpop.f32.mrf.mxu1 }
 0x37d   : > { %6068 = vmatmul.msk.f32.gmra.mxu3 %vm352_vm2, %v8236_v21  ;;  %v8254_v21 = vld [vmem:[#allocation3 + $0x48] sm:$0xff] }
 0x37e   : > { %9313 = vst [vmem:[#allocation37_spill] sm:$0xff] %v8242_v17  ;;  %6103 = vmatmul.msk.f32.gmra.mxu0 %vm352_vm2, %v8245_v41  ;;  %6116 = vmatmul.msk.f32.gmra.mxu1 %vm352_vm2, %v8254_v21  ;;  %v8271_v17 = vld [vmem:[#allocation3 + $0x169] sm:$0xff] }
 0x37f   : > { %v3467_v60 = vpop.f32.mrf.mxu2  ;;  %9318 = vst [vmem:[#allocation38_spill] sm:$0xff] %v8271_v17 }
 0x380   : > { %v3710_v6 = vpop.f32.mrf.mxu3  ;;  %v3468_v11 = vadd.f32 %v3467_v60, %v7936_v45  ;;  %v8264_v45 = vld [vmem:[#allocation3 + $0x18f] sm:$0xff] }
 0x381   : > { %9317 = vst [vmem:[#allocation41_spill] sm:$0xff] %v8264_v45 }
 0x382   : > { %v3798_v61 = vadd.f32 %v3710_v6, %v3468_v11 }
 0x383   : > { %v3994_v49 = vpop.f32.mrf.mxu0 }
 0x384   : > { %6036 = vmatmul.msk.f32.gmra.mxu2 %vm352_vm2, %v8194_v44  ;;  %v8260_v0 = vadd.f32 %v3985_v33, %v3798_v61  ;;  %v8269_v6 = vpop.f32.mrf.mxu1  ;;  %v8273_v33 = vld [vmem:[#allocation3 + $0x50] sm:$0xff] }
 0x385   : > { %6069 = vmatmul.msk.f32.gmra.mxu3 %vm352_vm2, %v8252_v58  ;;  %v8290_v44 = vld [vmem:[#allocation3 + $0x171] sm:$0xff] }
 0x386   : > { %9316 = vst [vmem:[#allocation36_spill] sm:$0xff] %v8260_v0  ;;  %6104 = vmatmul.msk.f32.gmra.mxu0 %vm352_vm2, %v8264_v45  ;;  %6117 = vmatmul.msk.f32.gmra.mxu1 %vm352_vm2, %v8273_v33 }
 0x387   : > { %v3470_v28 = vpop.f32.mrf.mxu2  ;;  %9321 = vst [vmem:[#allocation43_spill] sm:$0xff] %v8290_v44 }
 0x388   : > { %v3713_v32 = vpop.f32.mrf.mxu3  ;;  %v3471_v60 = vadd.f32 %v3470_v28, %v7957_v63  ;;  %v8283_v63 = vld [vmem:[#allocation3 + $0x1a7] sm:$0xff] }
 0x389   : > { %9320 = vst [vmem:[#allocation42_spill] sm:$0xff] %v8283_v63 }
 0x38a   : > { %v3799_v11 = vadd.f32 %v3713_v32, %v3471_v60 }
 0x38b   : > { %v3997_v58 = vpop.f32.mrf.mxu0 }
 0x38c   : > { %6037 = vmatmul.msk.f32.gmra.mxu2 %vm352_vm2, %v8213_v25  ;;  %v8279_v61 = vadd.f32 %v3988_v13, %v3799_v11  ;;  %v8288_v0 = vpop.f32.mrf.mxu1  ;;  %v8292_v13 = vld [vmem:[#allocation3 + $0x68] sm:$0xff] }
 0x38d   : > { %6070 = vmatmul.msk.f32.gmra.mxu3 %vm352_vm2, %v8271_v17 }
 0x38e   : > { %9319 = vst [vmem:[#allocation40_spill] sm:$0xff] %v8279_v61  ;;  %6105 = vmatmul.msk.f32.gmra.mxu0 %vm352_vm2, %v8283_v63  ;;  %6118 = vmatmul.msk.f32.gmra.mxu1 %vm352_vm2, %v8292_v13 }
 0x38f   : > { %v3473_v28 = vpop.f32.mrf.mxu2 }
 0x390   : > { %v3716_v32 = vpop.f32.mrf.mxu3  ;;  %v3474_v60 = vadd.f32 %v3473_v28, %v7978_v42  ;;  %v8302_v42 = vld [vmem:[#allocation3 + $0x1af] sm:$0xff] }
 0x391   : > { %9323 = vst [vmem:[#allocation45_spill] sm:$0xff] %v8302_v42 }
 0x392   : > { %v3800_v25 = vadd.f32 %v3716_v32, %v3474_v60 }
 0x393   : > { %v4000_v17 = vpop.f32.mrf.mxu0 }
 0x394   : > { %6038 = vmatmul.msk.f32.gmra.mxu2 %vm352_vm2, %v8229_v30  ;;  %v8298_v11 = vadd.f32 %v3991_v22, %v3800_v25  ;;  %v8307_v61 = vpop.f32.mrf.mxu1  ;;  %v8311_v22 = vld [vmem:[#allocation3 + $0x70] sm:$0xff] }
 0x395   : > { %6071 = vmatmul.msk.f32.gmra.mxu3 %vm352_vm2, %v8290_v44 }
 0x396   : > { %9322 = vst [vmem:[#allocation44_spill] sm:$0xff] %v8298_v11  ;;  %6106 = vmatmul.msk.f32.gmra.mxu0 %vm352_vm2, %v8302_v42  ;;  %6119 = vmatmul.msk.f32.gmra.mxu1 %vm352_vm2, %v8311_v22 }
 0x397   : > { %v3476_v28 = vpop.f32.mrf.mxu2 }
 0x398   : > { %v3719_v32 = vpop.f32.mrf.mxu3  ;;  %v3477_v60 = vadd.f32 %v3476_v28, %v7999_v29  ;;  %v8321_v29 = vld [vmem:[#allocation3 + $0x1c7] sm:$0xff] }
 0x399   : > { %9326 = vst [vmem:[#allocation48_spill] sm:$0xff] %v8321_v29 }
 0x39a   : > { %v3801_v30 = vadd.f32 %v3719_v32, %v3477_v60 }
 0x39b   : > { %v4003_v44 = vpop.f32.mrf.mxu0 }
 0x39c   : > { %6039 = vmatmul.msk.f32.gmra.mxu2 %vm352_vm2, %v8245_v41  ;;  %v8317_v25 = vadd.f32 %v3994_v49, %v3801_v30  ;;  %v8326_v11 = vpop.f32.mrf.mxu1  ;;  %v8330_v49 = vld [vmem:[#allocation3 + $0x88] sm:$0xff] }
 0x39d   : > { %6072 = vmatmul.msk.f32.gmra.mxu3 %vm352_vm2, %v8309_v56 }
 0x39e   : > { %9325 = vst [vmem:[#allocation47_spill] sm:$0xff] %v8317_v25  ;;  %6107 = vmatmul.msk.f32.gmra.mxu0 %vm352_vm2, %v8321_v29  ;;  %6120 = vmatmul.msk.f32.gmra.mxu1 %vm352_vm2, %v8330_v49 }
 0x39f   : > { %v3479_v28 = vpop.f32.mrf.mxu2 }
 0x3a0   : > { %v3722_v32 = vpop.f32.mrf.mxu3  ;;  %v3480_v60 = vadd.f32 %v3479_v28, %v8030_v3  ;;  %v8340_v3 = vld [vmem:[#allocation3 + $0x1cf] sm:$0xff] }
 0x3a1   : > { %9329 = vst [vmem:[#allocation51_spill] sm:$0xff] %v8340_v3 }
 0x3a2   : > { %v3802_v41 = vadd.f32 %v3722_v32, %v3480_v60 }
 0x3a3   : > { %v4006_v56 = vpop.f32.mrf.mxu0 }
 0x3a4   : > { %6040 = vmatmul.msk.f32.gmra.mxu2 %vm352_vm2, %v8264_v45  ;;  %v8336_v30 = vadd.f32 %v3997_v58, %v3802_v41  ;;  %v8345_v25 = vpop.f32.mrf.mxu1  ;;  %v8349_v58 = vld [vmem:[#allocation3 + $0x90] sm:$0xff] }
 0x3a5   : > { %6073 = vmatmul.msk.f32.gmra.mxu3 %vm352_vm2, %v8328_v1 }
 0x3a6   : > { %9328 = vst [vmem:[#allocation50_spill] sm:$0xff] %v8336_v30  ;;  %6108 = vmatmul.msk.f32.gmra.mxu0 %vm352_vm2, %v8340_v3  ;;  %6121 = vmatmul.msk.f32.gmra.mxu1 %vm352_vm2, %v8349_v58 }
 0x3a7   : > { %v3482_v28 = vpop.f32.mrf.mxu2 }
 0x3a8   : > { %v3725_v32 = vpop.f32.mrf.mxu3  ;;  %v3483_v60 = vadd.f32 %v3482_v28, %v8053_v50  ;;  %v8359_v50 = vld [vmem:[#allocation3 + $0x1e7] sm:$0xff] }
 0x3a9   : > { %9332 = vst [vmem:[#allocation54_spill] sm:$0xff] %v8359_v50 }
 0x3aa   : > { %v3803_v45 = vadd.f32 %v3725_v32, %v3483_v60 }
 0x3ab   : > { %v4009_v1 = vpop.f32.mrf.mxu0 }
 0x3ac   : > { %6041 = vmatmul.msk.f32.gmra.mxu2 %vm352_vm2, %v8283_v63  ;;  %v8355_v41 = vadd.f32 %v4000_v17, %v3803_v45  ;;  %v8364_v30 = vpop.f32.mrf.mxu1  ;;  %v8368_v17 = vld [vmem:[#allocation3 + $0xa8] sm:$0xff] }
 0x3ad   : > { %6074 = vmatmul.msk.f32.gmra.mxu3 %vm352_vm2, %v8347_v46 }
 0x3ae   : > { %9331 = vst [vmem:[#allocation53_spill] sm:$0xff] %v8355_v41  ;;  %6109 = vmatmul.msk.f32.gmra.mxu0 %vm352_vm2, %v8359_v50  ;;  %6122 = vmatmul.msk.f32.gmra.mxu1 %vm352_vm2, %v8368_v17 }
 0x3af   : > { %v3485_v28 = vpop.f32.mrf.mxu2 }
 0x3b0   : > { %v3728_v32 = vpop.f32.mrf.mxu3  ;;  %v3486_v60 = vadd.f32 %v3485_v28, %v8076_v2  ;;  %v8378_v2 = vld [vmem:[#allocation3 + $0x1ef] sm:$0xff] }
 0x3b2   : > { %v3804_v63 = vadd.f32 %v3728_v32, %v3486_v60 }
 0x3b3   : > { %v4012_v46 = vpop.f32.mrf.mxu0 }
 0x3b4   : > { %6042 = vmatmul.msk.f32.gmra.mxu2 %vm352_vm2, %v8302_v42  ;;  %v8374_v45 = vadd.f32 %v4003_v44, %v3804_v63  ;;  %v8383_v41 = vpop.f32.mrf.mxu1  ;;  %v8387_v44 = vld [vmem:[#allocation3 + $0xb0] sm:$0xff] }
 0x3b5   : > { %6075 = vmatmul.msk.f32.gmra.mxu3 %vm352_vm2, %v8366_v18 }
 0x3b6   : > { %9334 = vst [vmem:[#allocation56_spill] sm:$0xff] %v8374_v45  ;;  %6110 = vmatmul.msk.f32.gmra.mxu0 %vm352_vm2, %v8378_v2  ;;  %6123 = vmatmul.msk.f32.gmra.mxu1 %vm352_vm2, %v8387_v44 }
 0x3b7   : > { %v3488_v28 = vpop.f32.mrf.mxu2 }
 0x3b8   : > { %v3731_v32 = vpop.f32.mrf.mxu3  ;;  %v3489_v60 = vadd.f32 %v3488_v28, %v8102_v53  ;;  %v8397_v53 = vld [vmem:[#allocation3 + $0x207] sm:$0xff] }
 0x3b9   : > { %9337 = vst [vmem:[#allocation59_spill] sm:$0xff] %v8397_v53 }
 0x3ba   : > { %v3805_v42 = vadd.f32 %v3731_v32, %v3489_v60 }
 0x3bb   : > { %v4015_v18 = vpop.f32.mrf.mxu0 }
 0x3bc   : > { %6043 = vmatmul.msk.f32.gmra.mxu2 %vm352_vm2, %v8321_v29  ;;  %v8393_v63 = vadd.f32 %v4006_v56, %v3805_v42  ;;  %v8402_v45 = vpop.f32.mrf.mxu1  ;;  %v8406_v56 = vld [vmem:[#allocation3 + $0xc8] sm:$0xff] }
 0x3bd   : > { %6076 = vmatmul.msk.f32.gmra.mxu3 %vm352_vm2, %v8385_v12 }
 0x3be   : > { %9336 = vst [vmem:[#allocation58_spill] sm:$0xff] %v8393_v63  ;;  %6111 = vmatmul.msk.f32.gmra.mxu0 %vm352_vm2, %v8397_v53  ;;  %6124 = vmatmul.msk.f32.gmra.mxu1 %vm352_vm2, %v8406_v56 }
 0x3bf   : > { %v3491_v28 = vpop.f32.mrf.mxu2 }
 0x3c0   : > { %v3734_v32 = vpop.f32.mrf.mxu3  ;;  %v3492_v60 = vadd.f32 %v3491_v28, %v8129_v54  ;;  %v8416_v54 = vld [vmem:[#allocation3 + $0x20f] sm:$0xff] }
 0x3c1   : > { %9340 = vst [vmem:[#allocation62_spill] sm:$0xff] %v8416_v54 }
 0x3c2   : > { %v3806_v29 = vadd.f32 %v3734_v32, %v3492_v60 }
 0x3c3   : > { %v4018_v12 = vpop.f32.mrf.mxu0 }
 0x3c4   : > { %6044 = vmatmul.msk.f32.gmra.mxu2 %vm352_vm2, %v8340_v3  ;;  %v8412_v42 = vadd.f32 %v4009_v1, %v3806_v29  ;;  %v8421_v63 = vpop.f32.mrf.mxu1  ;;  %v8423_v3 = vld [vmem:[#allocation3 + $0x1e9] sm:$0xff] }
 0x3c5   : > { %6077 = vmatmul.msk.f32.gmra.mxu3 %vm352_vm2, %v8404_v59  ;;  %9341 = vst [vmem:[#allocation63_spill] sm:$0xff] %v8423_v3  ;;  %v8425_v1 = vld [vmem:[#allocation3 + $0xd0] sm:$0xff] }
 0x3c6   : > { %9339 = vst [vmem:[#allocation61_spill] sm:$0xff] %v8412_v42  ;;  %6112 = vmatmul.msk.f32.gmra.mxu0 %vm352_vm2, %v8416_v54  ;;  %6125 = vmatmul.msk.f32.gmra.mxu1 %vm352_vm2, %v8425_v1  ;;  %v8440_v54 = vld [vmem:[#allocation3 + $0x1f1] sm:$0xff] }
 0x3c7   : > { %v3494_v28 = vpop.f32.mrf.mxu2 }
 0x3c8   : > { %v3737_v32 = vpop.f32.mrf.mxu3  ;;  %v3495_v60 = vadd.f32 %v3494_v28, %v8157_v27 }
 0x3ca   : > { %v3807_v53 = vadd.f32 %v3737_v32, %v3495_v60 }
 0x3cb   : > { %v4021_v59 = vpop.f32.mrf.mxu0 }
 0x3cc   : > { %6045 = vmatmul.msk.f32.gmra.mxu2 %vm352_vm2, %v8359_v50  ;;  %v8431_v29 = vadd.f32 %v4012_v46, %v3807_v53  ;;  %v8438_v60 = vpop.f32.mrf.mxu1  ;;  %v6299_v53 = vld [vmem:[#allocation3 + $0xe8] sm:$0xff] }
 0x3cd   : > { %6078 = vmatmul.msk.f32.gmra.mxu3 %vm352_vm2, %v8423_v3 }
 0x3ce   : > { %9342 = vst [vmem:[#allocation64_spill] sm:$0xff] %v8431_v29  ;;  %6213 = vmatmul.msk.f32.vlgmr.msra.gmra.mxu0 %vm352_vm2, %v8254_v21  ;;  %6126 = vmatmul.msk.f32.gmra.mxu1 %vm352_vm2, %v6299_v53  ;;  %v4652_v29 = vld [vmem:[#allocation3 + $0x47] sm:$0xff] }
 0x3cf   : > { %v3497_v27 = vpop.f32.mrf.mxu2 }
 0x3d0   : > { %v3740_v28 = vpop.f32.mrf.mxu3  ;;  %v3498_v32 = vadd.f32 %v3497_v27, %v8178_v43 }
 0x3d2   : > { %v3808_v42 = vadd.f32 %v3740_v28, %v3498_v32 }
 0x3d3   : > { %v4024_v50 = vpop.f32.mrf.mxu0 }
 0x3d4   : > { %6046 = vmatmul.msk.f32.gmra.mxu2 %vm352_vm2, %v8378_v2  ;;  %v8446_v46 = vadd.f32 %v4015_v18, %v3808_v42  ;;  %v8452_v28 = vpop.f32.mrf.mxu1 }
 0x3d5   : > { %6079 = vmatmul.msk.f32.gmra.mxu3 %vm352_vm2, %v8440_v54 }
 0x3d6   : > { %6214 = vmatmul.msk.f32.gmra.mxu0 %vm352_vm2, %v8273_v33  ;;  %6127 = vmatmul.msk.f32.gmra.mxu1 %vm352_vm2, %v7833_v8 }
 0x3d7   : > { %v3500_v21 = vpop.f32.mrf.mxu2 }
 0x3d8   : > { %v3743_v43 = vpop.f32.mrf.mxu3  ;;  %v3501_v27 = vadd.f32 %v3500_v21, %v8199_v38 }
 0x3da   : > { %v3809_v32 = vadd.f32 %v3743_v43, %v3501_v27 }
 0x3db   : > { %v4027_v3 = vpop.f32.mrf.mxu0 }
 0x3dc   : > { %6147 = vmatmul.msk.f32.vlgmr.msra.gmra.mxu2 %vm352_vm2, %v7835_v26  ;;  %v8457_v18 = vadd.f32 %v4018_v12, %v3809_v32  ;;  %v8464_v53 = vpop.f32.mrf.mxu1  ;;  %v6300_v26 = vld [vmem:[#allocation3 + $0x4f] sm:$0xff] }
 0x3dd   : > { %6180 = vmatmul.msk.f32.vlgmr.msra.gmra.mxu3 %vm352_vm2, %v4652_v29 }
 0x3de   : > { %6215 = vmatmul.msk.f32.gmra.mxu0 %vm352_vm2, %v8292_v13  ;;  %6128 = vmatmul.msk.f32.gmra.mxu1 %vm352_vm2, %v7854_v36 }
 0x3df   : > { %v3503_v33 = vpop.f32.mrf.mxu2 }
 0x3e0   : > { %v3746_v38 = vpop.f32.mrf.mxu3  ;;  %v3504_v42 = vadd.f32 %v3503_v33, %v8218_v20 }
 0x3e2   : > { %v3810_v21 = vadd.f32 %v3746_v38, %v3504_v42 }
 0x3e3   : > { %v4030_v43 = vpop.f32.mrf.mxu0 }
 0x3e4   : > { %6148 = vmatmul.msk.f32.gmra.mxu2 %vm352_vm2, %v7856_v23  ;;  %v8469_v12 = vadd.f32 %v4021_v59, %v3810_v21  ;;  %v8476_v29 = vpop.f32.mrf.mxu1  ;;  %v6301_v23 = vld [vmem:[#allocation3 + $0x67] sm:$0xff] }
 0x3e5   : > { %6181 = vmatmul.msk.f32.gmra.mxu3 %vm352_vm2, %v6300_v26 }
 0x3e6   : > { %6216 = vmatmul.msk.f32.gmra.mxu0 %vm352_vm2, %v8311_v22  ;;  %6129 = vmatmul.msk.f32.gmra.mxu1 %vm352_vm2, %v7875_v31 }
 0x3e7   : > { %v3506_v8 = vpop.f32.mrf.mxu2 }
 0x3e8   : > { %v3749_v20 = vpop.f32.mrf.mxu3  ;;  %v3507_v13 = vadd.f32 %v3506_v8, %v8234_v16 }
 0x3ea   : > { %v3811_v27 = vadd.f32 %v3749_v20, %v3507_v13 }
 0x3eb   : > { %v4033_v32 = vpop.f32.mrf.mxu0 }
 0x3ec   : > { %6149 = vmatmul.msk.f32.gmra.mxu2 %vm352_vm2, %v7877_v62  ;;  %v8481_v59 = vadd.f32 %v4024_v50, %v3811_v27  ;;  %v8488_v33 = vpop.f32.mrf.mxu1 }
 0x3ed   : > { %6182 = vmatmul.msk.f32.gmra.mxu3 %vm352_vm2, %v6301_v23 }
 0x3ee   : > { %6217 = vmatmul.msk.f32.gmra.mxu0 %vm352_vm2, %v8330_v49  ;;  %6130 = vmatmul.msk.f32.gmra.mxu1 %vm352_vm2, %v7896_v7 }
 0x3ef   : > { %v3509_v36 = vpop.f32.mrf.mxu2 }
 0x3f0   : > { %v3752_v16 = vpop.f32.mrf.mxu3  ;;  %v3510_v22 = vadd.f32 %v3509_v36, %v8250_v55 }
 0x3f2   : > { %v3812_v38 = vadd.f32 %v3752_v16, %v3510_v22  ;;  %v9344_v22 = vld [vmem:[#allocation4_spill] sm:$0xff] }
 0x3f3   : > { %v4036_v42 = vpop.f32.mrf.mxu0 }
 0x3f4   : > { %6150 = vmatmul.msk.f32.gmra.mxu2 %vm352_vm2, %v7898_v15  ;;  %v8494_v62 = vadd.f32 %v4027_v3, %v3812_v38  ;;  %v8501_v50 = vpop.f32.mrf.mxu1 }
 0x3f5   : > { %6183 = vmatmul.msk.f32.gmra.mxu3 %vm352_vm2, %v7865_v47 }
 0x3f6   : > { %6218 = vmatmul.msk.f32.gmra.mxu0 %vm352_vm2, %v8349_v58  ;;  %6131 = vmatmul.msk.f32.gmra.mxu1 %vm352_vm2, %v7917_v19 }
 0x3f7   : > { %v3512_v31 = vpop.f32.mrf.mxu2 }
 0x3f8   : > { %v3755_v55 = vpop.f32.mrf.mxu3  ;;  %v3513_v49 = vadd.f32 %v3512_v31, %v8269_v6 }
 0x3fa   : > { %v3813_v21 = vadd.f32 %v3755_v55, %v3513_v49 }
 0x3fb   : > { %v4039_v26 = vpop.f32.mrf.mxu0 }
 0x3fc   : > { %6151 = vmatmul.msk.f32.gmra.mxu2 %vm352_vm2, %v7919_v52  ;;  %v8507_v47 = vadd.f32 %v4030_v43, %v3813_v21  ;;  %v8514_v3 = vpop.f32.mrf.mxu1  ;;  %v9345_v21 = vld [vmem:[#allocation8_spill] sm:$0xff] }
 0x3fd   : > { %6184 = vmatmul.msk.f32.gmra.mxu3 %vm352_vm2, %v7886_v34 }
 0x3fe   : > { %6219 = vmatmul.msk.f32.gmra.mxu0 %vm352_vm2, %v8368_v17  ;;  %6132 = vmatmul.msk.f32.gmra.mxu1 %vm352_vm2, %v7938_v37 }
 0x3ff   : > { %v3515_v7 = vpop.f32.mrf.mxu2 }
 0x400   : > { %v3758_v15 = vpop.f32.mrf.mxu3  ;;  %v3516_v6 = vadd.f32 %v3515_v7, %v8288_v0  ;;  %v9347_v7 = vld [vmem:[#allocation9_spill] sm:$0xff] }
 0x402   : > { %v3814_v58 = vadd.f32 %v3758_v15, %v3516_v6  ;;  %v4939_v15 = vld [vmem:[#allocation3 + $0x108] sm:$0xff] }
 0x403   : > { %v4042_v8 = vpop.f32.mrf.mxu0 }
 0x404   : > { %6152 = vmatmul.msk.f32.gmra.mxu2 %vm352_vm2, %v7940_v10  ;;  %v8520_v34 = vadd.f32 %v4033_v32, %v3814_v58  ;;  %v8527_v17 = vpop.f32.mrf.mxu1 }
 0x405   : > { %6185 = vmatmul.msk.f32.gmra.mxu3 %vm352_vm2, %v7907_v5 }
 0x406   : > { %6220 = vmatmul.msk.f32.gmra.mxu0 %vm352_vm2, %v8387_v44  ;;  %6133 = vmatmul.msk.f32.gmra.mxu1 %vm352_vm2, %v7959_v51 }
 0x407   : > { %v3518_v19 = vpop.f32.mrf.mxu2 }
 0x408   : > { %v3761_v52 = vpop.f32.mrf.mxu3  ;;  %v3519_v0 = vadd.f32 %v3518_v19, %v8307_v61 }
 0x40a   : > { %v3815_v43 = vadd.f32 %v3761_v52, %v3519_v0  ;;  %v9348_v0 = vld [vmem:[#allocation13_spill] sm:$0xff] }
 0x40b   : > { %v4045_v20 = vpop.f32.mrf.mxu0 }
 0x40c   : > { %6153 = vmatmul.msk.f32.gmra.mxu2 %vm352_vm2, %v7961_v35  ;;  %v8533_v5 = vadd.f32 %v4036_v42, %v3815_v43  ;;  %v8540_v44 = vpop.f32.mrf.mxu1  ;;  %v9349_v43 = vld [vmem:[#allocation6_spill] sm:$0xff] }
 0x40d   : > { %6186 = vmatmul.msk.f32.gmra.mxu3 %vm352_vm2, %v7928_v24 }
 0x40e   : > { %6221 = vmatmul.msk.f32.gmra.mxu0 %vm352_vm2, %v8406_v56  ;;  %6134 = vmatmul.msk.f32.gmra.mxu1 %vm352_vm2, %v7980_v4  ;;  %v4937_v4 = vld [vmem:[#allocation3 + $0xe8] sm:$0xff] }
 0x40f   : > { %v3521_v37 = vpop.f32.mrf.mxu2 }
 0x410   : > { %v3764_v10 = vpop.f32.mrf.mxu3  ;;  %v3522_v61 = vadd.f32 %v3521_v37, %v8326_v11  ;;  %v9350_v37 = vld [vmem:[#allocation10_spill] sm:$0xff] }
 0x412   : > { %v3816_v13 = vadd.f32 %v3764_v10, %v3522_v61  ;;  %v4940_v10 = vld [vmem:[#allocation3 + $0x110] sm:$0xff] }
 0x413   : > { %v4048_v27 = vpop.f32.mrf.mxu0 }
 0x414   : > { %6154 = vmatmul.msk.f32.gmra.mxu2 %vm352_vm2, %v7982_v48  ;;  %v8546_v24 = vadd.f32 %v4039_v26, %v3816_v13  ;;  %v8553_v56 = vpop.f32.mrf.mxu1 }
 0x415   : > { %6187 = vmatmul.msk.f32.gmra.mxu3 %vm352_vm2, %v7949_v57 }
 0x416   : > { %6222 = vmatmul.msk.f32.gmra.mxu0 %vm352_vm2, %v8425_v1  ;;  %6135 = vmatmul.msk.f32.gmra.mxu1 %vm352_vm2, %v8001_v40  ;;  %v4938_v40 = vld [vmem:[#allocation3 + $0xf0] sm:$0xff] }
 0x417   : > { %v3524_v51 = vpop.f32.mrf.mxu2 }
 0x418   : > { %v3767_v35 = vpop.f32.mrf.mxu3  ;;  %v3525_v11 = vadd.f32 %v3524_v51, %v8345_v25 }
 0x41a   : > { %v3817_v32 = vadd.f32 %v3767_v35, %v3525_v11  ;;  %v9351_v11 = vld [vmem:[#allocation15_spill] sm:$0xff] }
 0x41b   : > { %v4051_v57 = vpop.f32.mrf.mxu0 }
 0x41c   : > { %6155 = vmatmul.msk.f32.gmra.mxu2 %vm352_vm2, %v8003_v39  ;;  %v8559_v48 = vadd.f32 %v4042_v8, %v3817_v32  ;;  %v8565_v36 = vpop.f32.mrf.mxu1  ;;  %v9343_v39 = vld [vmem:[#allocation7_spill] sm:$0xff] }
 0x41d   : > { %6188 = vmatmul.msk.f32.gmra.mxu3 %vm352_vm2, %v7970_v14  ;;  %v9352_v32 = vld [vmem:[#allocation11_spill] sm:$0xff] }
 0x41e   : > { %6223 = vmatmul.msk.f32.gmra.mxu0 %vm352_vm2, %v4937_v4  ;;  %6136 = vmatmul.msk.f32.gmra.mxu1 %vm352_vm2, %v9344_v22  ;;  %v9354_v4 = vld [vmem:[#allocation14_spill] sm:$0xff] }
 0x41f   : > { %v3527_v1 = vpop.f32.mrf.mxu2 }
 0x420   : > { %v3770_v25 = vpop.f32.mrf.mxu3  ;;  %v3528_v23 = vadd.f32 %v3527_v1, %v8364_v30  ;;  %v4941_v1 = vld [vmem:[#allocation3 + $0x128] sm:$0xff] }
 0x422   : > { %v3818_v16 = vadd.f32 %v3770_v25, %v3528_v23 }
 0x423   : > { %v4054_v38 = vpop.f32.mrf.mxu0 }
 0x424   : > { %6156 = vmatmul.msk.f32.gmra.mxu2 %vm352_vm2, %v9343_v39  ;;  %v8571_v14 = vadd.f32 %v4045_v20, %v3818_v16  ;;  %v8577_v55 = vpop.f32.mrf.mxu1 }
 0x425   : > { %6189 = vmatmul.msk.f32.gmra.mxu3 %vm352_vm2, %v7991_v9  ;;  %v9346_v9 = vld [vmem:[#allocation5_spill] sm:$0xff] }
 0x426   : > { %6224 = vmatmul.msk.f32.gmra.mxu0 %vm352_vm2, %v4938_v40  ;;  %6137 = vmatmul.msk.f32.gmra.mxu1 %vm352_vm2, %v9347_v7  ;;  %v9355_v40 = vld [vmem:[#allocation16_spill] sm:$0xff] }
 0x427   : > { %v3530_v42 = vpop.f32.mrf.mxu2 }
 0x428   : > { %v3773_v30 = vpop.f32.mrf.mxu3  ;;  %v3531_v31 = vadd.f32 %v3530_v42, %v8383_v41  ;;  %v9356_v42 = vld [vmem:[#allocation12_spill] sm:$0xff] }
 0x42a   : > { %v3819_v49 = vadd.f32 %v3773_v30, %v3531_v31  ;;  %v9358_v30 = vld [vmem:[#allocation19_spill] sm:$0xff]  ;;  %v4942_v31 = vld [vmem:[#allocation3 + $0x130] sm:$0xff] }
 0x42b   : > { %v4057_v8 = vpop.f32.mrf.mxu0 }
 0x42c   : > { %6157 = vmatmul.msk.f32.gmra.mxu2 %vm352_vm2, %v9345_v21  ;;  %v8583_v26 = vadd.f32 %v4048_v27, %v3819_v49  ;;  %v8589_v19 = vpop.f32.mrf.mxu1 }
 0x42d   : > { %6190 = vmatmul.msk.f32.gmra.mxu3 %vm352_vm2, %v9346_v9 }
 0x42e   : > { %6225 = vmatmul.msk.f32.gmra.mxu0 %vm352_vm2, %v4939_v15  ;;  %6138 = vmatmul.msk.f32.gmra.mxu1 %vm352_vm2, %v9350_v37  ;;  %v9359_v15 = vld [vmem:[#allocation23_spill] sm:$0xff] }
 0x42f   : > { %v3533_v6 = vpop.f32.mrf.mxu2 }
 0x430   : > { %v3776_v58 = vpop.f32.mrf.mxu3  ;;  %v3534_v41 = vadd.f32 %v3533_v6, %v8402_v45  ;;  %v9360_v6 = vld [vmem:[#allocation17_spill] sm:$0xff] }
 0x432   : > { %v3820_v52 = vadd.f32 %v3776_v58, %v3534_v41  ;;  %v9362_v41 = vld [vmem:[#allocation18_spill] sm:$0xff] }
 0x433   : > { %v4060_v35 = vpop.f32.mrf.mxu0 }
 0x434   : > { %6158 = vmatmul.msk.f32.gmra.mxu2 %vm352_vm2, %v9348_v0  ;;  %v8595_v20 = vadd.f32 %v4051_v57, %v3820_v52  ;;  %v8601_v27 = vpop.f32.mrf.mxu1 }
 0x435   : > { %6191 = vmatmul.msk.f32.gmra.mxu3 %vm352_vm2, %v9349_v43 }
 0x436   : > { %6226 = vmatmul.msk.f32.gmra.mxu0 %vm352_vm2, %v4940_v10  ;;  %6139 = vmatmul.msk.f32.gmra.mxu1 %vm352_vm2, %v9354_v4 }
 0x437   : > { %v3536_v61 = vpop.f32.mrf.mxu2 }
 0x438   : > { %v3779_v45 = vpop.f32.mrf.mxu3  ;;  %v3537_v13 = vadd.f32 %v3536_v61, %v8421_v63  ;;  %v9363_v61 = vld [vmem:[#allocation22_spill] sm:$0xff] }
 0x43a   : > { %v3821_v51 = vadd.f32 %v3779_v45, %v3537_v13  ;;  %v9364_v45 = vld [vmem:[#allocation21_spill] sm:$0xff] }
 0x43b   : > { %v4063_v22 = vpop.f32.mrf.mxu0 }
 0x43c   : > { %6159 = vmatmul.msk.f32.gmra.mxu2 %vm352_vm2, %v9351_v11  ;;  %v8607_v57 = vadd.f32 %v4054_v38, %v3821_v51  ;;  %v8613_v16 = vpop.f32.mrf.mxu1  ;;  %v9366_v51 = vld [vmem:[#allocation25_spill] sm:$0xff] }
 0x43d   : > { %6192 = vmatmul.msk.f32.gmra.mxu3 %vm352_vm2, %v9352_v32 }
 0x43e   : > { %9353 = vst [vmem:[#allocation7_spill] sm:$0xff] %v8607_v57  ;;  %6227 = vmatmul.msk.f32.gmra.mxu0 %vm352_vm2, %v4941_v1  ;;  %6140 = vmatmul.msk.f32.gmra.mxu1 %vm352_vm2, %v9358_v30 }
 0x43f   : > { %v3539_v25 = vpop.f32.mrf.mxu2 }
 0x440   : > { %v3782_v63 = vpop.f32.mrf.mxu3  ;;  %v3540_v23 = vadd.f32 %v3539_v25, %v8438_v60 }
 0x442   : > { %v3822_v39 = vadd.f32 %v3782_v63, %v3540_v23  ;;  %v9367_v63 = vld [vmem:[#allocation26_spill] sm:$0xff]  ;;  %v9368_v23 = vld [vmem:[#allocation20_spill] sm:$0xff] }
 0x443   : > { %v4066_v52 = vpop.f32.mrf.mxu0 }
 0x444   : > { %6160 = vmatmul.msk.f32.gmra.mxu2 %vm352_vm2, %v9355_v40  ;;  %v8619_v38 = vadd.f32 %v4057_v8, %v3822_v39  ;;  %v8625_v9 = vpop.f32.mrf.mxu1  ;;  %v4943_v8 = vld [vmem:[#allocation3 + $0x148] sm:$0xff] }
 0x445   : > { %6193 = vmatmul.msk.f32.gmra.mxu3 %vm352_vm2, %v9356_v42  ;;  %v4945_v40 = vld [vmem:[#allocation3 + $0x168] sm:$0xff]  ;;  %v9371_v42 = vld [vmem:[#allocation27_spill] sm:$0xff] }
 0x446   : > { %9357 = vst [vmem:[#allocation4_spill] sm:$0xff] %v8619_v38  ;;  %6228 = vmatmul.msk.f32.gmra.mxu0 %vm352_vm2, %v4942_v31  ;;  %6141 = vmatmul.msk.f32.gmra.mxu1 %vm352_vm2, %v9362_v41  ;;  %v4344_v30 = vadd.f32 %v8488_v33, %v9371_v42  ;;  %v9373_v41 = vld [vmem:[#allocation24_spill] sm:$0xff]  ;;  %v4946_v33 = vld [vmem:[#allocation3 + $0x170] sm:$0xff] }
 0x447   : > { %v3542_v49 = vpop.f32.mrf.mxu2 }
 0x448   : > { %v3785_v60 = vpop.f32.mrf.mxu3  ;;  %v3543_v21 = vadd.f32 %v3542_v49, %v8452_v28 }
 0x44a   : > { %v3823_v7 = vadd.f32 %v3785_v60, %v3543_v21 }
 0x44c   : > { %6161 = vmatmul.msk.f32.gmra.mxu2 %vm352_vm2, %v9359_v15  ;;  %v8631_v58 = vadd.f32 %v4060_v35, %v3823_v7  ;;  %v8637_v37 = vpop.f32.mrf.mxu1  ;;  %v4944_v35 = vld [vmem:[#allocation3 + $0x150] sm:$0xff]  ;;  %v8664_v15 = vld [vmem:[#allocation3 + $0x208] sm:$0xff] }
 0x44d   : > { %6194 = vmatmul.msk.f32.gmra.mxu3 %vm352_vm2, %v9360_v6  ;;  %v9372_v6 = vld [vmem:[#allocation33_spill] sm:$0xff] }
 0x44e   : > { %9361 = vst [vmem:[#allocation8_spill] sm:$0xff] %v8631_v58  ;;  %6229 = vmatmul.msk.f32.gmra.mxu0 %vm352_vm2, %v4943_v8  ;;  %6142 = vmatmul.msk.f32.gmra.mxu1 %vm352_vm2, %v9366_v51  ;;  %v8679_v51 = vld [vmem:[#allocation3 + $0x210] sm:$0xff] }
 0x44f   : > { %v3545_v0 = vpop.f32.mrf.mxu2  ;;  %v5222_v58 = vld [vmem:[#allocation3 + $0x189] sm:$0xff] }
 0x450   : > { %v3788_v28 = vpop.f32.mrf.mxu3  ;;  %v3546_v43 = vadd.f32 %v3545_v0, %v8464_v53  ;;  %v5074_v53 = vpop.f32.mrf.mxu0 }
 0x452   : > { %v3824_v10 = vadd.f32 %v3788_v28, %v3546_v43 }
 0x454   : > { %6162 = vmatmul.msk.f32.gmra.mxu2 %vm352_vm2, %v9363_v61  ;;  %v8643_v13 = vadd.f32 %v4063_v22, %v3824_v10  ;;  %v8649_v1 = vpop.f32.mrf.mxu1  ;;  %v9370_v22 = vld [vmem:[#allocation29_spill] sm:$0xff] }
 0x455   : > { %6195 = vmatmul.msk.f32.gmra.mxu3 %vm352_vm2, %v9364_v45 }
 0x456   : > { %9365 = vst [vmem:[#allocation5_spill] sm:$0xff] %v8643_v13  ;;  %6230 = vmatmul.msk.f32.gmra.mxu0 %vm352_vm2, %v4944_v35  ;;  %6143 = vmatmul.msk.f32.gmra.mxu1 %vm352_vm2, %v9370_v22 }
 0x457   : > { %v3548_v11 = vpop.f32.mrf.mxu2 }
 0x458   : > { %v3791_v32 = vpop.f32.mrf.mxu3  ;;  %v3549_v4 = vadd.f32 %v3548_v11, %v8476_v29  ;;  %v5077_v21 = vpop.f32.mrf.mxu0  ;;  %v9375_v11 = vld [vmem:[#allocation32_spill] sm:$0xff] }
 0x45a   : > { %v3825_v25 = vadd.f32 %v3791_v32, %v3549_v4  ;;  %v9376_v32 = vld [vmem:[#allocation28_spill] sm:$0xff]  ;;  %v9377_v4 = vld [vmem:[#allocation30_spill] sm:$0xff] }
 0x45c   : > { %6163 = vmatmul.msk.f32.gmra.mxu2 %vm352_vm2, %v9367_v63  ;;  %v8655_v39 = vadd.f32 %v4066_v52, %v3825_v25  ;;  %v8662_v60 = vpop.f32.mrf.mxu1  ;;  %v9374_v52 = vld [vmem:[#allocation31_spill] sm:$0xff]  ;;  %v4346_v25 = vadd.f32 %v8514_v3, %v9377_v4  ;;  %v4948_v3 = vld [vmem:[#allocation3 + $0x190] sm:$0xff] }
 0x45d   : > { %6196 = vmatmul.msk.f32.gmra.mxu3 %vm352_vm2, %v9368_v23  ;;  %v4345_v0 = vadd.f32 %v8501_v50, %v9374_v52  ;;  %v4947_v50 = vld [vmem:[#allocation3 + $0x188] sm:$0xff] }
 0x45e   : > { %9369 = vst [vmem:[#allocation9_spill] sm:$0xff] %v8655_v39  ;;  %6231 = vmatmul.msk.f32.gmra.mxu0 %vm352_vm2, %v4945_v40  ;;  %6144 = vmatmul.msk.f32.gmra.mxu1 %vm352_vm2, %v8664_v15 }
 0x45f   : > { %v4523_v29 = vpop.f32.mrf.mxu2 }
 0x460   : > { %v4799_v31 = vpop.f32.mrf.mxu3  ;;  %v4619_v49 = vadd.f32 %v4523_v29, %v4344_v30  ;;  %v5080_v35 = vpop.f32.mrf.mxu0  ;;  %v5202_v30 = vld [vmem:[#allocation3 + $0x49] sm:$0xff]  ;;  %v9378_v29 = vld [vmem:[#allocation39_spill] sm:$0xff] }
 0x462   : > { %v4895_v7 = vadd.f32 %v4799_v31, %v4619_v49  ;;  %v9379_v31 = vld [vmem:[#allocation35_spill] sm:$0xff] }
 0x464   : > { %6164 = vmatmul.msk.f32.gmra.mxu2 %vm352_vm2, %v9372_v6  ;;  %v8670_v8 = vadd.f32 %v5074_v53, %v4895_v7  ;;  %v8677_v61 = vpop.f32.mrf.mxu1 }
 0x465   : > { %6197 = vmatmul.msk.f32.gmra.mxu3 %vm352_vm2, %v9373_v41 }
 0x466   : > { %6232 = vmatmul.msk.f32.gmra.mxu0 %vm352_vm2, %v4946_v33  ;;  %6145 = vmatmul.msk.f32.gmra.mxu1 %vm352_vm2, %v8679_v51 }
 0x467   : > { %v4526_v28 = vpop.f32.mrf.mxu2 }
 0x468   : > { %v4802_v43 = vpop.f32.mrf.mxu3  ;;  %v4620_v10 = vadd.f32 %v4526_v28, %v4345_v0  ;;  %v5083_v6 = vpop.f32.mrf.mxu0 }
 0x46a   : > { %v4896_v45 = vadd.f32 %v4802_v43, %v4620_v10  ;;  %v5203_v43 = vld [vmem:[#allocation3 + $0x51] sm:$0xff] }
 0x46b   : > { %v9381_v10 = vld [vmem:[#allocation38_spill] sm:$0xff] }
 0x46c   : > { %6165 = vmatmul.msk.f32.gmra.mxu2 %vm352_vm2, %v9375_v11  ;;  %v8685_v53 = vadd.f32 %v5077_v21, %v4896_v45  ;;  %v8692_v40 = vpop.f32.mrf.mxu1  ;;  %v9380_v21 = vld [vmem:[#allocation37_spill] sm:$0xff]  ;;  %v9382_v45 = vld [vmem:[#allocation34_spill] sm:$0xff]  ;;  %v9383_v11 = vld [vmem:[#allocation36_spill] sm:$0xff] }
 0x46d   : > { %6198 = vmatmul.msk.f32.gmra.mxu3 %vm352_vm2, %v9376_v32  ;;  %v4347_v7 = vadd.f32 %v8527_v17, %v9380_v21  ;;  %v4949_v17 = vld [vmem:[#allocation3 + $0x1a8] sm:$0xff]  ;;  %v4348_v32 = vadd.f32 %v8540_v44, %v9383_v11  ;;  %v4950_v44 = vld [vmem:[#allocation3 + $0x1b0] sm:$0xff]  ;;  %v9389_v11 = vld [vmem:[#allocation44_spill] sm:$0xff] }
 0x46e   : > { %6233 = vmatmul.msk.f32.gmra.mxu0 %vm352_vm2, %v4947_v50  ;;  %6246 = vmatmul.msk.f32.vlgmr.msra.gmra.mxu1 %vm352_vm2, %v5202_v30  ;;  %v9384_v30 = vld [vmem:[#allocation43_spill] sm:$0xff] }
 0x46f   : > { %v4529_v63 = vpop.f32.mrf.mxu2 }
 0x470   : > { %v4805_v23 = vpop.f32.mrf.mxu3  ;;  %v4621_v22 = vadd.f32 %v4529_v63, %v4346_v25  ;;  %v5086_v63 = vpop.f32.mrf.mxu0 }
 0x472   : > { %v4897_v42 = vadd.f32 %v4805_v23, %v4621_v22 }
 0x474   : > { %6166 = vmatmul.msk.f32.gmra.mxu2 %vm352_vm2, %v9378_v29  ;;  %v8698_v49 = vadd.f32 %v5080_v35, %v4897_v42  ;;  %v8704_v0 = vpop.f32.mrf.mxu1  ;;  %v5204_v42 = vld [vmem:[#allocation3 + $0x69] sm:$0xff] }
 0x475   : > { %6199 = vmatmul.msk.f32.gmra.mxu3 %vm352_vm2, %v9379_v31  ;;  %v9385_v29 = vld [vmem:[#allocation41_spill] sm:$0xff] }
 0x476   : > { %6234 = vmatmul.msk.f32.gmra.mxu0 %vm352_vm2, %v4948_v3  ;;  %6247 = vmatmul.msk.f32.gmra.mxu1 %vm352_vm2, %v5203_v43  ;;  %v9386_v3 = vld [vmem:[#allocation40_spill] sm:$0xff]  ;;  %v5205_v43 = vld [vmem:[#allocation3 + $0x71] sm:$0xff] }
 0x477   : > { %v4532_v41 = vpop.f32.mrf.mxu2  ;;  %v4349_v21 = vadd.f32 %v8553_v56, %v9386_v3  ;;  %v4951_v56 = vld [vmem:[#allocation3 + $0x1c8] sm:$0xff] }
 0x478   : > { %v4808_v33 = vpop.f32.mrf.mxu3  ;;  %v4622_v52 = vadd.f32 %v4532_v41, %v4347_v7 }
 0x47a   : > { %v4898_v28 = vadd.f32 %v4808_v33, %v4622_v52 }
 0x47c   : > { %6167 = vmatmul.msk.f32.gmra.mxu2 %vm352_vm2, %v9381_v10  ;;  %v8710_v35 = vadd.f32 %v5083_v6, %v4898_v28  ;;  %v8716_v23 = vpop.f32.mrf.mxu1  ;;  %v5089_v28 = vpop.f32.mrf.mxu0  ;;  %v9387_v10 = vld [vmem:[#allocation46_spill] sm:$0xff] }
 0x47d   : > { %6200 = vmatmul.msk.f32.gmra.mxu3 %vm352_vm2, %v9382_v45  ;;  %v9388_v45 = vld [vmem:[#allocation42_spill] sm:$0xff] }
 0x47e   : > { %6235 = vmatmul.msk.f32.gmra.mxu0 %vm352_vm2, %v4949_v17  ;;  %6248 = vmatmul.msk.f32.gmra.mxu1 %vm352_vm2, %v5204_v42  ;;  %v5206_v42 = vld [vmem:[#allocation3 + $0x89] sm:$0xff] }
 0x47f   : > { %v4535_v50 = vpop.f32.mrf.mxu2 }
 0x480   : > { %v4811_v4 = vpop.f32.mrf.mxu3  ;;  %v4623_v25 = vadd.f32 %v4535_v50, %v4348_v32  ;;  %v4350_v32 = vadd.f32 %v8565_v36, %v9389_v11  ;;  %v9392_v36 = vld [vmem:[#allocation47_spill] sm:$0xff] }
 0x481   : > { %v4351_v3 = vadd.f32 %v8577_v55, %v9392_v36  ;;  %v9395_v11 = vld [vmem:[#allocation55_spill] sm:$0xff]  ;;  %v9399_v36 = vld [vmem:[#allocation60_spill] sm:$0xff] }
 0x482   : > { %v4899_v22 = vadd.f32 %v4811_v4, %v4623_v25 }
 0x484   : > { %6168 = vmatmul.msk.f32.gmra.mxu2 %vm352_vm2, %v9384_v30  ;;  %v8722_v31 = vadd.f32 %v5086_v63, %v4899_v22  ;;  %v8728_v33 = vpop.f32.mrf.mxu1  ;;  %v9390_v30 = vld [vmem:[#allocation49_spill] sm:$0xff] }
 0x485   : > { %6201 = vmatmul.msk.f32.gmra.mxu3 %vm352_vm2, %v9385_v29  ;;  %v9391_v29 = vld [vmem:[#allocation45_spill] sm:$0xff] }
 0x486   : > { %6236 = vmatmul.msk.f32.gmra.mxu0 %vm352_vm2, %v4950_v44  ;;  %6249 = vmatmul.msk.f32.gmra.mxu1 %vm352_vm2, %v5205_v43  ;;  %v4952_v44 = vld [vmem:[#allocation3 + $0x1d0] sm:$0xff]  ;;  %v9393_v43 = vld [vmem:[#allocation52_spill] sm:$0xff] }
 0x487   : > { %v4538_v7 = vpop.f32.mrf.mxu2 }
 0x488   : > { %v4814_v6 = vpop.f32.mrf.mxu3  ;;  %v4624_v41 = vadd.f32 %v4538_v7, %v4349_v21 }
 0x48a   : > { %v4900_v52 = vadd.f32 %v4814_v6, %v4624_v41 }
 0x48c   : > { %6169 = vmatmul.msk.f32.gmra.mxu2 %vm352_vm2, %v9387_v10  ;;  %v8734_v17 = vadd.f32 %v5089_v28, %v4900_v52  ;;  %v8740_v63 = vpop.f32.mrf.mxu1  ;;  %v5207_v28 = vld [vmem:[#allocation3 + $0x91] sm:$0xff]  ;;  %v9394_v10 = vld [vmem:[#allocation48_spill] sm:$0xff] }
 0x48d   : > { %6202 = vmatmul.msk.f32.gmra.mxu3 %vm352_vm2, %v9388_v45  ;;  %v4953_v45 = vld [vmem:[#allocation3 + $0x1e8] sm:$0xff] }
 0x48e   : > { %6237 = vmatmul.msk.f32.gmra.mxu0 %vm352_vm2, %v4951_v56  ;;  %6250 = vmatmul.msk.f32.gmra.mxu1 %vm352_vm2, %v5206_v42  ;;  %v5208_v56 = vld [vmem:[#allocation3 + $0xa9] sm:$0xff] }
 0x48f   : > { %v4541_v50 = vpop.f32.mrf.mxu2  ;;  %v9397_v42 = vld [vmem:[#allocation57_spill] sm:$0xff] }
 0x490   : > { %v4817_v4 = vpop.f32.mrf.mxu3  ;;  %v4625_v25 = vadd.f32 %v4541_v50, %v4350_v32  ;;  %v9396_v32 = vld [vmem:[#allocation51_spill] sm:$0xff]  ;;  %v4954_v50 = vld [vmem:[#allocation3 + $0x1f0] sm:$0xff] }
 0x492   : > { %v8742_v22 = vadd.f32 %v4817_v4, %v4625_v25  ;;  %v5209_v25 = vld [vmem:[#allocation3 + $0xb1] sm:$0xff] }
 0x494   : > { %6170 = vmatmul.msk.f32.gmra.mxu2 %vm352_vm2, %v9390_v30  ;;  %v8752_v41 = vpop.f32.mrf.mxu1  ;;  %v9398_v30 = vld [vmem:[#allocation54_spill] sm:$0xff] }
 0x495   : > { %6203 = vmatmul.msk.f32.gmra.mxu3 %vm352_vm2, %v9391_v29 }
 0x496   : > { %6238 = vmatmul.msk.f32.gmra.mxu0 %vm352_vm2, %v4952_v44  ;;  %6251 = vmatmul.msk.f32.gmra.mxu1 %vm352_vm2, %v5207_v28  ;;  %v5210_v44 = vld [vmem:[#allocation3 + $0xc9] sm:$0xff]  ;;  %v8797_v28 = vpop.f32.mrf.mxu0 }
 0x497   : > { %v4544_v21 = vpop.f32.mrf.mxu2 }
 0x498   : > { %v4626_v7 = vadd.f32 %v4544_v21, %v4351_v3  ;;  %v4820_v6 = vpop.f32.mrf.mxu3  ;;  %v5211_v21 = vld [vmem:[#allocation3 + $0xd1] sm:$0xff] }
 0x49a   : > { %v8754_v52 = vadd.f32 %v4820_v6, %v4626_v7  ;;  %v9400_v7 = vld [vmem:[#allocation63_spill] sm:$0xff] }
 0x49c   : > { %6171 = vmatmul.msk.f32.gmra.mxu2 %vm352_vm2, %v9393_v43  ;;  %v8762_v55 = vpop.f32.mrf.mxu1  ;;  %v4957_v43 = vld [vmem:[#allocation3 + $0x228] sm:$0xff] }
 0x49d   : > { %6204 = vmatmul.msk.f32.gmra.mxu3 %vm352_vm2, %v9394_v10  ;;  %v4682_v10 = vld [vmem:[#allocation3 + $0x227] sm:$0xff] }
 0x49e   : > { %6239 = vmatmul.msk.f32.gmra.mxu0 %vm352_vm2, %v4953_v45  ;;  %6252 = vmatmul.msk.f32.gmra.mxu1 %vm352_vm2, %v5208_v56  ;;  %v8807_v56 = vld [vmem:[#allocation3 + $0x209] sm:$0xff] }
 0x4a4   : > { %6172 = vmatmul.msk.f32.gmra.mxu2 %vm352_vm2, %v9395_v11  ;;  %v8770_v4 = vpop.f32.mrf.mxu1  ;;  %v5213_v11 = vld [vmem:[#allocation3 + $0xf1] sm:$0xff] }
 0x4a5   : > { %6205 = vmatmul.msk.f32.gmra.mxu3 %vm352_vm2, %v9396_v32  ;;  %v8813_v32 = vpop.f32.mrf.mxu0 }
 0x4a6   : > { %6240 = vmatmul.msk.f32.gmra.mxu0 %vm352_vm2, %v4954_v50  ;;  %6253 = vmatmul.msk.f32.gmra.mxu1 %vm352_vm2, %v5209_v25  ;;  %v4683_v50 = vld [vmem:[#allocation3 + $0x22f] sm:$0xff] }
 0x4ac   : > { %6173 = vmatmul.msk.f32.gmra.mxu2 %vm352_vm2, %v9397_v42  ;;  %v8779_v29 = vpop.f32.mrf.mxu1  ;;  %v8818_v42 = vld [vmem:[#allocation3 + $0x211] sm:$0xff] }
 0x4ad   : > { %6206 = vmatmul.msk.f32.gmra.mxu3 %vm352_vm2, %v9398_v30  ;;  %v5214_v30 = vld [vmem:[#allocation3 + $0x109] sm:$0xff] }
 0x4ae   : > { %6241 = vmatmul.msk.f32.gmra.mxu0 %vm352_vm2, %v8664_v15  ;;  %6254 = vmatmul.msk.f32.gmra.mxu1 %vm352_vm2, %v5210_v44  ;;  %v9401_v15 = vld [vmem:[#allocation59_spill] sm:$0xff] }
 0x4b4   : > { %6174 = vmatmul.msk.f32.gmra.mxu2 %vm352_vm2, %v9399_v36  ;;  %v8788_v3 = vpop.f32.mrf.mxu1  ;;  %v5215_v36 = vld [vmem:[#allocation3 + $0x111] sm:$0xff] }
 0x4b5   : > { %6207 = vmatmul.msk.f32.gmra.mxu3 %vm352_vm2, %v8378_v2  ;;  %v5212_v2 = vld [vmem:[#allocation3 + $0xe9] sm:$0xff] }
 0x4b6   : > { %6242 = vmatmul.msk.f32.gmra.mxu0 %vm352_vm2, %v8679_v51  ;;  %6255 = vmatmul.msk.f32.gmra.mxu1 %vm352_vm2, %v5211_v21  ;;  %v9402_v51 = vld [vmem:[#allocation62_spill] sm:$0xff] }
 0x4bc   : > { %6175 = vmatmul.msk.f32.gmra.mxu2 %vm352_vm2, %v9400_v7  ;;  %v8795_v6 = vpop.f32.mrf.mxu1  ;;  %v5216_v7 = vld [vmem:[#allocation3 + $0x129] sm:$0xff] }
 0x4bd   : > { %6208 = vmatmul.msk.f32.gmra.mxu3 %vm352_vm2, %v9401_v15 }
 0x4be   : > { %6256 = vmatmul.msk.f32.gmra.mxu1 %vm352_vm2, %v5212_v2  ;;  %6243 = vmatmul.msk.f32.gmra.mxu0 %vm352_vm2, %v4957_v43  ;;  %v5217_v2 = vld [vmem:[#allocation3 + $0x131] sm:$0xff] }
 0x4c4   : > { %6176 = vmatmul.msk.f32.gmra.mxu2 %vm352_vm2, %v8440_v54  ;;  %v8805_v45 = vpop.f32.mrf.mxu1  ;;  %v4958_v54 = vld [vmem:[#allocation3 + $0x230] sm:$0xff] }
 0x4c5   : > { %6209 = vmatmul.msk.f32.gmra.mxu3 %vm352_vm2, %v9402_v51  ;;  %9403 = vst [vmem:[#allocation13_spill] sm:$0xff] %v8805_v45  ;;  %v8836_v51 = vld [vmem:[%s9122_s5] ss:$0 sm:$0xff]  ;;  %v9408_v45 = vld [vmem:[#allocation50_spill] sm:$0xff] }
 0x4c6   : > { %6257 = vmatmul.msk.f32.gmra.mxu1 %vm352_vm2, %v5213_v11  ;;  %6244 = vmatmul.msk.f32.gmra.mxu0 %vm352_vm2, %v4958_v54  ;;  %v8842_v11 = vld [vmem:[%s9123_s6] ss:$0 sm:$0xff]  ;;  %v5218_v54 = vld [vmem:[#allocation3 + $0x149] sm:$0xff] }
 0x4cc   : > { %6177 = vmatmul.msk.f32.gmra.mxu2 %vm352_vm2, %v8807_v56  ;;  %v8816_v25 = vpop.f32.mrf.mxu1 }
 0x4cd   : > { %6210 = vmatmul.msk.f32.gmra.mxu3 %vm352_vm2, %v4682_v10  ;;  %9404 = vst [vmem:[#allocation6_spill] sm:$0xff] %v8816_v25 }
 0x4ce   : > { %6258 = vmatmul.msk.f32.gmra.mxu1 %vm352_vm2, %v5214_v30 }
 0x4d4   : > { %6178 = vmatmul.msk.f32.gmra.mxu2 %vm352_vm2, %v8818_v42  ;;  %v8824_v44 = vpop.f32.mrf.mxu1 }
 0x4d5   : > { %6211 = vmatmul.msk.f32.gmra.mxu3 %vm352_vm2, %v4683_v50  ;;  %9405 = vst [vmem:[#allocation10_spill] sm:$0xff] %v8824_v44 }
 0x4d6   : > { %6259 = vmatmul.msk.f32.gmra.mxu1 %vm352_vm2, %v5215_v36  ;;  %v8847_v36 = vpop.f32.mrf.mxu2 }
 0x4dc   : > { %v8827_v21 = vpop.f32.mrf.mxu1 }
 0x4dd   : > { %9406 = vst [vmem:[#allocation15_spill] sm:$0xff] %v8827_v21 }
 0x4de   : > { %6260 = vmatmul.msk.f32.gmra.mxu1 %vm352_vm2, %v5216_v7  ;;  %v8866_v21 = vpop.f32.mrf.mxu2 }
 0x4e4   : > { %v8830_v15 = vpop.f32.mrf.mxu1 }
 0x4e5   : > { %9407 = vst [vmem:[#allocation11_spill] sm:$0xff] %v8830_v15  ;;  %v8864_v15 = vpop.f32.mrf.mxu0 }
 0x4e6   : > { %6261 = vmatmul.msk.f32.gmra.mxu1 %vm352_vm2, %v5217_v2  ;;  %v8881_v44 = vpop.f32.mrf.mxu2 }
 0x4ec   : > { %v5349_v43 = vpop.f32.mrf.mxu1 }
 0x4ed   : > { %v5445_v10 = vadd.f32 %v5349_v43, %v8670_v8  ;;  %v5219_v43 = vld [vmem:[#allocation3 + $0x151] sm:$0xff] }
 0x4ee   : > { %6262 = vmatmul.msk.f32.gmra.mxu1 %vm352_vm2, %v5218_v54  ;;  %v8861_v54 = vpop.f32.mrf.mxu3 }
 0x4ef   : > { %v5481_v50 = vmul.f32 %v8836_v51, %v5445_v10 }
 0x4f1   : > { %v5517_v30 = vadd.f32 %v8842_v11, %v5481_v50 }
 0x4f3   : > { %v5549_v8 = vmax.f32 %v5517_v30, 0.0 }
 0x4f4   : > { %v5352_v7 = vpop.f32.mrf.mxu1 }
 0x4f5   : > { %5581 = vst.msk [vmem:[%s8854_s17] sm:$0xff] %vm352_vm2, %v5549_v8  ;;  %v5446_v2 = vadd.f32 %v5352_v7, %v8685_v53  ;;  %v5220_v8 = vld [vmem:[#allocation3 + $0x169] sm:$0xff] }
 0x4f6   : > { %6263 = vmatmul.msk.f32.gmra.mxu1 %vm352_vm2, %v5219_v43  ;;  %v8874_v43 = vpop.f32.mrf.mxu3 }
 0x4f7   : > { %v5482_v10 = vmul.f32 %v8836_v51, %v5446_v2 }
 0x4f9   : > { %v5518_v50 = vadd.f32 %v8842_v11, %v5482_v10 }
 0x4fb   : > { %v5550_v39 = vmax.f32 %v5518_v50, 0.0  ;;  %v8876_v50 = vpop.f32.mrf.mxu0 }
 0x4fc   : > { %v5355_v30 = vpop.f32.mrf.mxu1 }
 0x4fd   : > { %5582 = vst.msk [vmem:[%s8854_s17 + $0x8] sm:$0xff] %vm352_vm2, %v5550_v39  ;;  %v5447_v53 = vadd.f32 %v5355_v30, %v8698_v49  ;;  %v5221_v49 = vld [vmem:[#allocation3 + $0x171] sm:$0xff] }
 0x4fe   : > { %6264 = vmatmul.msk.f32.gmra.mxu1 %vm352_vm2, %v5220_v8 }
 0x4ff   : > { %v5483_v7 = vmul.f32 %v8836_v51, %v5447_v53 }
 0x501   : > { %v5519_v2 = vadd.f32 %v8842_v11, %v5483_v7  ;;  %v8886_v7 = vpop.f32.mrf.mxu3 }
 0x503   : > { %v5551_v10 = vmax.f32 %v5519_v2, 0.0 }
 0x504   : > { %v5358_v13 = vpop.f32.mrf.mxu1 }
 0x505   : > { %5583 = vst.msk [vmem:[%s8854_s17 + $0x10] sm:$0xff] %vm352_vm2, %v5551_v10  ;;  %v5448_v39 = vadd.f32 %v5358_v13, %v8710_v35  ;;  %v8891_v13 = vpop.f32.mrf.mxu0 }
 0x506   : > { %6265 = vmatmul.msk.f32.gmra.mxu1 %vm352_vm2, %v5221_v49 }
 0x507   : > { %v5484_v30 = vmul.f32 %v8836_v51, %v5448_v39  ;;  %v8895_v39 = vpop.f32.mrf.mxu2 }
 0x509   : > { %v5520_v53 = vadd.f32 %v8842_v11, %v5484_v30  ;;  %v8901_v25 = vpop.f32.mrf.mxu3 }
 0x50b   : > { %v5552_v8 = vmax.f32 %v5520_v53, 0.0 }
 0x50c   : > { %v5361_v2 = vpop.f32.mrf.mxu1 }
 0x50d   : > { %5584 = vst.msk [vmem:[%s8854_s17 + $0x18] sm:$0xff] %vm352_vm2, %v5552_v8  ;;  %v5449_v10 = vadd.f32 %v5361_v2, %v8722_v31  ;;  %v5223_v31 = vld [vmem:[#allocation3 + $0x191] sm:$0xff] }
 0x50e   : > { %6266 = vmatmul.msk.f32.gmra.mxu1 %vm352_vm2, %v5222_v58 }
 0x50f   : > { %v5485_v35 = vmul.f32 %v8836_v51, %v5449_v10  ;;  %v8905_v10 = vpop.f32.mrf.mxu0  ;;  %v8908_v38 = vpop.f32.mrf.mxu2 }
 0x511   : > { %v5521_v49 = vadd.f32 %v8842_v11, %v5485_v35 }
 0x513   : > { %v5553_v30 = vmax.f32 %v5521_v49, 0.0  ;;  %v5176_v49 = vadd.f32 %v8797_v28, %v8742_v22 }
 0x514   : > { %v5364_v53 = vpop.f32.mrf.mxu1 }
 0x515   : > { %5585 = vst.msk [vmem:[%s8854_s17 + $0x20] sm:$0xff] %vm352_vm2, %v5553_v30  ;;  %v5450_v8 = vadd.f32 %v5364_v53, %v8734_v17  ;;  %v5224_v53 = vld [vmem:[#allocation3 + $0x1a9] sm:$0xff] }
 0x516   : > { %6267 = vmatmul.msk.f32.gmra.mxu1 %vm352_vm2, %v5223_v31  ;;  %v8916_v31 = vpop.f32.mrf.mxu3 }
 0x517   : > { %v5486_v2 = vmul.f32 %v8836_v51, %v5450_v8  ;;  %v8922_v22 = vpop.f32.mrf.mxu0 }
 0x519   : > { %v5522_v58 = vadd.f32 %v8842_v11, %v5486_v2  ;;  %v4352_v2 = vadd.f32 %v8589_v19, %v9408_v45 }
 0x51b   : > { %v5554_v35 = vmax.f32 %v5522_v58, 0.0  ;;  %v4627_v57 = vadd.f32 %v8847_v36, %v4352_v2  ;;  %v9409_v36 = vld [vmem:[#allocation53_spill] sm:$0xff] }
 0x51c   : > { %v5367_v30 = vpop.f32.mrf.mxu1 }
 0x51d   : > { %5586 = vst.msk [vmem:[%s8854_s17 + $0x28] sm:$0xff] %vm352_vm2, %v5554_v35  ;;  %v5451_v17 = vadd.f32 %v5367_v30, %v5176_v49  ;;  %v5177_v35 = vadd.f32 %v8813_v32, %v8754_v52  ;;  %v8926_v49 = vpop.f32.mrf.mxu2  ;;  %v4903_v19 = vadd.f32 %v8861_v54, %v4627_v57 }
 0x51e   : > { %6268 = vmatmul.msk.f32.gmra.mxu1 %vm352_vm2, %v5224_v53  ;;  %v5225_v53 = vld [vmem:[#allocation3 + $0x1b1] sm:$0xff]  ;;  %v8936_v52 = vpop.f32.mrf.mxu3 }
 0x51f   : > { %v5487_v8 = vmul.f32 %v8836_v51, %v5451_v17 }
 0x521   : > { %v5523_v58 = vadd.f32 %v8842_v11, %v5487_v8  ;;  %v4353_v8 = vadd.f32 %v8601_v27, %v9409_v36 }
 0x523   : > { %v5555_v28 = vmax.f32 %v5523_v58, 0.0  ;;  %v4628_v32 = vadd.f32 %v8866_v21, %v4353_v8  ;;  %v9410_v21 = vld [vmem:[#allocation56_spill] sm:$0xff] }
 0x524   : > { %v5370_v30 = vpop.f32.mrf.mxu1 }
 0x525   : > { %5587 = vst.msk [vmem:[%s8854_s17 + $0x30] sm:$0xff] %vm352_vm2, %v5555_v28  ;;  %v5452_v17 = vadd.f32 %v5370_v30, %v5177_v35  ;;  %v5178_v28 = vadd.f32 %v8864_v15, %v4903_v19  ;;  %v8940_v30 = vpop.f32.mrf.mxu0  ;;  %v8944_v54 = vpop.f32.mrf.mxu2  ;;  %v4904_v27 = vadd.f32 %v8874_v43, %v4628_v32  ;;  %v5227_v32 = vld [vmem:[#allocation3 + $0x1d1] sm:$0xff] }
 0x526   : > { %6269 = vmatmul.msk.f32.gmra.mxu1 %vm352_vm2, %v5225_v53 }
 0x527   : > { %v5488_v45 = vmul.f32 %v8836_v51, %v5452_v17  ;;  %v5226_v17 = vld [vmem:[#allocation3 + $0x1c9] sm:$0xff]  ;;  %v5179_v8 = vadd.f32 %v8876_v50, %v4904_v27 }
 0x529   : > { %v5524_v2 = vadd.f32 %v8842_v11, %v5488_v45  ;;  %v4354_v45 = vadd.f32 %v8613_v16, %v9410_v21 }
 0x52b   : > { %v5556_v58 = vmax.f32 %v5524_v2, 0.0  ;;  %v4629_v19 = vadd.f32 %v8881_v44, %v4354_v45  ;;  %v4841_v2 = vpop.f32.mrf.mxu3  ;;  %v9411_v44 = vld [vmem:[#allocation58_spill] sm:$0xff] }
 0x52c   : > { %v5373_v35 = vpop.f32.mrf.mxu1 }
 0x52d   : > { %5588 = vst.msk [vmem:[%s8854_s17 + $0x38] sm:$0xff] %vm352_vm2, %v5556_v58  ;;  %v5453_v57 = vadd.f32 %v5373_v35, %v5178_v28  ;;  %v4905_v28 = vadd.f32 %v8886_v7, %v4629_v19  ;;  %v8957_v35 = vpop.f32.mrf.mxu0  ;;  %v5228_v19 = vld [vmem:[#allocation3 + $0x1e9] sm:$0xff] }
 0x52e   : > { %6270 = vmatmul.msk.f32.gmra.mxu1 %vm352_vm2, %v5226_v17  ;;  %v4355_v17 = vadd.f32 %v8625_v9, %v9411_v44  ;;  %v9412_v9 = vld [vmem:[#allocation61_spill] sm:$0xff] }
 0x52f   : > { %v5489_v53 = vmul.f32 %v8836_v51, %v5453_v57  ;;  %v4568_v57 = vpop.f32.mrf.mxu2  ;;  %v5180_v21 = vadd.f32 %v8891_v13, %v4905_v28 }
 0x530   : > { %v4630_v27 = vadd.f32 %v8895_v39, %v4355_v17  ;;  %v5229_v17 = vld [vmem:[#allocation3 + $0x1f1] sm:$0xff] }
 0x531   : > { %v5525_v15 = vadd.f32 %v8842_v11, %v5489_v53 }
 0x533   : > { %v5557_v36 = vmax.f32 %v5525_v15, 0.0  ;;  %v4844_v15 = vpop.f32.mrf.mxu3 }
 0x534   : > { %v5376_v58 = vpop.f32.mrf.mxu1 }
 0x535   : > { %5589 = vst.msk [vmem:[%s8854_s17 + $0x40] sm:$0xff] %vm352_vm2, %v5557_v36  ;;  %v5454_v43 = vadd.f32 %v5376_v58, %v5179_v8  ;;  %v4906_v36 = vadd.f32 %v8901_v25, %v4630_v27  ;;  %v4356_v58 = vadd.f32 %v8637_v37, %v9412_v9  ;;  %v5119_v39 = vpop.f32.mrf.mxu0 }
 0x536   : > { %6271 = vmatmul.msk.f32.gmra.mxu1 %vm352_vm2, %v5227_v32 }
 0x537   : > { %v5490_v16 = vmul.f32 %v8836_v51, %v5454_v43  ;;  %v4571_v13 = vpop.f32.mrf.mxu2  ;;  %v4631_v32 = vadd.f32 %v8908_v38, %v4356_v58 }
 0x539   : > { %v5526_v50 = vadd.f32 %v8842_v11, %v5490_v16  ;;  %v5181_v16 = vadd.f32 %v8905_v10, %v4906_v36 }
 0x53b   : > { %v5558_v53 = vmax.f32 %v5526_v50, 0.0  ;;  %v4907_v50 = vadd.f32 %v8916_v31, %v4631_v32  ;;  %v4847_v37 = vpop.f32.mrf.mxu3 }
 0x53c   : > { %v5379_v45 = vpop.f32.mrf.mxu1 }
 0x53d   : > { %5590 = vst.msk [vmem:[%s8854_s17 + $0x48] sm:$0xff] %vm352_vm2, %v5558_v53  ;;  %v5455_v7 = vadd.f32 %v5379_v45, %v5180_v21  ;;  %v9413_v53 = vld [vmem:[#allocation64_spill] sm:$0xff]  ;;  %v5122_v45 = vpop.f32.mrf.mxu0 }
 0x53e   : > { %6272 = vmatmul.msk.f32.gmra.mxu1 %vm352_vm2, %v5228_v19  ;;  %v4357_v21 = vadd.f32 %v8649_v1, %v9413_v53  ;;  %v5182_v19 = vadd.f32 %v8922_v22, %v4907_v50  ;;  %v4358_v1 = vadd.f32 %v8662_v60, %v8446_v46  ;;  %v4359_v46 = vadd.f32 %v8677_v61, %v8457_v18 }
 0x53f   : > { %v5491_v8 = vmul.f32 %v8836_v51, %v5455_v7  ;;  %v4574_v36 = vpop.f32.mrf.mxu2  ;;  %v4360_v61 = vadd.f32 %v8692_v40, %v8469_v12  ;;  %v4361_v12 = vadd.f32 %v8704_v0, %v8481_v59 }
 0x540   : > { %v4632_v10 = vadd.f32 %v8926_v49, %v4357_v21  ;;  %v4633_v22 = vadd.f32 %v8944_v54, %v4358_v1  ;;  %v4634_v54 = vadd.f32 %v4568_v57, %v4359_v46  ;;  %v5232_v21 = vld [vmem:[#allocation3 + $0x229] sm:$0xff] }
 0x541   : > { %v5527_v43 = vadd.f32 %v8842_v11, %v5491_v8 }
 0x542   : > { %v4908_v9 = vadd.f32 %v8936_v52, %v4632_v10 }
 0x543   : > { %v5559_v28 = vmax.f32 %v5527_v43, 0.0  ;;  %v4850_v43 = vpop.f32.mrf.mxu3 }
 0x544   : > { %v5382_v44 = vpop.f32.mrf.mxu1 }
 0x545   : > { %5591 = vst.msk [vmem:[%s8854_s17 + $0x50] sm:$0xff] %vm352_vm2, %v5559_v28  ;;  %v5456_v25 = vadd.f32 %v5382_v44, %v5181_v16  ;;  %v5183_v28 = vadd.f32 %v8940_v30, %v4908_v9  ;;  %v5125_v44 = vpop.f32.mrf.mxu0 }
 0x546   : > { %6273 = vmatmul.msk.f32.gmra.mxu1 %vm352_vm2, %v5229_v17  ;;  %v4909_v17 = vadd.f32 %v4841_v2, %v4633_v22 }
 0x547   : > { %v5492_v27 = vmul.f32 %v8836_v51, %v5456_v25  ;;  %v4577_v25 = vpop.f32.mrf.mxu2 }
 0x548   : > { %v5184_v50 = vadd.f32 %v8957_v35, %v4909_v17  ;;  %v4635_v35 = vadd.f32 %v4571_v13, %v4360_v61 }
 0x549   : > { %v5528_v38 = vadd.f32 %v8842_v11, %v5492_v27 }
 0x54b   : > { %v5560_v7 = vmax.f32 %v5528_v38, 0.0  ;;  %v4853_v27 = vpop.f32.mrf.mxu3  ;;  %v4910_v38 = vadd.f32 %v4844_v15, %v4634_v54 }
 0x54c   : > { %v5385_v8 = vpop.f32.mrf.mxu1 }
 0x54d   : > { %5592 = vst.msk [vmem:[%s8854_s17 + $0x58] sm:$0xff] %vm352_vm2, %v5560_v7  ;;  %v5457_v31 = vadd.f32 %v5385_v8, %v5182_v19  ;;  %v5128_v10 = vpop.f32.mrf.mxu0  ;;  %v5185_v19 = vadd.f32 %v5119_v39, %v4910_v38  ;;  %v4636_v39 = vadd.f32 %v4574_v36, %v4361_v12 }
 0x54e   : > { %6274 = vmatmul.msk.f32.gmra.mxu1 %vm352_vm2, %v8807_v56 }
 0x54f   : > { %v5493_v58 = vmul.f32 %v8836_v51, %v5457_v31  ;;  %v4580_v18 = vpop.f32.mrf.mxu2  ;;  %v5233_v31 = vld [vmem:[#allocation3 + $0x231] sm:$0xff] }
 0x551   : > { %v5529_v49 = vadd.f32 %v8842_v11, %v5493_v58  ;;  %v4911_v58 = vadd.f32 %v4847_v37, %v4635_v35  ;;  %v4912_v37 = vadd.f32 %v4850_v43, %v4636_v39  ;;  %v4364_v35 = vadd.f32 %v8740_v63, %v8520_v34 }
 0x553   : > { %v5561_v32 = vmax.f32 %v5529_v49, 0.0  ;;  %v4856_v9 = vpop.f32.mrf.mxu3  ;;  %v5187_v36 = vadd.f32 %v5125_v44, %v4912_v37 }
 0x554   : > { %v5388_v16 = vpop.f32.mrf.mxu1 }
 0x555   : > { %5593 = vst.msk [vmem:[%s8854_s17 + $0x60] sm:$0xff] %vm352_vm2, %v5561_v32  ;;  %v5458_v52 = vadd.f32 %v5388_v16, %v5183_v28  ;;  %v5131_v40 = vpop.f32.mrf.mxu0  ;;  %v5186_v32 = vadd.f32 %v5122_v45, %v4911_v58 }
 0x556   : > { %6275 = vmatmul.msk.f32.gmra.mxu1 %vm352_vm2, %v8818_v42 }
 0x557   : > { %v5494_v56 = vmul.f32 %v8836_v51, %v5458_v52  ;;  %v4583_v49 = vpop.f32.mrf.mxu2 }
 0x559   : > { %v5530_v60 = vadd.f32 %v8842_v11, %v5494_v56  ;;  %v4362_v56 = vadd.f32 %v8716_v23, %v8494_v62 }
 0x55b   : > { %v5562_v30 = vmax.f32 %v5530_v60, 0.0  ;;  %v4859_v17 = vpop.f32.mrf.mxu3  ;;  %v4637_v0 = vadd.f32 %v4577_v25, %v4362_v56 }
 0x55c   : > { %v5391_v53 = vpop.f32.mrf.mxu1 }
 0x55d   : > { %5594 = vst.msk [vmem:[%s8854_s17 + $0x68] sm:$0xff] %vm352_vm2, %v5562_v30  ;;  %v5459_v2 = vadd.f32 %v5391_v53, %v5184_v50  ;;  %v5134_v46 = vpop.f32.mrf.mxu0  ;;  %v4913_v50 = vadd.f32 %v4853_v27, %v4637_v0  ;;  %v4363_v53 = vadd.f32 %v8728_v33, %v8507_v47  ;;  %v4639_v33 = vadd.f32 %v4583_v49, %v4364_v35 }
 0x55e   : > { %6276 = vmatmul.msk.f32.gmra.mxu1 %vm352_vm2, %v5232_v21 }
 0x55f   : > { %v5495_v42 = vmul.f32 %v8836_v51, %v5459_v2  ;;  %v4586_v54 = vpop.f32.mrf.mxu2  ;;  %v4638_v21 = vadd.f32 %v4580_v18, %v4363_v53  ;;  %v5188_v2 = vadd.f32 %v5128_v10, %v4913_v50 }
 0x561   : > { %v5531_v57 = vadd.f32 %v8842_v11, %v5495_v42 }
 0x563   : > { %v5563_v7 = vmax.f32 %v5531_v57, 0.0  ;;  %v4862_v23 = vpop.f32.mrf.mxu3  ;;  %v4914_v57 = vadd.f32 %v4856_v9, %v4638_v21  ;;  %v4368_v21 = vadd.f32 %v8779_v29, %v8571_v14 }
 0x564   : > { %v5394_v8 = vpop.f32.mrf.mxu1 }
 0x565   : > { %5595 = vst.msk [vmem:[%s8854_s17 + $0x70] sm:$0xff] %vm352_vm2, %v5563_v7  ;;  %v5460_v15 = vadd.f32 %v5394_v8, %v5185_v19  ;;  %v5137_v44 = vpop.f32.mrf.mxu0  ;;  %v5189_v18 = vadd.f32 %v5131_v40, %v4914_v57 }
 0x566   : > { %6277 = vmatmul.msk.f32.gmra.mxu1 %vm352_vm2, %v5233_v31  ;;  %v4915_v31 = vadd.f32 %v4859_v17, %v4639_v33 }
 0x567   : > { %v5496_v1 = vmul.f32 %v8836_v51, %v5460_v15  ;;  %v4589_v61 = vpop.f32.mrf.mxu2 }
 0x569   : > { %v5532_v13 = vadd.f32 %v8842_v11, %v5496_v1  ;;  %v4365_v1 = vadd.f32 %v8752_v41, %v8533_v5 }
 0x56b   : > { %v5564_v22 = vmax.f32 %v5532_v13, 0.0  ;;  %v4865_v19 = vpop.f32.mrf.mxu3  ;;  %v4640_v63 = vadd.f32 %v4586_v54, %v4365_v1  ;;  %v5190_v13 = vadd.f32 %v5134_v46, %v4915_v31 }
 0x56c   : > { %v5397_v28 = vpop.f32.mrf.mxu1 }
 0x56d   : > { %5596 = vst.msk [vmem:[%s8854_s17 + $0x78] sm:$0xff] %vm352_vm2, %v5564_v22  ;;  %v5461_v16 = vadd.f32 %v5397_v28, %v5186_v32  ;;  %v5140_v15 = vpop.f32.mrf.mxu0  ;;  %v4916_v22 = vadd.f32 %v4862_v23, %v4640_v63  ;;  %v4366_v28 = vadd.f32 %v8762_v55, %v8546_v24 }
 0x56f   : > { %v5497_v52 = vmul.f32 %v8836_v51, %v5461_v16  ;;  %v4592_v58 = vpop.f32.mrf.mxu2  ;;  %v4641_v37 = vadd.f32 %v4589_v61, %v4366_v28  ;;  %v5191_v17 = vadd.f32 %v5137_v44, %v4916_v22  ;;  %v9415_v22 = vld [vmem:[#allocation13_spill] sm:$0xff] }
 0x571   : > { %v5533_v59 = vadd.f32 %v8842_v11, %v5497_v52  ;;  %v4917_v0 = vadd.f32 %v4865_v19, %v4641_v37 }
 0x573   : > { %v5565_v60 = vmax.f32 %v5533_v59, 0.0  ;;  %v4868_v39 = vpop.f32.mrf.mxu3 }
 0x574   : > { %v5400_v45 = vpop.f32.mrf.mxu1 }
 0x575   : > { %5597 = vst.msk [vmem:[%s8854_s17 + $0x80] sm:$0xff] %vm352_vm2, %v5565_v60  ;;  %v5462_v30 = vadd.f32 %v5400_v45, %v5187_v36  ;;  %v5143_v16 = vpop.f32.mrf.mxu0  ;;  %v4367_v36 = vadd.f32 %v8770_v4, %v8559_v48 }
 0x577   : > { %v5498_v43 = vmul.f32 %v8836_v51, %v5462_v30  ;;  %v4595_v41 = vpop.f32.mrf.mxu2  ;;  %v4642_v54 = vadd.f32 %v4592_v58, %v4367_v36  ;;  %v5192_v30 = vadd.f32 %v5140_v15, %v4917_v0  ;;  %v4370_v58 = vadd.f32 %v8795_v6, %v8595_v20  ;;  %v9416_v0 = vld [vmem:[#allocation4_spill] sm:$0xff] }
 0x579   : > { %v5534_v62 = vadd.f32 %v8842_v11, %v5498_v43 }
 0x57b   : > { %v5566_v25 = vmax.f32 %v5534_v62, 0.0  ;;  %v4871_v60 = vpop.f32.mrf.mxu3  ;;  %v4918_v62 = vadd.f32 %v4868_v39, %v4642_v54  ;;  %v9414_v39 = vld [vmem:[#allocation7_spill] sm:$0xff] }
 0x57c   : > { %v5403_v38 = vpop.f32.mrf.mxu1 }
 0x57d   : > { %5598 = vst.msk [vmem:[%s8854_s17 + $0x88] sm:$0xff] %vm352_vm2, %v5566_v25  ;;  %v5463_v42 = vadd.f32 %v5403_v38, %v5188_v2  ;;  %v5146_v55 = vpop.f32.mrf.mxu0  ;;  %v4643_v25 = vadd.f32 %v4595_v41, %v4368_v21  ;;  %v5193_v38 = vadd.f32 %v5143_v16, %v4918_v62  ;;  %v9419_v21 = vld [vmem:[#allocation10_spill] sm:$0xff] }
 0x57f   : > { %v5499_v27 = vmul.f32 %v8836_v51, %v5463_v42  ;;  %v4598_v50 = vpop.f32.mrf.mxu2 }
 0x581   : > { %v5535_v47 = vadd.f32 %v8842_v11, %v5499_v27  ;;  %v4919_v27 = vadd.f32 %v4871_v60, %v4643_v25 }
 0x583   : > { %v5567_v7 = vmax.f32 %v5535_v47, 0.0  ;;  %v4874_v4 = vpop.f32.mrf.mxu3  ;;  %v4369_v47 = vadd.f32 %v8788_v3, %v8583_v26 }
 0x584   : > { %v5406_v10 = vpop.f32.mrf.mxu1 }
 0x585   : > { %5599 = vst.msk [vmem:[%s8854_s17 + $0x90] sm:$0xff] %vm352_vm2, %v5567_v7  ;;  %v5464_v8 = vadd.f32 %v5406_v10, %v5189_v18  ;;  %v5149_v42 = vpop.f32.mrf.mxu0  ;;  %v4644_v29 = vadd.f32 %v4598_v50, %v4369_v47  ;;  %v5194_v7 = vadd.f32 %v5146_v55, %v4919_v27 }
 0x587   : > { %v5500_v9 = vmul.f32 %v8836_v51, %v5464_v8  ;;  %v4601_v57 = vpop.f32.mrf.mxu2  ;;  %v4920_v31 = vadd.f32 %v4874_v4, %v4644_v29  ;;  %v9421_v29 = vld [vmem:[#allocation15_spill] sm:$0xff] }
 0x588   : > { %v4645_v3 = vadd.f32 %v4601_v57, %v4370_v58 }
 0x589   : > { %v5536_v34 = vadd.f32 %v8842_v11, %v5500_v9 }
 0x58b   : > { %v5568_v12 = vmax.f32 %v5536_v34, 0.0  ;;  %v4877_v18 = vpop.f32.mrf.mxu3  ;;  %v5195_v34 = vadd.f32 %v5149_v42, %v4920_v31 }
 0x58c   : > { %v5409_v40 = vpop.f32.mrf.mxu1 }
 0x58d   : > { %5600 = vst.msk [vmem:[%s8854_s17 + $0x98] sm:$0xff] %vm352_vm2, %v5568_v12  ;;  %v5465_v49 = vadd.f32 %v5409_v40, %v5190_v13  ;;  %v5152_v8 = vpop.f32.mrf.mxu0  ;;  %v4921_v40 = vadd.f32 %v4877_v18, %v4645_v3 }
 0x58f   : > { %v5501_v32 = vmul.f32 %v8836_v51, %v5465_v49  ;;  %v4604_v9 = vpop.f32.mrf.mxu2  ;;  %v5196_v41 = vadd.f32 %v5152_v8, %v4921_v40 }
 0x591   : > { %v5537_v5 = vadd.f32 %v8842_v11, %v5501_v32  ;;  %v4371_v32 = vadd.f32 %v9415_v22, %v9414_v39 }
 0x593   : > { %v5569_v52 = vmax.f32 %v5537_v5, 0.0  ;;  %v4880_v13 = vpop.f32.mrf.mxu3  ;;  %v4646_v16 = vadd.f32 %v4604_v9, %v4371_v32 }
 0x594   : > { %v5412_v56 = vpop.f32.mrf.mxu1 }
 0x595   : > { %5601 = vst.msk [vmem:[%s8854_s17 + $0xa0] sm:$0xff] %vm352_vm2, %v5569_v52  ;;  %v5466_v59 = vadd.f32 %v5412_v56, %v5191_v17  ;;  %v5155_v28 = vpop.f32.mrf.mxu0  ;;  %v4922_v17 = vadd.f32 %v4880_v13, %v4646_v16 }
 0x597   : > { %v5502_v46 = vmul.f32 %v8836_v51, %v5466_v59  ;;  %v4607_v6 = vpop.f32.mrf.mxu2 }
 0x599   : > { %v5538_v24 = vadd.f32 %v8842_v11, %v5502_v46  ;;  %v9417_v46 = vld [vmem:[#allocation6_spill] sm:$0xff] }
 0x59a   : > { %v4372_v60 = vadd.f32 %v9417_v46, %v9416_v0 }
 0x59b   : > { %v5570_v45 = vmax.f32 %v5538_v24, 0.0  ;;  %v4883_v59 = vpop.f32.mrf.mxu3 }
 0x59c   : > { %v5415_v43 = vpop.f32.mrf.mxu1  ;;  %v4647_v55 = vadd.f32 %v4607_v6, %v4372_v60 }
 0x59d   : > { %5602 = vst.msk [vmem:[%s8854_s17 + $0xa8] sm:$0xff] %vm352_vm2, %v5570_v45  ;;  %v5467_v53 = vadd.f32 %v5415_v43, %v5192_v30  ;;  %v5158_v24 = vpop.f32.mrf.mxu0  ;;  %v5197_v45 = vadd.f32 %v5155_v28, %v4922_v17 }
 0x59f   : > { %v5503_v23 = vmul.f32 %v8836_v51, %v5467_v53  ;;  %v4610_v30 = vpop.f32.mrf.mxu2  ;;  %v4923_v53 = vadd.f32 %v4883_v59, %v4647_v55 }
 0x5a1   : > { %v5539_v48 = vadd.f32 %v8842_v11, %v5503_v23  ;;  %v9418_v23 = vld [vmem:[#allocation8_spill] sm:$0xff] }
 0x5a3   : > { %v5571_v2 = vmax.f32 %v5539_v48, 0.0  ;;  %v4373_v48 = vadd.f32 %v9419_v21, %v9418_v23  ;;  %v4886_v25 = vpop.f32.mrf.mxu3 }
 0x5a4   : > { %v5418_v44 = vpop.f32.mrf.mxu1 }
 0x5a5   : > { %5603 = vst.msk [vmem:[%s8854_s17 + $0xb0] sm:$0xff] %vm352_vm2, %v5571_v2  ;;  %v5468_v61 = vadd.f32 %v5418_v44, %v5193_v38  ;;  %v4648_v2 = vadd.f32 %v4610_v30, %v4373_v48  ;;  %v5198_v44 = vadd.f32 %v5158_v24, %v4923_v53  ;;  %v5161_v57 = vpop.f32.mrf.mxu0 }
 0x5a7   : > { %v5504_v35 = vmul.f32 %v8836_v51, %v5468_v61  ;;  %v4613_v27 = vpop.f32.mrf.mxu2 }
 0x5a9   : > { %v5540_v14 = vadd.f32 %v8842_v11, %v5504_v35  ;;  %v4924_v35 = vadd.f32 %v4886_v25, %v4648_v2 }
 0x5ab   : > { %v5572_v33 = vmax.f32 %v5540_v14, 0.0  ;;  %v9420_v14 = vld [vmem:[#allocation5_spill] sm:$0xff]  ;;  %v4889_v18 = vpop.f32.mrf.mxu3  ;;  %v5199_v8 = vadd.f32 %v5161_v57, %v4924_v35 }
 0x5ac   : > { %v5421_v19 = vpop.f32.mrf.mxu1 }
 0x5ad   : > { %5604 = vst.msk [vmem:[%s8854_s17 + $0xb8] sm:$0xff] %vm352_vm2, %v5572_v33  ;;  %v5469_v10 = vadd.f32 %v5421_v19, %v5194_v7  ;;  %v4374_v33 = vadd.f32 %v9421_v29, %v9420_v14  ;;  %v5164_v9 = vpop.f32.mrf.mxu0 }
 0x5af   : > { %v5505_v15 = vmul.f32 %v8836_v51, %v5469_v10  ;;  %v4649_v19 = vadd.f32 %v4613_v27, %v4374_v33  ;;  %v4616_v3 = vpop.f32.mrf.mxu2 }
 0x5b1   : > { %v5541_v26 = vadd.f32 %v8842_v11, %v5505_v15  ;;  %v4925_v58 = vadd.f32 %v4889_v18, %v4649_v19 }
 0x5b3   : > { %v5573_v1 = vmax.f32 %v5541_v26, 0.0  ;;  %v5200_v13 = vadd.f32 %v5164_v9, %v4925_v58  ;;  %v4892_v39 = vpop.f32.mrf.mxu3 }
 0x5b4   : > { %v5424_v63 = vpop.f32.mrf.mxu1 }
 0x5b5   : > { %5605 = vst.msk [vmem:[%s8854_s17 + $0xc0] sm:$0xff] %vm352_vm2, %v5573_v1  ;;  %v5470_v12 = vadd.f32 %v5424_v63, %v5195_v34  ;;  %v9422_v1 = vld [vmem:[#allocation9_spill] sm:$0xff]  ;;  %v9423_v34 = vld [vmem:[#allocation11_spill] sm:$0xff]  ;;  %v5167_v6 = vpop.f32.mrf.mxu0 }
 0x5b6   : > { %v4375_v63 = vadd.f32 %v9423_v34, %v9422_v1 }
 0x5b7   : > { %v5506_v49 = vmul.f32 %v8836_v51, %v5470_v12 }
 0x5b8   : > { %v4650_v40 = vadd.f32 %v4616_v3, %v4375_v63 }
 0x5b9   : > { %v5542_v20 = vadd.f32 %v8842_v11, %v5506_v49 }
 0x5ba   : > { %v4926_v28 = vadd.f32 %v4892_v39, %v4650_v40 }
 0x5bb   : > { %v5574_v5 = vmax.f32 %v5542_v20, 0.0 }
 0x5bc   : > { %v5427_v37 = vpop.f32.mrf.mxu1 }
 0x5bd   : > { %5606 = vst.msk [vmem:[%s8854_s17 + $0xc8] sm:$0xff] %vm352_vm2, %v5574_v5  ;;  %v5471_v52 = vadd.f32 %v5427_v37, %v5196_v41  ;;  %v5201_v5 = vadd.f32 %v5167_v6, %v4926_v28 }
 0x5bf   : > { %v5507_v56 = vmul.f32 %v8836_v51, %v5471_v52 }
 0x5c1   : > { %v5543_v36 = vadd.f32 %v8842_v11, %v5507_v56 }
 0x5c3   : > { %v5575_v54 = vmax.f32 %v5543_v36, 0.0 }
 0x5c4   : > { %v5430_v50 = vpop.f32.mrf.mxu1 }
 0x5c5   : > { %5607 = vst.msk [vmem:[%s8854_s17 + $0xd0] sm:$0xff] %vm352_vm2, %v5575_v54  ;;  %v5472_v43 = vadd.f32 %v5430_v50, %v5197_v45 }
 0x5c7   : > { %v5508_v62 = vmul.f32 %v8836_v51, %v5472_v43 }
 0x5c9   : > { %v5544_v4 = vadd.f32 %v8842_v11, %v5508_v62 }
 0x5cb   : > { %v5576_v38 = vmax.f32 %v5544_v4, 0.0 }
 0x5cc   : > { %v5433_v42 = vpop.f32.mrf.mxu1 }
 0x5cd   : > { %5608 = vst.msk [vmem:[%s8854_s17 + $0xd8] sm:$0xff] %vm352_vm2, %v5576_v38  ;;  %v5473_v61 = vadd.f32 %v5433_v42, %v5198_v44 }
 0x5cf   : > { %v5509_v47 = vmul.f32 %v8836_v51, %v5473_v61 }
 0x5d1   : > { %v5545_v7 = vadd.f32 %v8842_v11, %v5509_v47 }
 0x5d3   : > { %v5577_v10 = vmax.f32 %v5545_v7, 0.0 }
 0x5d4   : > { %v5436_v31 = vpop.f32.mrf.mxu1 }
 0x5d5   : > { %5609 = vst.msk [vmem:[%s8854_s17 + $0xe0] sm:$0xff] %vm352_vm2, %v5577_v10  ;;  %v5474_v15 = vadd.f32 %v5436_v31, %v5199_v8 }
 0x5d7   : > { %v5510_v26 = vmul.f32 %v8836_v51, %v5474_v15 }
 0x5d9   : > { %v5546_v12 = vadd.f32 %v8842_v11, %v5510_v26 }
 0x5db   : > { %v5578_v49 = vmax.f32 %v5546_v12, 0.0 }
 0x5dc   : > { %v5439_v22 = vpop.f32.mrf.mxu1 }
 0x5dd   : > { %5610 = vst.msk [vmem:[%s8854_s17 + $0xe8] sm:$0xff] %vm352_vm2, %v5578_v49  ;;  %v5475_v32 = vadd.f32 %v5439_v22, %v5200_v13 }
 0x5df   : > { %v5511_v20 = vmul.f32 %v8836_v51, %v5475_v32 }
 0x5e1   : > { %v5547_v16 = vadd.f32 %v8842_v11, %v5511_v20 }
 0x5e3   : > { %v5579_v41 = vmax.f32 %v5547_v16, 0.0 }
 0x5e4   : > { %v5442_v37 = vpop.f32.mrf.mxu1 }
 0x5e5   : > { %5611 = vst.msk [vmem:[%s8854_s17 + $0xf0] sm:$0xff] %vm352_vm2, %v5579_v41  ;;  %v5476_v52 = vadd.f32 %v5442_v37, %v5201_v5 }
 0x5e7   : > { %v5512_v17 = vmul.f32 %v8836_v51, %v5476_v52 }
 0x5e9   : > { %v5548_v56 = vadd.f32 %v8842_v11, %v5512_v17 }
 0x5eb   : > { %v5580_v59 = vmax.f32 %v5548_v56, 0.0 }
 0x5ed   : > { %5612 = vst.msk [vmem:[%s8854_s17 + $0xf8] sm:$0xff] %vm352_vm2, %v5580_v59 }
 0x5ee PF: > { %s17_s24 = sadd.s32 1, %s6308_s24  }
 0x5ef   : > { %p14_p4 = scmp.ge.s32.totalorder %s17_s24, 4  }
 0x5f1   :  { %16 = sbr.rel (!%p14_p4) target bundleno = 1 (0x1), region = 98 }

</bundles_post_ra>
